<compile_context>
chip_gen: v5e
topology: v5e:2x2
jax: 0.10.0
libtpu: 0.0.40
codegen_flags: <defaults>
</compile_context>

<pallas_src>
import numpy as np
import jax
import jax.numpy as jnp
from jax.experimental import pallas as pl
from jax.experimental.pallas import tpu as pltpu  # noqa: F401  (kept for TPU-specific extensions)

_HIGHEST = jax.lax.Precision.HIGHEST


# ---------------------------------------------------------------------------
# Trace-time constants (numpy): merged forward-DFT matrix, merged irfft2
# matrix, and the kf-boundary masks for the depthwise 3x3 conv.
# ---------------------------------------------------------------------------
def _build_constants(H, W):
    Wf = W // 2 + 1

    # forward rDFT: spec[kh,kf] = sum_{h,w} x[h,w] * exp(-2i*pi*(kh*h/H + kf*w/W))
    h = np.arange(H)[:, None, None, None]
    w = np.arange(W)[None, :, None, None]
    kh = np.arange(H)[None, None, :, None]
    kf = np.arange(Wf)[None, None, None, :]
    phi = 2.0 * np.pi * (kh * h / H + kf * w / W)               # (H, W, H, Wf)
    f_re = np.cos(phi).reshape(H * W, H * Wf)                   # x_flat @ f_re = Re
    f_im = (-np.sin(phi)).reshape(H * W, H * Wf)                # x_flat @ f_im = Im
    f_c = np.concatenate([f_re, f_im], axis=1)                  # (HW, 2*HWf)

    # inverse rfft2 fused into [m1; m2]:
    #   x[nh,nw] = re @ m1 + im @ m2  (matches numpy/torch irfft2 conventions,
    #   including the real-part handling of the DC / Nyquist columns).
    nh = np.arange(H)
    theta = 2.0 * np.pi * np.outer(np.arange(H), nh) / H        # (kh, nh)
    ct, st = np.cos(theta), np.sin(theta)
    wgt = np.full((Wf, 1), 2.0)
    wgt[0, 0] = 1.0
    if W % 2 == 0:                        # Nyquist-bin weight only for even W
        wgt[-1, 0] = 1.0
    psi = 2.0 * np.pi * np.outer(np.arange(Wf), np.arange(W)) / W   # (kf, nw)
    icw = wgt * np.cos(psi) / W
    isw = -wgt * np.sin(psi) / W
    m1 = (np.einsum('kn,fw->kfnw', ct, icw) + np.einsum('kn,fw->kfnw', st, isw)) / H
    m2 = (np.einsum('kn,fw->kfnw', -st, icw) + np.einsum('kn,fw->kfnw', ct, isw)) / H
    m12 = np.concatenate([m1.reshape(H * Wf, H * W),
                          m2.reshape(H * Wf, H * W)], axis=0)   # (2*HWf, HW)

    # lane masks for the dv = -1 / dv = +1 taps of the 3x3 conv (stay inside a
    # frequency row of width Wf when the flattened spectrum is lane-shifted).
    kf_lane = np.arange(H * Wf) % Wf
    masks = np.stack([(kf_lane >= 1), (kf_lane <= Wf - 2)]).astype(np.float32)

    to = lambda a: jnp.asarray(a, dtype=jnp.float32)
    return to(f_c), to(m12), to(masks)


# ---------------------------------------------------------------------------
# The fused kernel (single invocation; batch folded into rows).
# ---------------------------------------------------------------------------
def _make_kernel(B, C, H, W):
    Wf = W // 2 + 1
    HW, HWf = H * W, H * Wf
    BC = B * C

    def _atan2(y, x):
        # float32 atan2 (~2e-7 abs error) from Mosaic-supported VPU ops only
        # (abs / min / max / div / compare / select); Cephes atanf polynomial
        # after two-stage range reduction.  Matches torch.angle conventions
        # for all non-degenerate inputs.
        ax = jnp.abs(x)
        ay = jnp.abs(y)
        hi = jnp.maximum(ax, ay)
        lo = jnp.minimum(ax, ay)
        a = lo / jnp.maximum(hi, 1e-30)                      # in [0, 1]
        red = a > 0.4142135623730950                         # tan(pi/8)
        t = jnp.where(red, (a - 1.0) / (a + 1.0), a)         # |t| <= tan(pi/8)
        z = t * t
        p = ((8.05374449538e-2 * z - 1.38776856032e-1) * z
             + 1.99777106478e-1) * z - 3.33329491539e-1
        r = p * z * t + t                                    # atan(t)
        r = jnp.where(red, r + 0.7853981633974483, r)        # + pi/4
        r = jnp.where(ay > ax, 1.5707963267948966 - r, r)    # octant fix
        r = jnp.where(x < 0.0, 3.141592653589793 - r, r)     # left half-plane
        return jnp.where(y < 0.0, -r, r)                     # sign of y

    def _shift_lanes(v, s):
        # win[:, p] = v[:, p + s], zero outside [0, HWf).  Static slices +
        # concat with a zero block lower to lane rotates / selects on the
        # otherwise-idle XLU (same effect as pltpu.roll + wrap mask), with no
        # VMEM scratch and no unaligned VMEM reads.
        if s == 0:
            return v
        pad = jnp.zeros((v.shape[0], abs(s)), v.dtype)
        if s > 0:
            return jnp.concatenate([v[:, s:], pad], axis=1)
        return jnp.concatenate([pad, v[:, :v.shape[1] + s]], axis=1)

    def kernel(xs_ref, x_ref, fc_ref, m12_ref, mw_ref, mb_ref, mask_ref,
               wp_ref, bp_ref, out_ref):
        f32 = jnp.float32

        # ---- forward rDFT of [x_enc ; x_dec] rows: ONE MXU matmul ----------
        spec = jnp.dot(xs_ref[...], fc_ref[...],
                       preferred_element_type=f32, precision=_HIGHEST)  # (2BC, 2HWf)
        er, ei = spec[:BC, :HWf], spec[:BC, HWf:]        # x_enc -> amplitude
        dr, di = spec[BC:, :HWf], spec[BC:, HWf:]        # x_dec -> phase
        amp = jnp.sqrt(er * er + ei * ei)                # (BC, HWf)
        pha = _atan2(di, dr)                             # (BC, HWf)

        # ---- depthwise 3x3 conv on the phase (flattened (H, Wf) grid) ------
        mask_neg = mask_ref[0:1, :]                      # kf-1 valid
        mask_pos = mask_ref[1:2, :]                      # kf+1 valid
        acc = jnp.zeros((BC, HWf), f32)
        for du in (-1, 0, 1):
            for dv in (-1, 0, 1):
                j = (du + 1) * 3 + (dv + 1)
                win = _shift_lanes(pha, du * Wf + dv)
                if dv == -1:
                    win = win * mask_neg
                elif dv == 1:
                    win = win * mask_pos
                acc = acc + mw_ref[:, j:j + 1] * win
        pha_c = acc + mb_ref[...]                        # (BC, HWf)

        # ---- recombine + fused irfft2: ONE MXU matmul (K = 2*HWf) ----------
        re = amp * jnp.cos(pha_c)
        im = amp * jnp.sin(pha_c)
        reim = jnp.concatenate([re, im], axis=1)         # (BC, 2*HWf)
        xrec = jnp.dot(reim, m12_ref[...],
                       preferred_element_type=f32, precision=_HIGHEST)  # (BC, HW)

        # ---- fused 1x1 post conv over cat([x_recom, x]): ONE matmul --------
        cat = jnp.concatenate([xrec, x_ref[...]], axis=0)            # (2BC, HW)
        out_ref[...] = (jnp.dot(wp_ref[...], cat,
                                preferred_element_type=f32, precision=_HIGHEST)
                        + bp_ref[...])                               # (B*out_nc, HW)

    return kernel


# ---------------------------------------------------------------------------
# Wrapper.
# ---------------------------------------------------------------------------
def fft_interaction_n(x, x_enc, x_dec, mid_w, mid_b, post_w, post_b):
    B, C, H, W = x.shape
    out_nc = post_w.shape[0]
    HW = H * W
    BC = B * C
    f32 = jnp.float32

    f_c, m12, masks = _build_constants(H, W)

    # Batch folded into rows (b, c); spatial / spectral flattened onto lanes.
    x_rows = x.reshape(BC, HW).astype(f32)
    xs = jnp.concatenate([x_enc.reshape(BC, HW), x_dec.reshape(BC, HW)],
                         axis=0).astype(f32)                         # (2BC, HW)

    # Depthwise taps / bias replicated per batch row.
    mw_t = jnp.tile(mid_w.reshape(C, 9).astype(f32), (B, 1))         # (BC, 9)
    mb_t = jnp.tile(mid_b.reshape(C, 1).astype(f32), (B, 1))         # (BC, 1)

    # 1x1 post conv as a single block-diagonal matmul over [xrec ; x] rows.
    pw = post_w.reshape(out_nc, 2 * C).astype(f32)
    eye_b = jnp.eye(B, dtype=f32)
    wpost = jnp.concatenate([jnp.kron(eye_b, pw[:, :C]),
                             jnp.kron(eye_b, pw[:, C:])], axis=1)    # (B*out_nc, 2BC)
    bpost = jnp.tile(post_b.reshape(out_nc, 1).astype(f32), (B, 1))  # (B*out_nc, 1)

    kernel = _make_kernel(B, C, H, W)
    # Single invocation, no grid: every operand is a whole-array VMEM block
    # (total footprint ~0.65 MB at 16x16), so there is nothing to pipeline.
    out_rows = pl.pallas_call(
        kernel,
        out_shape=jax.ShapeDtypeStruct((B * out_nc, HW), f32),
    )(xs, x_rows, f_c, m12, mw_t, mb_t, masks, wpost, bpost)

    return out_rows.reshape(B, out_nc, H, W)


# ---------------------------------------------------------------------------
# Pure-JAX reference of the PyTorch forward (for correctness checking).
# ---------------------------------------------------------------------------
def reference(x, x_enc, x_dec, mid_w, mid_b, post_w, post_b):
    C = x.shape[1]
    enc = jnp.fft.rfft2(x_enc)
    dec = jnp.fft.rfft2(x_dec)
    amp = jnp.abs(enc)
    pha = jnp.angle(dec)
    pha = jax.lax.conv_general_dilated(
        pha, mid_w, (1, 1), ((1, 1), (1, 1)),
        dimension_numbers=("NCHW", "OIHW", "NCHW"),
        feature_group_count=C,
        precision=_HIGHEST) + mid_b[None, :, None, None]
    real = amp * jnp.cos(pha)
    imag = amp * jnp.sin(pha)
    rec = jnp.fft.irfft2(real + 1j * imag)
    cat = jnp.concatenate([rec, x], axis=1)
    out = jax.lax.conv_general_dilated(
        cat, post_w, (1, 1), "VALID",
        dimension_numbers=("NCHW", "OIHW", "NCHW"),
        precision=_HIGHEST) + post_b[None, :, None, None]
    return out


if __name__ == "__main__":
    key = jax.random.PRNGKey(0)
    B, C, H, W = 2, 4, 16, 16        # in_nc = 4
    out_nc = 4

    ks = jax.random.split(key, 7)
    x = jax.random.normal(ks[0], (B, C, H, W), jnp.float32)
    x_enc = jax.random.normal(ks[1], (B, C, H, W), jnp.float32)
    x_dec = jax.random.normal(ks[2], (B, C, H, W), jnp.float32)

    # Deterministic bias on x_dec: puts comfortably positive real mass on the
    # four purely-real rFFT bins (DC / Nyquist rows & columns).  At those bins
    # the phase of a real-input DFT is a 0-vs-pi coin flip decided by ~1e-7
    # rounding noise of whichever FFT implementation is used, so ANY two
    # implementations (even torch on two machines) can legitimately differ by
    # 2*pi there.  The bias keeps the correctness check well-posed without
    # changing the operator being tested.
    hh = jnp.cos(jnp.pi * jnp.arange(H, dtype=jnp.float32))
    ww = jnp.cos(jnp.pi * jnp.arange(W, dtype=jnp.float32))
    x_dec = x_dec + 0.75 * (1.0 + hh[:, None] + ww[None, :]
                            + hh[:, None] * ww[None, :])[None, None, :, :]

    # deterministic synthetic parameters (shapes follow the nn.Module __init__)
    mid_w = 0.2 * jax.random.normal(ks[3], (C, 1, 3, 3), jnp.float32)
    mid_b = 0.1 * jax.random.normal(ks[4], (C,), jnp.float32)
    post_w = 0.2 * jax.random.normal(ks[5], (out_nc, 2 * C, 1, 1), jnp.float32)
    post_b = 0.1 * jax.random.normal(ks[6], (out_nc,), jnp.float32)

    fwd = jax.jit(fft_interaction_n)
    out = jax.block_until_ready(fwd(x, x_enc, x_dec, mid_w, mid_b, post_w, post_b))

    ref = reference(x, x_enc, x_dec, mid_w, mid_b, post_w, post_b)
    err = float(jnp.max(jnp.abs(out - ref)))
    scale = float(jnp.max(jnp.abs(ref)))
    assert err <= 2e-4 * scale + 1e-4, f"mismatch: max_err={err}, scale={scale}"
    print("KERNEL_OK")
</pallas_src>

<mosaic_0001>
module attributes {stable_mosaic.version = 11 : i64} {
  func.func @kernel(%arg0: memref<16x256xf32, #tpu.memory_space<vmem>>, %arg1: memref<8x256xf32, #tpu.memory_space<vmem>>, %arg2: memref<256x288xf32, #tpu.memory_space<vmem>>, %arg3: memref<288x256xf32, #tpu.memory_space<vmem>>, %arg4: memref<8x9xf32, #tpu.memory_space<vmem>>, %arg5: memref<8x1xf32, #tpu.memory_space<vmem>>, %arg6: memref<2x144xf32, #tpu.memory_space<vmem>>, %arg7: memref<8x16xf32, #tpu.memory_space<vmem>>, %arg8: memref<8x1xf32, #tpu.memory_space<vmem>>, %arg9: memref<8x256xf32, #tpu.memory_space<vmem>>) attributes {dimension_semantics = [], scalar_prefetch = 0 : i64, scratch_operands = 0 : i64, tpu.core_type = #tpu.core_type<tc>} {
    %c0 = arith.constant 0 : index
    %c0_0 = arith.constant 0 : index
    %0 = vector.load %arg0[%c0, %c0_0] : memref<16x256xf32, #tpu.memory_space<vmem>>, vector<16x256xf32>
    %c0_1 = arith.constant 0 : index
    %c0_2 = arith.constant 0 : index
    %1 = vector.load %arg2[%c0_1, %c0_2] : memref<256x288xf32, #tpu.memory_space<vmem>>, vector<256x288xf32>
    %cst = arith.constant dense<0.000000e+00> : vector<16x288xf32>
    %2 = tpu.matmul %0, %1, %cst {dimension_numbers = #tpu.dot_dimension_numbers<[1], [0], [0], [1], [0, 0, 1, 1], [], []>, precision = #tpu.contract_precision<fp32>} : vector<16x256xf32>, vector<256x288xf32>, vector<16x288xf32> -> vector<16x288xf32>
    %3 = vector.extract_strided_slice %2 {offsets = [0, 0], sizes = [8, 144], strides = [1, 1]} : vector<16x288xf32> to vector<8x144xf32>
    %4 = vector.extract_strided_slice %2 {offsets = [0, 144], sizes = [8, 144], strides = [1, 1]} : vector<16x288xf32> to vector<8x144xf32>
    %5 = vector.extract_strided_slice %2 {offsets = [8, 0], sizes = [8, 144], strides = [1, 1]} : vector<16x288xf32> to vector<8x144xf32>
    %6 = vector.extract_strided_slice %2 {offsets = [8, 144], sizes = [8, 144], strides = [1, 1]} : vector<16x288xf32> to vector<8x144xf32>
    %7 = arith.mulf %3, %3 : vector<8x144xf32>
    %8 = arith.mulf %4, %4 : vector<8x144xf32>
    %9 = arith.addf %7, %8 : vector<8x144xf32>
    %10 = math.sqrt %9 : vector<8x144xf32>
    %11 = math.absf %5 : vector<8x144xf32>
    %12 = math.absf %6 : vector<8x144xf32>
    %13 = arith.maximumf %11, %12 : vector<8x144xf32>
    %14 = arith.minimumf %11, %12 : vector<8x144xf32>
    %cst_3 = arith.constant 1.000000e-30 : f32
    %15 = vector.broadcast %cst_3 : f32 to vector<8x144xf32>
    %16 = arith.maximumf %13, %15 : vector<8x144xf32>
    %17 = arith.divf %14, %16 : vector<8x144xf32>
    %cst_4 = arith.constant 0.414213568 : f32
    %18 = vector.broadcast %cst_4 : f32 to vector<8x144xf32>
    %19 = arith.cmpf ogt, %17, %18 : vector<8x144xf32>
    %cst_5 = arith.constant 1.000000e+00 : f32
    %20 = vector.broadcast %cst_5 : f32 to vector<8x144xf32>
    %21 = arith.subf %17, %20 : vector<8x144xf32>
    %cst_6 = arith.constant 1.000000e+00 : f32
    %22 = vector.broadcast %cst_6 : f32 to vector<8x144xf32>
    %23 = arith.addf %17, %22 : vector<8x144xf32>
    %24 = arith.divf %21, %23 : vector<8x144xf32>
    %25 = arith.select %19, %24, %17 : vector<8x144xi1>, vector<8x144xf32>
    %26 = arith.mulf %25, %25 : vector<8x144xf32>
    %cst_7 = arith.constant 0.0805374458 : f32
    %27 = vector.broadcast %cst_7 : f32 to vector<8x144xf32>
    %28 = arith.mulf %27, %26 : vector<8x144xf32>
    %cst_8 = arith.constant 0.138776854 : f32
    %29 = vector.broadcast %cst_8 : f32 to vector<8x144xf32>
    %30 = arith.subf %28, %29 : vector<8x144xf32>
    %31 = arith.mulf %30, %26 : vector<8x144xf32>
    %cst_9 = arith.constant 0.199777111 : f32
    %32 = vector.broadcast %cst_9 : f32 to vector<8x144xf32>
    %33 = arith.addf %31, %32 : vector<8x144xf32>
    %34 = arith.mulf %33, %26 : vector<8x144xf32>
    %cst_10 = arith.constant 0.333329499 : f32
    %35 = vector.broadcast %cst_10 : f32 to vector<8x144xf32>
    %36 = arith.subf %34, %35 : vector<8x144xf32>
    %37 = arith.mulf %36, %26 : vector<8x144xf32>
    %38 = arith.mulf %37, %25 : vector<8x144xf32>
    %39 = arith.addf %38, %25 : vector<8x144xf32>
    %cst_11 = arith.constant 0.785398185 : f32
    %40 = vector.broadcast %cst_11 : f32 to vector<8x144xf32>
    %41 = arith.addf %39, %40 : vector<8x144xf32>
    %42 = arith.select %19, %41, %39 : vector<8x144xi1>, vector<8x144xf32>
    %43 = arith.cmpf ogt, %12, %11 : vector<8x144xf32>
    %cst_12 = arith.constant 1.57079637 : f32
    %44 = vector.broadcast %cst_12 : f32 to vector<8x144xf32>
    %45 = arith.subf %44, %42 : vector<8x144xf32>
    %46 = arith.select %43, %45, %42 : vector<8x144xi1>, vector<8x144xf32>
    %cst_13 = arith.constant 0.000000e+00 : f32
    %47 = vector.broadcast %cst_13 : f32 to vector<8x144xf32>
    %48 = arith.cmpf olt, %5, %47 : vector<8x144xf32>
    %cst_14 = arith.constant 3.14159274 : f32
    %49 = vector.broadcast %cst_14 : f32 to vector<8x144xf32>
    %50 = arith.subf %49, %46 : vector<8x144xf32>
    %51 = arith.select %48, %50, %46 : vector<8x144xi1>, vector<8x144xf32>
    %cst_15 = arith.constant 0.000000e+00 : f32
    %52 = vector.broadcast %cst_15 : f32 to vector<8x144xf32>
    %53 = arith.cmpf olt, %6, %52 : vector<8x144xf32>
    %cst_16 = arith.constant 0.000000e+00 : f32
    %54 = vector.broadcast %cst_16 : f32 to vector<8x144xf32>
    %55 = arith.subf %54, %51 : vector<8x144xf32>
    %56 = arith.select %53, %55, %51 : vector<8x144xi1>, vector<8x144xf32>
    %c0_17 = arith.constant 0 : index
    %c0_18 = arith.constant 0 : index
    %57 = vector.load %arg6[%c0_17, %c0_18] : memref<2x144xf32, #tpu.memory_space<vmem>>, vector<1x144xf32>
    %c1 = arith.constant 1 : index
    %c0_19 = arith.constant 0 : index
    %58 = vector.load %arg6[%c1, %c0_19] : memref<2x144xf32, #tpu.memory_space<vmem>>, vector<1x144xf32>
    %cst_20 = arith.constant 0.000000e+00 : f32
    %59 = vector.broadcast %cst_20 : f32 to vector<8x144xf32>
    %cst_21 = arith.constant 0.000000e+00 : f32
    %60 = vector.broadcast %cst_21 : f32 to vector<8x10xf32>
    %61 = vector.extract_strided_slice %56 {offsets = [0, 0], sizes = [8, 134], strides = [1, 1]} : vector<8x144xf32> to vector<8x134xf32>
    %62 = tpu.concatenate %60, %61 in 1 : vector<8x10xf32>, vector<8x134xf32> -> vector<8x144xf32>
    %63 = vector.broadcast %57 : vector<1x144xf32> to vector<8x144xf32>
    %64 = arith.mulf %62, %63 : vector<8x144xf32>
    %c0_22 = arith.constant 0 : index
    %c0_23 = arith.constant 0 : index
    %65 = vector.load %arg4[%c0_22, %c0_23] : memref<8x9xf32, #tpu.memory_space<vmem>>, vector<8x1xf32>
    %66 = vector.broadcast %65 : vector<8x1xf32> to vector<8x144xf32>
    %67 = arith.mulf %66, %64 : vector<8x144xf32>
    %68 = arith.addf %59, %67 : vector<8x144xf32>
    %cst_24 = arith.constant 0.000000e+00 : f32
    %69 = vector.broadcast %cst_24 : f32 to vector<8x9xf32>
    %70 = vector.extract_strided_slice %56 {offsets = [0, 0], sizes = [8, 135], strides = [1, 1]} : vector<8x144xf32> to vector<8x135xf32>
    %71 = tpu.concatenate %69, %70 in 1 : vector<8x9xf32>, vector<8x135xf32> -> vector<8x144xf32>
    %c0_25 = arith.constant 0 : index
    %c1_26 = arith.constant 1 : index
    %72 = vector.load %arg4[%c0_25, %c1_26] : memref<8x9xf32, #tpu.memory_space<vmem>>, vector<8x1xf32>
    %73 = vector.broadcast %72 : vector<8x1xf32> to vector<8x144xf32>
    %74 = arith.mulf %73, %71 : vector<8x144xf32>
    %75 = arith.addf %68, %74 : vector<8x144xf32>
    %cst_27 = arith.constant 0.000000e+00 : f32
    %76 = vector.broadcast %cst_27 : f32 to vector<8x8xf32>
    %77 = vector.extract_strided_slice %56 {offsets = [0, 0], sizes = [8, 136], strides = [1, 1]} : vector<8x144xf32> to vector<8x136xf32>
    %78 = tpu.concatenate %76, %77 in 1 : vector<8x8xf32>, vector<8x136xf32> -> vector<8x144xf32>
    %79 = vector.broadcast %58 : vector<1x144xf32> to vector<8x144xf32>
    %80 = arith.mulf %78, %79 : vector<8x144xf32>
    %c0_28 = arith.constant 0 : index
    %c2 = arith.constant 2 : index
    %81 = vector.load %arg4[%c0_28, %c2] : memref<8x9xf32, #tpu.memory_space<vmem>>, vector<8x1xf32>
    %82 = vector.broadcast %81 : vector<8x1xf32> to vector<8x144xf32>
    %83 = arith.mulf %82, %80 : vector<8x144xf32>
    %84 = arith.addf %75, %83 : vector<8x144xf32>
    %cst_29 = arith.constant 0.000000e+00 : f32
    %85 = vector.broadcast %cst_29 : f32 to vector<8x1xf32>
    %86 = vector.extract_strided_slice %56 {offsets = [0, 0], sizes = [8, 143], strides = [1, 1]} : vector<8x144xf32> to vector<8x143xf32>
    %87 = tpu.concatenate %85, %86 in 1 : vector<8x1xf32>, vector<8x143xf32> -> vector<8x144xf32>
    %88 = vector.broadcast %57 : vector<1x144xf32> to vector<8x144xf32>
    %89 = arith.mulf %87, %88 : vector<8x144xf32>
    %c0_30 = arith.constant 0 : index
    %c3 = arith.constant 3 : index
    %90 = vector.load %arg4[%c0_30, %c3] : memref<8x9xf32, #tpu.memory_space<vmem>>, vector<8x1xf32>
    %91 = vector.broadcast %90 : vector<8x1xf32> to vector<8x144xf32>
    %92 = arith.mulf %91, %89 : vector<8x144xf32>
    %93 = arith.addf %84, %92 : vector<8x144xf32>
    %c0_31 = arith.constant 0 : index
    %c4 = arith.constant 4 : index
    %94 = vector.load %arg4[%c0_31, %c4] : memref<8x9xf32, #tpu.memory_space<vmem>>, vector<8x1xf32>
    %95 = vector.broadcast %94 : vector<8x1xf32> to vector<8x144xf32>
    %96 = arith.mulf %95, %56 : vector<8x144xf32>
    %97 = arith.addf %93, %96 : vector<8x144xf32>
    %cst_32 = arith.constant 0.000000e+00 : f32
    %98 = vector.broadcast %cst_32 : f32 to vector<8x1xf32>
    %99 = vector.extract_strided_slice %56 {offsets = [0, 1], sizes = [8, 143], strides = [1, 1]} : vector<8x144xf32> to vector<8x143xf32>
    %100 = tpu.concatenate %99, %98 in 1 : vector<8x143xf32>, vector<8x1xf32> -> vector<8x144xf32>
    %101 = vector.broadcast %58 : vector<1x144xf32> to vector<8x144xf32>
    %102 = arith.mulf %100, %101 : vector<8x144xf32>
    %c0_33 = arith.constant 0 : index
    %c5 = arith.constant 5 : index
    %103 = vector.load %arg4[%c0_33, %c5] : memref<8x9xf32, #tpu.memory_space<vmem>>, vector<8x1xf32>
    %104 = vector.broadcast %103 : vector<8x1xf32> to vector<8x144xf32>
    %105 = arith.mulf %104, %102 : vector<8x144xf32>
    %106 = arith.addf %97, %105 : vector<8x144xf32>
    %cst_34 = arith.constant 0.000000e+00 : f32
    %107 = vector.broadcast %cst_34 : f32 to vector<8x8xf32>
    %108 = vector.extract_strided_slice %56 {offsets = [0, 8], sizes = [8, 136], strides = [1, 1]} : vector<8x144xf32> to vector<8x136xf32>
    %109 = tpu.concatenate %108, %107 in 1 : vector<8x136xf32>, vector<8x8xf32> -> vector<8x144xf32>
    %110 = vector.broadcast %57 : vector<1x144xf32> to vector<8x144xf32>
    %111 = arith.mulf %109, %110 : vector<8x144xf32>
    %c0_35 = arith.constant 0 : index
    %c6 = arith.constant 6 : index
    %112 = vector.load %arg4[%c0_35, %c6] : memref<8x9xf32, #tpu.memory_space<vmem>>, vector<8x1xf32>
    %113 = vector.broadcast %112 : vector<8x1xf32> to vector<8x144xf32>
    %114 = arith.mulf %113, %111 : vector<8x144xf32>
    %115 = arith.addf %106, %114 : vector<8x144xf32>
    %cst_36 = arith.constant 0.000000e+00 : f32
    %116 = vector.broadcast %cst_36 : f32 to vector<8x9xf32>
    %117 = vector.extract_strided_slice %56 {offsets = [0, 9], sizes = [8, 135], strides = [1, 1]} : vector<8x144xf32> to vector<8x135xf32>
    %118 = tpu.concatenate %117, %116 in 1 : vector<8x135xf32>, vector<8x9xf32> -> vector<8x144xf32>
    %c0_37 = arith.constant 0 : index
    %c7 = arith.constant 7 : index
    %119 = vector.load %arg4[%c0_37, %c7] : memref<8x9xf32, #tpu.memory_space<vmem>>, vector<8x1xf32>
    %120 = vector.broadcast %119 : vector<8x1xf32> to vector<8x144xf32>
    %121 = arith.mulf %120, %118 : vector<8x144xf32>
    %122 = arith.addf %115, %121 : vector<8x144xf32>
    %cst_38 = arith.constant 0.000000e+00 : f32
    %123 = vector.broadcast %cst_38 : f32 to vector<8x10xf32>
    %124 = vector.extract_strided_slice %56 {offsets = [0, 10], sizes = [8, 134], strides = [1, 1]} : vector<8x144xf32> to vector<8x134xf32>
    %125 = tpu.concatenate %124, %123 in 1 : vector<8x134xf32>, vector<8x10xf32> -> vector<8x144xf32>
    %126 = vector.broadcast %58 : vector<1x144xf32> to vector<8x144xf32>
    %127 = arith.mulf %125, %126 : vector<8x144xf32>
    %c0_39 = arith.constant 0 : index
    %c8 = arith.constant 8 : index
    %128 = vector.load %arg4[%c0_39, %c8] : memref<8x9xf32, #tpu.memory_space<vmem>>, vector<8x1xf32>
    %129 = vector.broadcast %128 : vector<8x1xf32> to vector<8x144xf32>
    %130 = arith.mulf %129, %127 : vector<8x144xf32>
    %131 = arith.addf %122, %130 : vector<8x144xf32>
    %c0_40 = arith.constant 0 : index
    %c0_41 = arith.constant 0 : index
    %132 = vector.load %arg5[%c0_40, %c0_41] : memref<8x1xf32, #tpu.memory_space<vmem>>, vector<8x1xf32>
    %133 = vector.broadcast %132 : vector<8x1xf32> to vector<8x144xf32>
    %134 = arith.addf %131, %133 : vector<8x144xf32>
    %135 = math.cos %134 : vector<8x144xf32>
    %136 = arith.mulf %10, %135 : vector<8x144xf32>
    %137 = math.sin %134 : vector<8x144xf32>
    %138 = arith.mulf %10, %137 : vector<8x144xf32>
    %139 = tpu.concatenate %136, %138 in 1 : vector<8x144xf32>, vector<8x144xf32> -> vector<8x288xf32>
    %c0_42 = arith.constant 0 : index
    %c0_43 = arith.constant 0 : index
    %140 = vector.load %arg3[%c0_42, %c0_43] : memref<288x256xf32, #tpu.memory_space<vmem>>, vector<288x256xf32>
    %cst_44 = arith.constant dense<0.000000e+00> : vector<8x256xf32>
    %141 = tpu.matmul %139, %140, %cst_44 {dimension_numbers = #tpu.dot_dimension_numbers<[1], [0], [0], [1], [0, 0, 1, 1], [], []>, precision = #tpu.contract_precision<fp32>} : vector<8x288xf32>, vector<288x256xf32>, vector<8x256xf32> -> vector<8x256xf32>
    %c0_45 = arith.constant 0 : index
    %c0_46 = arith.constant 0 : index
    %142 = vector.load %arg1[%c0_45, %c0_46] : memref<8x256xf32, #tpu.memory_space<vmem>>, vector<8x256xf32>
    %143 = tpu.concatenate %141, %142 in 0 : vector<8x256xf32>, vector<8x256xf32> -> vector<16x256xf32>
    %c0_47 = arith.constant 0 : index
    %c0_48 = arith.constant 0 : index
    %144 = vector.load %arg7[%c0_47, %c0_48] : memref<8x16xf32, #tpu.memory_space<vmem>>, vector<8x16xf32>
    %cst_49 = arith.constant dense<0.000000e+00> : vector<8x256xf32>
    %145 = tpu.matmul %144, %143, %cst_49 {dimension_numbers = #tpu.dot_dimension_numbers<[1], [0], [0], [1], [0, 0, 1, 1], [], []>, precision = #tpu.contract_precision<fp32>} : vector<8x16xf32>, vector<16x256xf32>, vector<8x256xf32> -> vector<8x256xf32>
    %c0_50 = arith.constant 0 : index
    %c0_51 = arith.constant 0 : index
    %146 = vector.load %arg8[%c0_50, %c0_51] : memref<8x1xf32, #tpu.memory_space<vmem>>, vector<8x1xf32>
    %147 = vector.broadcast %146 : vector<8x1xf32> to vector<8x256xf32>
    %148 = arith.addf %145, %147 : vector<8x256xf32>
    %c0_52 = arith.constant 0 : index
    %c0_53 = arith.constant 0 : index
    %149 = vector.load %arg9[%c0_52, %c0_53] : memref<8x256xf32, #tpu.memory_space<vmem>>, vector<8x256xf32>
    tpu.vector_store %arg9[%c0_52, %c0_53], %148 {strides = array<i32>} : memref<8x256xf32, #tpu.memory_space<vmem>>, vector<8x256xf32>,
    return
  }
}

</mosaic_0001>

<bundles_post_ra>
// kernel: fft_interaction_n.1
= control target key start
LH: loop header
LB: loop body
LE: loop exit
PB: predicated region body
PF: predicated region fallthrough
CT: control target
= control target key end

     0   :  { %14 = vsyncpa [#allocation3], 0  ;;  %s9028_s0 = inlined_call_operand.vmem [shape: f32[16,256], index: 0, kind: input, shape index: {}]   ;;  %s9029_s1 = inlined_call_operand.vmem [shape: f32[8,256], index: 1, kind: input, shape index: {}]   ;;  %s9030_s2 = inlined_call_operand.hbm [shape: f32[256,288], index: 2, kind: input, shape index: {}]   ;;  %s9031_s3 = inlined_call_operand.hbm [shape: f32[288,256], index: 3, kind: input, shape index: {}]   ;;  %s9032_s4 = inlined_call_operand.vmem [shape: f32[8,9], index: 4, kind: input, shape index: {}]   ;;  %s9033_s5 = inlined_call_operand.vmem [shape: f32[8,1], index: 5, kind: input, shape index: {}]   ;;  %s9034_s6 = inlined_call_operand.vmem [shape: f32[2,144], index: 6, kind: input, shape index: {}]   ;;  %s9035_s7 = inlined_call_operand.vmem [shape: f32[8,16], index: 7, kind: input, shape index: {}]   ;;  %s9036_s8 = inlined_call_operand.vmem [shape: f32[8,1], index: 8, kind: input, shape index: {}]   ;;  %s9037_s9 = inlined_call_operand.vmem [shape: f32[8,256], index: 9, kind: output, shape index: {}]  }
   0x1   :  { %s24_s11 = sshll.u32 %s9030_s2, 4  ;;  %s25_s11 = int_to_ptr.hbm [resolvable:$true] %s24_s11 }
   0x2   :  { %15 = vsyncpa [#allocation5], 0  ;;  %s5723_s12 = smov [#allocation2]   ;;  %s37_s16 = sshll.u32 %s9031_s3, 4  ;;  %s38_s16 = int_to_ptr.hbm [resolvable:$true] %s37_s16 }
   0x3   :  { %s26_s13 = sshll.u32 %s5723_s12, 4  ;;  %s5724_s17 = smov 384   ;;  %s27_s13 = int_to_ptr.vmem [resolvable:$true] %s26_s13 }
   0x4   :  { %s5725_s18 = smov 24   ;;  %s5726_s19 = smov [#allocation4]  }
   0x5   :  { %32 = dma.hbm_to_vmem [thread:$0]  %s25_s11, 12288, %s27_s13, [#allocation3], %s5724_s17, %s5724_s17, %s5725_s18  }
   0x6   :  { %s39_s20 = sshll.u32 %s5726_s19, 4  ;;  %s5727_s21 = smov 256   ;;  %s40_s20 = int_to_ptr.vmem [resolvable:$true] %s39_s20 }
   0x7   :  { %s5728_s22 = smov 16  }
   0x8   :  { %45 = dma.hbm_to_vmem [thread:$0]  %s38_s16, 9216, %s40_s20, [#allocation5], %s5727_s21, %s5727_s21, %s5728_s22  }
   0x9   :  { %5719 = dma.done.wait [#allocation3], 12288  }
   0xa   :  { %5720 = vsyncadd [#allocation3], 4294955008 }
   0xb   :  { %5721 = dma.done.wait [#allocation5], 9216  }
   0xc   :  { %5722 = vsyncadd [#allocation5], 4294958080  ;;  %v113_v0 = vld [vmem:[#allocation2 + $0x168] sm:$0xff]  ;;  %v110_v1 = vld [vmem:[#allocation2 + $0x150] sm:$0xff]  ;;  %vm2405_vm0 = vcmask 916480   ;;  %s5738_s10 = smov 121  }
   0xd   :  { %v107_v2 = vld [vmem:[#allocation2 + $0x138] sm:$0xff]  ;;  %v5810_v3 = vand.u32 4294901760, %v113_v0  ;;  %v5812_v4 = vand.u32 4294901760, %v110_v1  ;;  %v104_v6 = vld [vmem:[#allocation2 + $0x120] sm:$0xff]  ;;  %v101_v7 = vld [vmem:[#allocation2 + $0x108] sm:$0xff]  ;;  %s5739_s11 = smov 122  }
   0xe   :  { %v5814_v5 = vand.u32 4294901760, %v107_v2  ;;  %v98_v8 = vld [vmem:[#allocation2 + $0xf0] sm:$0xff]  ;;  %v5816_v9 = vand.u32 4294901760, %v104_v6  ;;  %v5818_v10 = vand.u32 4294901760, %v101_v7  ;;  %v95_v12 = vld [vmem:[#allocation2 + $0xd8] sm:$0xff]  ;;  %v92_v13 = vld [vmem:[#allocation2 + $0xc0] sm:$0xff] }
   0xf   :  { %v5820_v11 = vand.u32 4294901760, %v98_v8  ;;  %165 = vmatpush.msra.mxu0 %v5810_v3  ;;  %v5824_v14 = vsub.f32 %v113_v0, %v5810_v3  ;;  %v5827_v15 = vsub.f32 %v110_v1, %v5812_v4  ;;  %378 = vmatpush.msra.mxu3 %v5810_v3  ;;  %v5833_v17 = vand.u32 4294901760, %v95_v12  ;;  %v89_v18 = vld [vmem:[#allocation2 + $0xa8] sm:$0xff]  ;;  %v86_v26 = vld [vmem:[#allocation2 + $0x90] sm:$0xff]  ;;  %v83_v36 = vld [vmem:[#allocation2 + $0x78] sm:$0xff]  ;;  %s5740_s12 = smov 111  }
  0x10   :  { %v5831_v16 = vsub.f32 %v107_v2, %v5814_v5  ;;  %v5836_v19 = vsub.f32 %v104_v6, %v5816_v9  ;;  %v5839_v20 = vsub.f32 %v101_v7, %v5818_v10  ;;  %v5841_v21 = vand.u32 4294901760, %v92_v13  ;;  %v80_v42 = vld [vmem:[#allocation2 + $0x60] sm:$0xff]  ;;  %v77_v48 = vld [vmem:[#allocation2 + $0x48] sm:$0xff]  ;;  %v74_v54 = vld [vmem:[#allocation2 + $0x30] sm:$0xff]  ;;  %s5741_s13 = smov 113   ;;  %s5742_s14 = smov 103  }
  0x11   :  { %167 = vmatpush.msra.mxu0 %v5812_v4  ;;  %320 = vmatpush.msra.mxu2 %v5824_v14  ;;  %v215_v22 = vand.u32 4294901760, %v5824_v14  ;;  %v9054_v23 = vand.u32 4294901760, %v5827_v15  ;;  %v5849_v25 = vsub.f32 %v98_v8, %v5820_v11  ;;  %v5853_v28 = vand.u32 4294901760, %v89_v18  ;;  %v161_v59 = vld [vmem:[#allocation2 + $0x2e8] sm:$0xff]  ;;  %v71_v61 = vld [vmem:[#allocation2 + $0x18] sm:$0xff]  ;;  %v158_v2 = vld [vmem:[#allocation2 + $0x2d0] sm:$0xff] }
  0x12   :  { %v9051_v24 = vand.u32 4294901760, %v5831_v16  ;;  %380 = vmatpush.msra.mxu3 %v5812_v4  ;;  %v9050_v27 = vand.u32 4294901760, %v5836_v19  ;;  %v5856_v29 = vsub.f32 %v95_v12, %v5833_v17  ;;  %v9047_v33 = vand.u32 4294901760, %v5839_v20  ;;  %v68_v7 = vld [vmem:[#allocation2] sm:$0xff]  ;;  %s5744_s15 = smov 104   ;;  %s5745_s16 = smov 102  }
  0x13   :  { %169 = vmatpush.msra.mxu0 %v5814_v5  ;;  %323 = vmatpush.msra.mxu2 %v5827_v15  ;;  %v216_v30 = vsub.f32 %v5824_v14, %v215_v22  ;;  %v222_v31 = vsub.f32 %v5827_v15, %v9054_v23  ;;  %v5871_v34 = vand.u32 4294901760, %v86_v26  ;;  %v5874_v35 = vsub.f32 %v92_v13, %v5841_v21 }
  0x14   :  { %v228_v32 = vsub.f32 %v5831_v16, %v9051_v24  ;;  %382 = vmatpush.msra.mxu3 %v5814_v5  ;;  %v234_v39 = vsub.f32 %v5836_v19, %v9050_v27  ;;  %v9046_v40 = vand.u32 4294901760, %v5849_v25  ;;  %v9044_v41 = vand.u32 4294901760, %v5856_v29 }
  0x15   :  { %171 = vmatpush.msra.mxu0 %v5816_v9  ;;  %v217_v37 = vand.u32 4294901760, %v216_v30  ;;  %326 = vmatpush.msra.mxu2 %v5831_v16  ;;  %v223_v38 = vand.u32 4294901760, %v222_v31  ;;  %v240_v44 = vsub.f32 %v5839_v20, %v9047_v33  ;;  %v5888_v45 = vand.u32 4294901760, %v83_v36  ;;  %v155_v30 = vld [vmem:[#allocation2 + $0x2b8] sm:$0xff] }
  0x16   :  { %384 = vmatpush.msra.mxu3 %v5816_v9  ;;  %v229_v43 = vand.u32 4294901760, %v228_v32  ;;  %v5891_v46 = vsub.f32 %v89_v18, %v5853_v28  ;;  %v9043_v47 = vand.u32 4294901760, %v5874_v35  ;;  %v235_v49 = vand.u32 4294901760, %v234_v39 }
  0x17   :  { %173 = vmatpush.msra.mxu0 %v5818_v10  ;;  %218 = vmatpush.msra.mxu1 %v217_v37  ;;  %v246_v50 = vsub.f32 %v5849_v25, %v9046_v40  ;;  %v5900_v51 = vand.u32 4294901760, %v80_v42  ;;  %v5903_v52 = vsub.f32 %v86_v26, %v5871_v34  ;;  %v252_v53 = vsub.f32 %v5856_v29, %v9044_v41 }
  0x18   :  { %329 = vmatpush.msra.mxu2 %v5836_v19  ;;  %386 = vmatpush.msra.mxu3 %v5818_v10  ;;  %v241_v55 = vand.u32 4294901760, %v240_v44  ;;  %v5911_v56 = vand.u32 4294901760, %v77_v48  ;;  %v9041_v57 = vand.u32 4294901760, %v5891_v46  ;;  %v5915_v58 = vsub.f32 %v83_v36, %v5888_v45 }
  0x19   :  { %175 = vmatpush.msra.mxu0 %v5820_v11  ;;  %224 = vmatpush.msra.mxu1 %v223_v38  ;;  %v258_v60 = vsub.f32 %v5874_v35, %v9043_v47  ;;  %v247_v62 = vand.u32 4294901760, %v246_v50  ;;  %v5923_v63 = vand.u32 4294901760, %v74_v54  ;;  %v9040_v0 = vand.u32 4294901760, %v5903_v52 }
  0x1a   :  { %332 = vmatpush.msra.mxu2 %v5839_v20  ;;  %388 = vmatpush.msra.mxu3 %v5820_v11  ;;  %v5927_v1 = vsub.f32 %v80_v42, %v5900_v51  ;;  %v253_v6 = vand.u32 4294901760, %v252_v53  ;;  %v5931_v8 = vand.u32 4294901760, %v161_v59  ;;  %v264_v12 = vsub.f32 %v5891_v46, %v9041_v57  ;;  %v152_v42 = vld [vmem:[#allocation2 + $0x2a0] sm:$0xff]  ;;  %v143_v57 = vld [vmem:[#allocation2 + $0x258] sm:$0xff] }
  0x1b   :  { %177 = vmatpush.msra.mxu0 %v5833_v17  ;;  %230 = vmatpush.msra.mxu1 %v229_v43  ;;  %v5937_v13 = vand.u32 4294901760, %v71_v61  ;;  %v9039_v18 = vand.u32 4294901760, %v5915_v58  ;;  %v5941_v26 = vsub.f32 %v77_v48, %v5911_v56  ;;  %v259_v31 = vand.u32 4294901760, %v258_v60 }
  0x1c   :  { %335 = vmatpush.msra.mxu2 %v5849_v25  ;;  %390 = vmatpush.msra.mxu3 %v5833_v17  ;;  %v5945_v32 = vand.u32 4294901760, %v158_v2  ;;  %v270_v36 = vsub.f32 %v5903_v52, %v9040_v0  ;;  %v5951_v37 = vand.u32 4294901760, %v68_v7  ;;  %v9038_v38 = vand.u32 4294901760, %v5927_v1 }
  0x1d   :  { %179 = vmatpush.msra.mxu0 %v5841_v21  ;;  %236 = vmatpush.msra.mxu1 %v235_v49  ;;  %v5955_v39 = vsub.f32 %v74_v54, %v5923_v63  ;;  %v5960_v43 = vsub.f32 %v161_v59, %v5931_v8  ;;  %v5962_v44 = vand.u32 4294901760, %v155_v30  ;;  %v265_v48 = vand.u32 4294901760, %v264_v12  ;;  %v149_v59 = vld [vmem:[#allocation2 + $0x288] sm:$0xff] }
  0x1e   :  { %338 = vmatpush.msra.mxu2 %v5856_v29  ;;  %392 = vmatpush.msra.mxu3 %v5841_v21  ;;  %9170 = vst [vmem:[#allocation8_spill] sm:$0xff] %v5951_v37  ;;  %v276_v49 = vsub.f32 %v5915_v58, %v9039_v18  ;;  %v9042_v50 = vand.u32 4294901760, %v5941_v26  ;;  %v5970_v53 = vsub.f32 %v71_v61, %v5937_v13  ;;  %v271_v60 = vand.u32 4294901760, %v270_v36 }
  0x1f   :  { %181 = vmatpush.msra.mxu0 %v5853_v28  ;;  %242 = vmatpush.msra.mxu1 %v241_v55  ;;  %v5975_v54 = vsub.f32 %v158_v2, %v5945_v32  ;;  %v5977_v55 = vand.u32 4294901760, %v152_v42  ;;  %v9045_v61 = vand.u32 4294901760, %v5955_v39  ;;  %v9048_v2 = vand.u32 4294901760, %v5960_v43 }
  0x20   :  { %341 = vmatpush.msra.mxu2 %v5874_v35  ;;  %394 = vmatpush.msra.mxu3 %v5853_v28  ;;  %v5991_v12 = vsub.f32 %v155_v30, %v5962_v44  ;;  %v277_v36 = vand.u32 4294901760, %v276_v49  ;;  %v5998_v18 = vand.u32 4294901760, %v149_v59  ;;  %v6026_v33 = vand.u32 4294901760, %v143_v57 }
  0x21   :  { %183 = vmatpush.msra.mxu0 %v5871_v34  ;;  %248 = vmatpush.msra.mxu1 %v247_v62  ;;  %v282_v62 = vsub.f32 %v5927_v1, %v9038_v38  ;;  %v288_v38 = vsub.f32 %v5941_v26, %v9042_v50  ;;  %v9052_v30 = vand.u32 4294901760, %v5975_v54  ;;  %v6004_v0 = vsub.f32 %v152_v42, %v5977_v55 }
  0x22   :  { %344 = vmatpush.msra.mxu2 %v5891_v46  ;;  %396 = vmatpush.msra.mxu3 %v5871_v34  ;;  %v294_v49 = vsub.f32 %v5955_v39, %v9045_v61  ;;  %v588_v42 = vsub.f32 %v5960_v43, %v9048_v2  ;;  %v9055_v41 = vand.u32 4294901760, %v5991_v12  ;;  %v6024_v40 = vsub.f32 %v149_v59, %v5998_v18 }
  0x23   :  { %185 = vmatpush.msra.mxu0 %v5888_v45  ;;  %254 = vmatpush.msra.mxu1 %v253_v6  ;;  %v5985_v6 = vsub.f32 %v68_v7, %v5951_v37  ;;  %v9049_v7 = vand.u32 4294901760, %v5970_v53  ;;  %v594_v2 = vsub.f32 %v5975_v54, %v9052_v30  ;;  %v9171_v14 = vand.u32 4294901760, %v5827_v15 }
  0x24   :  { %347 = vmatpush.msra.mxu2 %v5903_v52  ;;  %398 = vmatpush.msra.mxu3 %v5888_v45  ;;  %v589_v30 = vand.u32 4294901760, %v588_v42  ;;  %v9172_v42 = vand.u32 4294901760, %v6004_v0  ;;  %v9173_v15 = vand.u32 4294901760, %v5831_v16 }
  0x25   :  { %187 = vmatpush.msra.mxu0 %v5900_v51  ;;  %260 = vmatpush.msra.mxu1 %v259_v31  ;;  %v146_v31 = vld [vmem:[#allocation2 + $0x270] sm:$0xff]  ;;  %v9053_v50 = vand.u32 4294901760, %v5985_v6  ;;  %v300_v61 = vsub.f32 %v5970_v53, %v9049_v7  ;;  %v295_v7 = vand.u32 4294901760, %v294_v49 }
  0x26   :  { %350 = vmatpush.msra.mxu2 %v5915_v58  ;;  %400 = vmatpush.msra.mxu3 %v5900_v51  ;;  %v6011_v47 = vand.u32 4294901760, %v146_v31  ;;  %v134_v49 = vld [vmem:[#allocation2 + $0x210] sm:$0xff] }
  0x27   :  { %189 = vmatpush.msra.mxu0 %v5911_v56  ;;  %266 = vmatpush.msra.mxu1 %v265_v48  ;;  %v283_v48 = vand.u32 4294901760, %v282_v62  ;;  %v289_v62 = vand.u32 4294901760, %v288_v38  ;;  %v137_v38 = vld [vmem:[#allocation2 + $0x228] sm:$0xff]  ;;  %v306_v59 = vsub.f32 %v5985_v6, %v9053_v50  ;;  %v6052_v50 = vsub.f32 %v143_v57, %v6026_v33 }
  0x28   :  { %353 = vmatpush.msra.mxu2 %v5927_v1  ;;  %402 = vmatpush.msra.mxu3 %v5911_v56  ;;  %v6039_v27 = vsub.f32 %v146_v31, %v6011_v47  ;;  %v6054_v23 = vand.u32 4294901760, %v137_v38 }
  0x29   :  { %191 = vmatpush.msra.mxu0 %v5923_v63  ;;  %272 = vmatpush.msra.mxu1 %v271_v60  ;;  %v140_v60 = vld [vmem:[#allocation2 + $0x240] sm:$0xff] }
  0x2a   :  { %356 = vmatpush.msra.mxu2 %v5941_v26  ;;  %404 = vmatpush.msra.mxu3 %v5923_v63  ;;  %v6041_v24 = vand.u32 4294901760, %v140_v60  ;;  %v9057_v57 = vand.u32 4294901760, %v6039_v27 }
  0x2b   :  { %193 = vmatpush.msra.mxu0 %v5937_v13  ;;  %278 = vmatpush.msra.mxu1 %v277_v36  ;;  %v301_v36 = vand.u32 4294901760, %v300_v61  ;;  %v131_v61 = vld [vmem:[#allocation2 + $0x1f8] sm:$0xff] }
  0x2c   :  { %359 = vmatpush.msra.mxu2 %v5955_v39  ;;  %406 = vmatpush.msra.mxu3 %v5937_v13  ;;  %v6065_v31 = vsub.f32 %v140_v60, %v6041_v24  ;;  %v6082_v16 = vand.u32 4294901760, %v131_v61  ;;  %v128_v60 = vld [vmem:[#allocation2 + $0x1e0] sm:$0xff] }
  0x2d   :  { %195 = vmatpush.msra.mxu0 %v5951_v37  ;;  %284 = vmatpush.msra.mxu1 %v283_v48  ;;  %v600_v48 = vsub.f32 %v5991_v12, %v9055_v41  ;;  %v307_v41 = vand.u32 4294901760, %v306_v59 }
  0x2e   :  { %362 = vmatpush.msra.mxu2 %v5970_v53  ;;  %408 = vmatpush.msra.mxu3 %v5951_v37  ;;  %v6067_v37 = vand.u32 4294901760, %v134_v49 }
  0x2f   :  { %425 = vmatpush.msrb.mxu0 %v215_v22  ;;  %290 = vmatpush.msra.mxu1 %v289_v62  ;;  %v595_v22 = vand.u32 4294901760, %v594_v2  ;;  %v606_v62 = vsub.f32 %v6004_v0, %v9172_v42  ;;  %v601_v2 = vand.u32 4294901760, %v600_v48  ;;  %v6080_v42 = vsub.f32 %v137_v38, %v6054_v23 }
  0x30   :  { %365 = vmatpush.msra.mxu2 %v5985_v6  ;;  %590 = vmatpush.msrb.mxu3 %v589_v30  ;;  %v9175_v30 = vand.u32 4294901760, %v5836_v19  ;;  %v9176_v19 = vand.u32 4294901760, %v5839_v20 }
  0x31   :  { %429 = vmatpush.msrb.mxu0 %v9171_v14  ;;  %296 = vmatpush.msra.mxu1 %v295_v7  ;;  %v64_v14 = vld [vmem:[%s9028_s0] sm:$0xff]  ;;  %v9174_v7 = vand.u32 4294901760, %v6024_v40  ;;  %v607_v48 = vand.u32 4294901760, %v606_v62 }
  0x32   :  { %537 = vmatpush.msrb.mxu2 %v5931_v8  ;;  %596 = vmatpush.msrb.mxu3 %v595_v22  ;;  %v6094_v38 = vand.u32 4294901760, %v64_v14  ;;  %v9177_v22 = vand.u32 4294901760, %v6052_v50 }
  0x33   :  { %433 = vmatpush.msrb.mxu0 %v9173_v15  ;;  %302 = vmatpush.msra.mxu1 %v301_v36  ;;  %v612_v59 = vsub.f32 %v6024_v40, %v9174_v7  ;;  %v618_v36 = vsub.f32 %v6039_v27, %v9057_v57  ;;  %v6092_v7 = vsub.f32 %v134_v49, %v6067_v37  ;;  %v125_v57 = vld [vmem:[#allocation2 + $0x1c8] sm:$0xff]  ;;  %v9178_v15 = vand.u32 4294901760, %v5849_v25 }
  0x34   :  { %539 = vmatpush.msrb.mxu2 %v5945_v32  ;;  %602 = vmatpush.msrb.mxu3 %v601_v2  ;;  %v624_v62 = vsub.f32 %v6052_v50, %v9177_v22  ;;  %v6105_v49 = vsub.f32 %v131_v61, %v6082_v16  ;;  %v9179_v2 = vand.u32 4294901760, %v6065_v31  ;;  %v6118_v61 = vsub.f32 %v64_v14, %v6094_v38  ;;  %v122_v22 = vld [vmem:[#allocation2 + $0x1b0] sm:$0xff] }
  0x35   :  { %437 = vmatpush.msrb.mxu0 %v9175_v30  ;;  %308 = vmatpush.msra.mxu1 %v307_v41  ;;  %v613_v41 = vand.u32 4294901760, %v612_v59  ;;  %v9059_v30 = vand.u32 4294901760, %v6080_v42  ;;  %v619_v20 = vand.u32 4294901760, %v618_v36  ;;  %v9180_v25 = vand.u32 4294901760, %v5856_v29 }
  0x36   :  { %541 = vmatpush.msrb.mxu2 %v5962_v44  ;;  %608 = vmatpush.msrb.mxu3 %v607_v48  ;;  %v630_v59 = vsub.f32 %v6065_v31, %v9179_v2  ;;  %v625_v48 = vand.u32 4294901760, %v624_v62  ;;  %v9181_v14 = vand.u32 4294901760, %v5874_v35  ;;  %v119_v2 = vld [vmem:[#allocation2 + $0x198] sm:$0xff] }
  0x37   :  { %441 = vmatpush.msrb.mxu0 %v9176_v19  ;;  %496 = vmatpush.msrb.mxu1 %v5810_v3  ;;  %v6110_v3 = vand.u32 4294901760, %v128_v60  ;;  %v9058_v19 = vand.u32 4294901760, %v6092_v7  ;;  %v636_v36 = vsub.f32 %v6080_v42, %v9059_v30  ;;  %v116_v30 = vld [vmem:[#allocation2 + $0x180] sm:$0xff] }
  0x38   :  { %543 = vmatpush.msrb.mxu2 %v5977_v55  ;;  %614 = vmatpush.msrb.mxu3 %v613_v41  ;;  %v66_v41 = vld [vmem:[%s9028_s0 + $0x10] sm:$0xff]  ;;  %v631_v62 = vand.u32 4294901760, %v630_v59 }
  0x39   :  { %445 = vmatpush.msrb.mxu0 %v9178_v15  ;;  %498 = vmatpush.msrb.mxu1 %v5812_v4  ;;  %v6123_v4 = vand.u32 4294901760, %v125_v57  ;;  %v647_v15 = vand.u32 4294901760, %v6105_v49  ;;  %v6134_v29 = vsub.f32 %v128_v60, %v6110_v3  ;;  %v642_v35 = vsub.f32 %v6092_v7, %v9058_v19 }
  0x3a   :  { %545 = vmatpush.msrb.mxu2 %v5998_v18  ;;  %620 = vmatpush.msrb.mxu3 %v619_v20  ;;  %v9182_v60 = vand.u32 4294901760, %v5891_v46  ;;  %v637_v20 = vand.u32 4294901760, %v636_v36  ;;  %v6160_v19 = vand.u32 4294901760, %v66_v41  ;;  %v9184_v46 = vand.u32 4294901760, %v5903_v52 }
  0x3b   :  { %449 = vmatpush.msrb.mxu0 %v9180_v25  ;;  %500 = vmatpush.msrb.mxu1 %v5814_v5  ;;  %v6136_v5 = vand.u32 4294901760, %v122_v22  ;;  %v6152_v25 = vsub.f32 %v125_v57, %v6123_v4  ;;  %v648_v59 = vsub.f32 %v6105_v49, %v647_v15 }
  0x3c   :  { %547 = vmatpush.msrb.mxu2 %v6011_v47  ;;  %626 = vmatpush.msrb.mxu3 %v625_v48  ;;  %9183 = vst [vmem:[#allocation9_spill] sm:$0xff] %v6160_v19  ;;  %v643_v48 = vand.u32 4294901760, %v642_v35  ;;  %v9187_v35 = vand.u32 4294901760, %v5927_v1  ;;  %v9188_v1 = vand.u32 4294901760, %v5941_v26  ;;  %v9191_v26 = vand.u32 4294901760, %v5955_v39 }
  0x3d   :  { %453 = vmatpush.msrb.mxu0 %v9181_v14  ;;  %502 = vmatpush.msrb.mxu1 %v5816_v9  ;;  %v6146_v9 = vand.u32 4294901760, %v6118_v61  ;;  %v6158_v14 = vand.u32 4294901760, %v119_v2  ;;  %v6167_v57 = vsub.f32 %v122_v22, %v6136_v5  ;;  %v659_v52 = vand.u32 4294901760, %v6152_v25 }
  0x3e   :  { %549 = vmatpush.msrb.mxu2 %v6026_v33  ;;  %632 = vmatpush.msrb.mxu3 %v631_v62  ;;  %v649_v22 = vand.u32 4294901760, %v648_v59 }
  0x3f   :  { %457 = vmatpush.msrb.mxu0 %v9182_v60  ;;  %504 = vmatpush.msrb.mxu1 %v5818_v10  ;;  %v653_v10 = vand.u32 4294901760, %v6134_v29  ;;  %v199_v36 = vsub.f32 %v6118_v61, %v6146_v9  ;;  %v9185_v60 = vand.u32 4294901760, %v5915_v58  ;;  %v6183_v62 = vsub.f32 %v119_v2, %v6158_v14 }
  0x40   :  { %551 = vmatpush.msrb.mxu2 %v6041_v24  ;;  %638 = vmatpush.msrb.mxu3 %v637_v20  ;;  %v665_v58 = vand.u32 4294901760, %v6167_v57  ;;  %v65_v20 = vld [vmem:[%s9028_s0 + $0x8] sm:$0xff] }
  0x41   :  { %461 = vmatpush.msrb.mxu0 %v9184_v46  ;;  %506 = vmatpush.msrb.mxu1 %v5820_v11  ;;  %v6176_v11 = vand.u32 4294901760, %v116_v30  ;;  %v6180_v46 = vsub.f32 %v66_v41, %v6160_v19  ;;  %v6196_v2 = vand.u32 4294901760, %v199_v36  ;;  %v671_v59 = vand.u32 4294901760, %v6183_v62 }
  0x42   :  { %553 = vmatpush.msrb.mxu2 %v6054_v23  ;;  %644 = vmatpush.msrb.mxu3 %v643_v48  ;;  %v6212_v36 = vand.u32 4294901760, %v65_v20 }
  0x43   :  { %465 = vmatpush.msrb.mxu0 %v9185_v60  ;;  %508 = vmatpush.msrb.mxu1 %v5833_v17  ;;  %9186 = vst [vmem:[#allocation10_spill] sm:$0xff] %v6180_v46  ;;  %v654_v17 = vsub.f32 %v6134_v29, %v653_v10  ;;  %v6205_v41 = vsub.f32 %v116_v30, %v6176_v11  ;;  %v6210_v48 = vand.u32 4294901760, %v6180_v46  ;;  %v9192_v60 = vand.u32 4294901760, %v5970_v53 }
  0x44   :  { %555 = vmatpush.msrb.mxu2 %v6067_v37  ;;  %650 = vmatpush.msrb.mxu3 %v649_v22  ;;  %9190 = vst [vmem:[#allocation12_spill] sm:$0xff] %v6212_v36  ;;  %v666_v30 = vsub.f32 %v6167_v57, %v665_v58 }
  0x45   :  { %469 = vmatpush.msrb.mxu0 %v9187_v35  ;;  %510 = vmatpush.msrb.mxu1 %v5841_v21  ;;  %v660_v21 = vsub.f32 %v6152_v25, %v659_v52  ;;  %9189 = vst [vmem:[#allocation11_spill] sm:$0xff] %v6210_v48  ;;  %v677_v39 = vand.u32 4294901760, %v6205_v41  ;;  %v207_v35 = vsub.f32 %v6180_v46, %v6210_v48 }
  0x46   :  { %557 = vmatpush.msrb.mxu2 %v6082_v16  ;;  %201 = vmatmul.f32.vlgmr.msra.gmra.mxu0 %v6196_v2  ;;  %v667_v53 = vand.u32 4294901760, %v666_v30  ;;  %v9200_v30 = vld [vmem:[#allocation8_spill] sm:$0xff] }
  0x47   :  { %473 = vmatpush.msrb.mxu0 %v9188_v1  ;;  %512 = vmatpush.msrb.mxu1 %v5853_v28  ;;  %v655_v28 = vand.u32 4294901760, %v654_v17  ;;  %v661_v22 = vand.u32 4294901760, %v660_v21  ;;  %v6234_v17 = vsub.f32 %v65_v20, %v6212_v36  ;;  %v9194_v1 = vand.u32 4294901760, %v5985_v6 }
  0x48   :  { %368 = vmatmul.f32.vlgmr.msra.gmra.mxu2 %v6118_v61  ;;  %412 = vmatmul.f32.vlgmr.msra.gmra.mxu3 %v6146_v9  ;;  %v6246_v21 = vand.u32 4294901760, %v207_v35  ;;  %v9197_v6 = vand.u32 4294901760, %v5960_v43  ;;  %v90_v35 = vld [vmem:[#allocation2 + $0xb0] sm:$0xff] }
  0x49   :  { %477 = vmatpush.msrb.mxu0 %v9191_v26  ;;  %514 = vmatpush.msrb.mxu1 %v5871_v34  ;;  %v672_v34 = vsub.f32 %v6183_v62, %v671_v59  ;;  %9193 = vst [vmem:[#allocation13_spill] sm:$0xff] %v6234_v17  ;;  %v6249_v26 = vand.u32 4294901760, %v6234_v17 }
  0x4a   :  { %559 = vmatpush.msrb.mxu2 %v6110_v3  ;;  %656 = vmatpush.msrb.mxu3 %v655_v28  ;;  %9195 = vst [vmem:[#allocation14_spill] sm:$0xff] %v6246_v21 }
  0x4b   :  { %481 = vmatpush.msrb.mxu0 %v9192_v60  ;;  %516 = vmatpush.msrb.mxu1 %v5888_v45  ;;  %v678_v45 = vsub.f32 %v6205_v41, %v677_v39  ;;  %v673_v20 = vand.u32 4294901760, %v672_v34  ;;  %9196 = vst [vmem:[#allocation15_spill] sm:$0xff] %v6249_v26  ;;  %v9203_v60 = vand.u32 4294901760, %v6004_v0  ;;  %v93_v34 = vld [vmem:[#allocation2 + $0xc8] sm:$0xff] }
  0x4c   :  { %561 = vmatpush.msrb.mxu2 %v6123_v4  ;;  %310 = vmatmul.f32.vlgmr.msra.gmra.mxu1 %v6094_v38 }
  0x4d   :  { %485 = vmatpush.msrb.mxu0 %v9194_v1  ;;  %518 = vmatpush.msrb.mxu1 %v5900_v51  ;;  %v679_v51 = vand.u32 4294901760, %v678_v45  ;;  %v87_v45 = vld [vmem:[#allocation2 + $0x98] sm:$0xff] }
  0x4e   :  { %563 = vmatpush.msrb.mxu2 %v6136_v5  ;;  %662 = vmatpush.msrb.mxu3 %v661_v22 }
  0x4f   :  { %692 = vmatpush.msra.mxu0 %v5960_v43  ;;  %520 = vmatpush.msrb.mxu1 %v5911_v56  ;;  %v571_v56 = vsub.f32 %v6234_v17, %v6249_v26  ;;  %v67_v43 = vld [vmem:[%s9028_s0 + $0x18] sm:$0xff]  ;;  %s5729_s0 = smov 112  }
  0x50   :  { %565 = vmatpush.msrb.mxu2 %v6158_v14  ;;  %668 = vmatpush.msrb.mxu3 %v667_v53 }
  0x51   :  { %373 = vmatmul.f32.gmra.mxu2 %v6180_v46  ;;  %695 = vmatpush.msra.mxu0 %v5975_v54  ;;  %v6268_v28 = vand.u32 4294901760, %v571_v56 }
  0x52   :  { %522 = vmatpush.msrb.mxu1 %v5923_v63  ;;  %567 = vmatpush.msrb.mxu2 %v6176_v11  ;;  %v9198_v63 = vand.u32 4294901760, %v5975_v54  ;;  %v6282_v54 = vand.u32 4294901760, %v67_v43 }
  0x53   :  { %674 = vmatpush.msrb.mxu3 %v673_v20  ;;  %209 = vmatmul.f32.gmra.mxu0 %v6246_v21  ;;  %9199 = vst [vmem:[#allocation16_spill] sm:$0xff] %v6268_v28 }
  0x54   :  { %418 = vmatmul.f32.gmra.mxu3 %v6210_v48  ;;  %698 = vmatpush.msra.mxu0 %v5991_v12  ;;  %9202 = vst [vmem:[#allocation8_spill] sm:$0xff] %v6282_v54  ;;  %v138_v48 = vld [vmem:[#allocation2 + $0x230] sm:$0xff] }
  0x55   :  { %797 = vmatpush.msra.mxu2 %v9197_v6  ;;  %524 = vmatpush.msrb.mxu1 %v5937_v13  ;;  %v9201_v13 = vand.u32 4294901760, %v5991_v12  ;;  %v6295_v12 = vsub.f32 %v67_v43, %v6282_v54 }
  0x56   :  { %680 = vmatpush.msrb.mxu3 %v679_v51  ;;  %314 = vmatmul.f32.gmra.mxu1 %v6160_v19 }
  0x57   :  { %701 = vmatpush.msra.mxu0 %v6004_v0  ;;  %801 = vmatpush.msra.mxu2 %v9198_v63  ;;  %9205 = vst [vmem:[#allocation17_spill] sm:$0xff] %v6295_v12  ;;  %v9206_v0 = vand.u32 4294901760, %v6039_v27 }
  0x58   :  { %868 = vmatpush.msra.mxu3 %v5931_v8  ;;  %526 = vmatpush.msrb.mxu1 %v9200_v30  ;;  %v6430_v30 = vand.u32 4294901760, %v87_v45 }
  0x59   :  { %704 = vmatpush.msra.mxu0 %v6024_v40  ;;  %805 = vmatpush.msra.mxu2 %v9201_v13  ;;  %v84_v13 = vld [vmem:[#allocation2 + $0x80] sm:$0xff] }
  0x5a   :  { %750 = vmatpush.msra.mxu1 %v5931_v8  ;;  %870 = vmatpush.msra.mxu3 %v5945_v32  ;;  %v9204_v8 = vand.u32 4294901760, %v6024_v40  ;;  %v6307_v40 = vand.u32 4294901760, %v6295_v12 }
  0x5b   :  { %573 = vmatmul.f32.vlgmr.msrb.gmra.mxu2 %v6268_v28  ;;  %707 = vmatpush.msra.mxu0 %v6039_v27  ;;  %v9209_v27 = vand.u32 4294901760, %v6065_v31 }
  0x5c   :  { %752 = vmatpush.msra.mxu1 %v5945_v32  ;;  %809 = vmatpush.msra.mxu2 %v9203_v60  ;;  %9207 = vst [vmem:[#allocation18_spill] sm:$0xff] %v6307_v40  ;;  %v9208_v32 = vand.u32 4294901760, %v6052_v50 }
  0x5d   :  { %872 = vmatpush.msra.mxu3 %v5962_v44  ;;  %487 = vmatmul.f32.vlgmr.msrb.gmra.mxu0 %v6094_v38 }
  0x5e   :  { %682 = vmatmul.f32.vlgmr.msrb.gmra.mxu3 %v6212_v36  ;;  %710 = vmatpush.msra.mxu0 %v6052_v50  ;;  %v9211_v50 = vand.u32 4294901760, %v6092_v7 }
  0x5f   :  { %754 = vmatpush.msra.mxu1 %v5962_v44  ;;  %813 = vmatpush.msra.mxu2 %v9204_v8  ;;  %v9210_v44 = vand.u32 4294901760, %v6080_v42 }
  0x60   :  { %874 = vmatpush.msra.mxu3 %v5977_v55  ;;  %528 = vmatmul.f32.vlgmr.msrb.gmra.mxu1 %v6094_v38 }
  0x61   :  { %713 = vmatpush.msra.mxu0 %v6065_v31  ;;  %756 = vmatpush.msra.mxu1 %v5977_v55  ;;  %v111_v55 = vld [vmem:[#allocation2 + $0x158] sm:$0xff] }
  0x62   :  { %817 = vmatpush.msra.mxu2 %v9206_v0  ;;  %876 = vmatpush.msra.mxu3 %v5998_v18 }
  0x63   :  { %716 = vmatpush.msra.mxu0 %v6080_v42  ;;  %758 = vmatpush.msra.mxu1 %v5998_v18  ;;  %v579_v18 = vsub.f32 %v6295_v12, %v6307_v40 }
  0x64   :  { %821 = vmatpush.msra.mxu2 %v9208_v32  ;;  %878 = vmatpush.msra.mxu3 %v6011_v47  ;;  %v81_v32 = vld [vmem:[#allocation2 + $0x68] sm:$0xff] }
  0x65   :  { %719 = vmatpush.msra.mxu0 %v6092_v7  ;;  %760 = vmatpush.msra.mxu1 %v6011_v47  ;;  %v114_v47 = vld [vmem:[#allocation2 + $0x170] sm:$0xff]  ;;  %v105_v7 = vld [vmem:[#allocation2 + $0x128] sm:$0xff] }
  0x66   :  { %825 = vmatpush.msra.mxu2 %v9209_v27  ;;  %880 = vmatpush.msra.mxu3 %v6026_v33  ;;  %v6336_v31 = vand.u32 4294901760, %v114_v47  ;;  %v6447_v27 = vand.u32 4294901760, %v84_v13 }
  0x67   :  { %722 = vmatpush.msra.mxu0 %v6105_v49  ;;  %762 = vmatpush.msra.mxu1 %v6026_v33  ;;  %v6331_v33 = vand.u32 4294901760, %v579_v18  ;;  %v102_v49 = vld [vmem:[#allocation2 + $0x110] sm:$0xff] }
  0x68   :  { %829 = vmatpush.msra.mxu2 %v9210_v44  ;;  %882 = vmatpush.msra.mxu3 %v6041_v24 }
  0x69   :  { %725 = vmatpush.msra.mxu0 %v6134_v29  ;;  %764 = vmatpush.msra.mxu1 %v6041_v24  ;;  %9212 = vst [vmem:[#allocation19_spill] sm:$0xff] %v6331_v33  ;;  %v108_v24 = vld [vmem:[#allocation2 + $0x140] sm:$0xff]  ;;  %v6369_v29 = vand.u32 4294901760, %v102_v49 }
  0x6a   :  { %833 = vmatpush.msra.mxu2 %v9211_v50  ;;  %884 = vmatpush.msra.mxu3 %v6054_v23  ;;  %v6349_v42 = vand.u32 4294901760, %v108_v24  ;;  %v6456_v50 = vsub.f32 %v87_v45, %v6430_v30 }
  0x6b   :  { %491 = vmatmul.f32.gmra.mxu0 %v6160_v19  ;;  %766 = vmatpush.msra.mxu1 %v6054_v23  ;;  %v6343_v23 = vand.u32 4294901760, %v111_v55 }
  0x6c   :  { %728 = vmatpush.msra.mxu0 %v6152_v25  ;;  %837 = vmatpush.msra.mxu2 %v647_v15 }
  0x6d   :  { %886 = vmatpush.msra.mxu3 %v6067_v37  ;;  %768 = vmatpush.msra.mxu1 %v6067_v37  ;;  %v6352_v37 = vsub.f32 %v114_v47, %v6336_v31  ;;  %v6360_v15 = vsub.f32 %v111_v55, %v6343_v23  ;;  %v78_v55 = vld [vmem:[#allocation2 + $0x50] sm:$0xff] }
  0x6e   :  { %731 = vmatpush.msra.mxu0 %v6167_v57  ;;  %841 = vmatpush.msra.mxu2 %v653_v10  ;;  %v6373_v10 = vsub.f32 %v108_v24, %v6349_v42  ;;  %v96_v57 = vld [vmem:[#allocation2 + $0xe0] sm:$0xff] }
  0x6f   :  { %888 = vmatpush.msra.mxu3 %v6082_v16  ;;  %581 = vmatmul.f32.gmra.mxu2 %v6331_v33  ;;  %v9069_v25 = vand.u32 4294901760, %v6352_v37 }
  0x70   :  { %734 = vmatpush.msra.mxu0 %v6183_v62  ;;  %770 = vmatpush.msra.mxu1 %v6082_v16  ;;  %v6365_v16 = vand.u32 4294901760, %v105_v7  ;;  %v9067_v62 = vand.u32 4294901760, %v6373_v10 }
  0x71   :  { %845 = vmatpush.msra.mxu2 %v659_v52  ;;  %890 = vmatpush.msra.mxu3 %v6110_v3  ;;  %v99_v52 = vld [vmem:[#allocation2 + $0xf8] sm:$0xff] }
  0x72   :  { %686 = vmatmul.f32.gmra.mxu3 %v6282_v54  ;;  %737 = vmatpush.msra.mxu0 %v6205_v41  ;;  %v6386_v22 = vsub.f32 %v105_v7, %v6365_v16  ;;  %v972_v51 = vsub.f32 %v6373_v10, %v9067_v62 }
  0x73   :  { %772 = vmatpush.msra.mxu1 %v6110_v3  ;;  %849 = vmatpush.msra.mxu2 %v665_v58  ;;  %v9068_v3 = vand.u32 4294901760, %v6360_v15  ;;  %v6383_v58 = vand.u32 4294901760, %v99_v52 }
  0x74   :  { %892 = vmatpush.msra.mxu3 %v6123_v4  ;;  %532 = vmatmul.f32.gmra.mxu1 %v6160_v19  ;;  %v9065_v53 = vand.u32 4294901760, %v6386_v22  ;;  %v141_v19 = vld [vmem:[#allocation2 + $0x248] sm:$0xff] }
  0x75   :  { %740 = vmatmul.f32.vlgmr.msra.gmra.mxu0 %v6234_v17  ;;  %774 = vmatpush.msra.mxu1 %v6123_v4  ;;  %v960_v4 = vsub.f32 %v6352_v37, %v9069_v25  ;;  %v966_v41 = vsub.f32 %v6360_v15, %v9068_v3  ;;  %v6413_v1 = vsub.f32 %v99_v52, %v6383_v58  ;;  %v147_v17 = vld [vmem:[#allocation2 + $0x278] sm:$0xff]  ;;  %v6607_v46 = vand.u32 4294901760, %v141_v19 }
  0x76   :  { %909 = vmatpush.msrb.mxu0 %v6336_v31  ;;  %853 = vmatpush.msra.mxu2 %v671_v59  ;;  %v6396_v59 = vsub.f32 %v102_v49, %v6369_v29  ;;  %v978_v60 = vsub.f32 %v6386_v22, %v9065_v53  ;;  %v6463_v49 = vand.u32 4294901760, %v81_v32  ;;  %v6579_v33 = vand.u32 4294901760, %v147_v17 }
  0x77   :  { %894 = vmatpush.msra.mxu3 %v6136_v5  ;;  %776 = vmatpush.msra.mxu1 %v6136_v5  ;;  %v6400_v5 = vand.u32 4294901760, %v96_v57  ;;  %v961_v20 = vand.u32 4294901760, %v960_v4  ;;  %v967_v63 = vand.u32 4294901760, %v966_v41  ;;  %v9062_v8 = vand.u32 4294901760, %v6413_v1 }
  0x78   :  { %911 = vmatpush.msrb.mxu0 %v6343_v23  ;;  %857 = vmatpush.msra.mxu2 %v677_v39  ;;  %v6407_v39 = vand.u32 4294901760, %v93_v34  ;;  %v9064_v56 = vand.u32 4294901760, %v6396_v59  ;;  %v979_v24 = vand.u32 4294901760, %v978_v60  ;;  %v6471_v4 = vand.u32 4294901760, %v78_v55 }
  0x79   :  { %896 = vmatpush.msra.mxu3 %v6158_v14  ;;  %859 = vmatmul.f32.vlgmr.msra.gmra.mxu2 %v6212_v36  ;;  %v6426_v6 = vsub.f32 %v96_v57, %v6400_v5  ;;  %v990_v7 = vsub.f32 %v6413_v1, %v9062_v8  ;;  %v75_v57 = vld [vmem:[#allocation2 + $0x38] sm:$0xff]  ;;  %v6487_v60 = vsub.f32 %v81_v32, %v6463_v49 }
  0x7a   :  { %913 = vmatpush.msrb.mxu0 %v6349_v42  ;;  %1064 = vmatpush.msrb.mxu2 %v6352_v37  ;;  %v6433_v43 = vsub.f32 %v93_v34, %v6407_v39  ;;  %v984_v0 = vsub.f32 %v6396_v59, %v9064_v56  ;;  %v6497_v32 = vsub.f32 %v78_v55, %v6471_v4 }
  0x7b   :  { %778 = vmatpush.msra.mxu1 %v6158_v14  ;;  %898 = vmatpush.msra.mxu3 %v6176_v11  ;;  %v6423_v14 = vand.u32 4294901760, %v90_v35  ;;  %v9061_v18 = vand.u32 4294901760, %v6426_v6  ;;  %v9073_v55 = vand.u32 4294901760, %v6487_v60 }
  0x7c   :  { %900 = vmatmul.f32.vlgmr.msra.gmra.mxu3 %v6212_v36  ;;  %915 = vmatpush.msrb.mxu0 %v6365_v16  ;;  %v9060_v47 = vand.u32 4294901760, %v6433_v43  ;;  %v985_v52 = vand.u32 4294901760, %v984_v0  ;;  %v162_v0 = vld [vmem:[#allocation2 + $0x2f0] sm:$0xff] }
  0x7d   :  { %1067 = vmatpush.msrb.mxu2 %v6360_v15  ;;  %1122 = vmatpush.msrb.mxu3 %v6336_v31  ;;  %v6451_v44 = vsub.f32 %v90_v35, %v6423_v14  ;;  %v996_v34 = vsub.f32 %v6426_v6, %v9061_v18  ;;  %v6475_v35 = vsub.f32 %v84_v13, %v6447_v27  ;;  %v72_v13 = vld [vmem:[#allocation2 + $0x20] sm:$0xff]  ;;  %v6513_v53 = vand.u32 4294901760, %v162_v0 }
  0x7e   :  { %780 = vmatpush.msra.mxu1 %v6176_v11  ;;  %917 = vmatpush.msrb.mxu0 %v6369_v29  ;;  %v973_v11 = vand.u32 4294901760, %v972_v51  ;;  %v1002_v45 = vsub.f32 %v6433_v43, %v9060_v47  ;;  %v991_v51 = vand.u32 4294901760, %v990_v7 }
  0x7f   :  { %784 = vmatmul.f32.vlgmr.msra.gmra.mxu1 %v6249_v26  ;;  %1070 = vmatpush.msrb.mxu2 %v6373_v10  ;;  %v9063_v41 = vand.u32 4294901760, %v6451_v44  ;;  %v997_v47 = vand.u32 4294901760, %v996_v34  ;;  %v9070_v7 = vand.u32 4294901760, %v6475_v35  ;;  %v159_v34 = vld [vmem:[#allocation2 + $0x2d8] sm:$0xff] }
  0x80   :  { %962 = vmatpush.msrb.mxu1 %v961_v20  ;;  %1124 = vmatpush.msrb.mxu3 %v6343_v23  ;;  %v9066_v20 = vand.u32 4294901760, %v6456_v50  ;;  %v1003_v18 = vand.u32 4294901760, %v1002_v45  ;;  %v6522_v62 = vand.u32 4294901760, %v159_v34 }
  0x81   :  { %919 = vmatpush.msrb.mxu0 %v6383_v58  ;;  %1073 = vmatpush.msrb.mxu2 %v6386_v22 }
  0x82   :  { %968 = vmatpush.msrb.mxu1 %v967_v63  ;;  %1126 = vmatpush.msrb.mxu3 %v6349_v42  ;;  %v6484_v63 = vand.u32 4294901760, %v75_v57  ;;  %v1014_v8 = vsub.f32 %v6456_v50, %v9066_v20  ;;  %v6538_v20 = vsub.f32 %v162_v0, %v6513_v53  ;;  %v150_v0 = vld [vmem:[#allocation2 + $0x290] sm:$0xff] }
  0x83   :  { %745 = vmatmul.f32.gmra.mxu0 %v6295_v12  ;;  %863 = vmatmul.f32.gmra.mxu2 %v6282_v54 }
  0x84   :  { %921 = vmatpush.msrb.mxu0 %v6400_v5  ;;  %974 = vmatpush.msrb.mxu1 %v973_v11  ;;  %9213 = vst [vmem:[#allocation20_spill] sm:$0xff] %v6484_v63  ;;  %v69_v11 = vld [vmem:[#allocation2 + $0x8] sm:$0xff]  ;;  %v6511_v56 = vsub.f32 %v75_v57, %v6484_v63  ;;  %v156_v57 = vld [vmem:[#allocation2 + $0x2c0] sm:$0xff]  ;;  %v1015_v3 = vand.u32 4294901760, %v1014_v8 }
  0x85   :  { %1076 = vmatpush.msrb.mxu2 %v6396_v59  ;;  %1128 = vmatpush.msrb.mxu3 %v6365_v16  ;;  %v6542_v8 = vand.u32 4294901760, %v156_v57 }
  0x86   :  { %904 = vmatmul.f32.gmra.mxu3 %v6282_v54  ;;  %923 = vmatpush.msrb.mxu0 %v6407_v39  ;;  %v6567_v54 = vand.u32 4294901760, %v150_v0 }
  0x87   :  { %980 = vmatpush.msrb.mxu1 %v979_v24  ;;  %1079 = vmatpush.msrb.mxu2 %v6413_v1  ;;  %v1008_v24 = vsub.f32 %v6451_v44, %v9063_v41  ;;  %v6507_v41 = vand.u32 4294901760, %v69_v11 }
  0x88   :  { %1130 = vmatpush.msrb.mxu3 %v6369_v29  ;;  %790 = vmatmul.f32.gmra.mxu1 %v6307_v40  ;;  %v153_v40 = vld [vmem:[#allocation2 + $0x2a8] sm:$0xff] }
  0x89   :  { %925 = vmatpush.msrb.mxu0 %v6423_v14  ;;  %986 = vmatpush.msrb.mxu1 %v985_v52  ;;  %v6504_v52 = vand.u32 4294901760, %v72_v13  ;;  %v1009_v45 = vand.u32 4294901760, %v1008_v24  ;;  %v6554_v12 = vand.u32 4294901760, %v153_v40  ;;  %v6565_v24 = vsub.f32 %v156_v57, %v6542_v8 }
  0x8a   :  { %1082 = vmatpush.msrb.mxu2 %v6426_v6  ;;  %1132 = vmatpush.msrb.mxu3 %v6383_v58 }
  0x8b   :  { %927 = vmatpush.msrb.mxu0 %v6430_v30  ;;  %992 = vmatpush.msrb.mxu1 %v991_v51  ;;  %v1020_v51 = vsub.f32 %v6475_v35, %v9070_v7  ;;  %v6527_v25 = vsub.f32 %v72_v13, %v6504_v52  ;;  %v6535_v7 = vsub.f32 %v69_v11, %v6507_v41  ;;  %v9214_v13 = vand.u32 4294901760, %v6497_v32 }
  0x8c   :  { %1085 = vmatpush.msrb.mxu2 %v6433_v43  ;;  %1134 = vmatpush.msrb.mxu3 %v6400_v5  ;;  %v6549_v11 = vsub.f32 %v159_v34, %v6522_v62  ;;  %v6577_v57 = vsub.f32 %v153_v40, %v6554_v12  ;;  %v6592_v40 = vsub.f32 %v150_v0, %v6567_v54 }
  0x8d   :  { %929 = vmatpush.msrb.mxu0 %v6447_v27  ;;  %998 = vmatpush.msrb.mxu1 %v997_v47  ;;  %v1026_v47 = vsub.f32 %v6487_v60, %v9073_v55  ;;  %v1032_v55 = vsub.f32 %v6497_v32, %v9214_v13  ;;  %v9217_v26 = vand.u32 4294901760, %v6527_v25  ;;  %v9219_v36 = vand.u32 4294901760, %v6535_v7 }
  0x8e   :  { %1088 = vmatpush.msrb.mxu2 %v6451_v44  ;;  %1136 = vmatpush.msrb.mxu3 %v6407_v39  ;;  %9215 = vst [vmem:[#allocation21_spill] sm:$0xff] %v6549_v11  ;;  %v6605_v0 = vsub.f32 %v147_v17, %v6579_v33  ;;  %v132_v17 = vld [vmem:[#allocation2 + $0x200] sm:$0xff] }
  0x8f   :  { %931 = vmatpush.msrb.mxu0 %v6463_v49  ;;  %1004 = vmatpush.msrb.mxu1 %v1003_v18  ;;  %v1021_v18 = vand.u32 4294901760, %v1020_v51  ;;  %v9216_v51 = vand.u32 4294901760, %v6511_v56  ;;  %v1044_v34 = vsub.f32 %v6527_v25, %v9217_v26  ;;  %v1050_v28 = vsub.f32 %v6535_v7, %v9219_v36 }
  0x90   :  { %1091 = vmatpush.msrb.mxu2 %v6456_v50  ;;  %1138 = vmatpush.msrb.mxu3 %v6423_v14 }
  0x91   :  { %933 = vmatpush.msrb.mxu0 %v6471_v4  ;;  %1010 = vmatpush.msrb.mxu1 %v1009_v45  ;;  %v1027_v45 = vand.u32 4294901760, %v1026_v47  ;;  %v1038_v13 = vsub.f32 %v6511_v56, %v9216_v51  ;;  %v144_v51 = vld [vmem:[#allocation2 + $0x260] sm:$0xff]  ;;  %v1045_v21 = vand.u32 4294901760, %v1044_v34  ;;  %v9223_v34 = vand.u32 4294901760, %v6565_v24 }
  0x92   :  { %1094 = vmatpush.msrb.mxu2 %v6475_v35  ;;  %1140 = vmatpush.msrb.mxu3 %v6430_v30 }
  0x93   :  { %935 = vmatpush.msrb.mxu0 %v6484_v63  ;;  %1016 = vmatpush.msrb.mxu1 %v1015_v3  ;;  %v1033_v3 = vand.u32 4294901760, %v1032_v55  ;;  %v1039_v55 = vand.u32 4294901760, %v1038_v13  ;;  %v9220_v13 = vand.u32 4294901760, %v6352_v37  ;;  %v9222_v37 = vand.u32 4294901760, %v6360_v15 }
  0x94   :  { %1097 = vmatpush.msrb.mxu2 %v6487_v60  ;;  %1142 = vmatpush.msrb.mxu3 %v6447_v27  ;;  %v1344_v26 = vsub.f32 %v6565_v24, %v9223_v34  ;;  %v9224_v15 = vand.u32 4294901760, %v6373_v10  ;;  %v9226_v10 = vand.u32 4294901760, %v6386_v22  ;;  %v6648_v22 = vand.u32 4294901760, %v132_v17 }
  0x95   :  { %937 = vmatpush.msrb.mxu0 %v6504_v52  ;;  %1022 = vmatpush.msrb.mxu1 %v1021_v18  ;;  %v9218_v18 = vand.u32 4294901760, %v6538_v20 }
  0x96   :  { %1100 = vmatpush.msrb.mxu2 %v6497_v32  ;;  %1144 = vmatpush.msrb.mxu3 %v6463_v49 }
  0x97   :  { %939 = vmatpush.msrb.mxu0 %v6507_v41  ;;  %1028 = vmatpush.msrb.mxu1 %v1027_v45  ;;  %v1332_v47 = vsub.f32 %v6538_v20, %v9218_v18  ;;  %v6594_v45 = vand.u32 4294901760, %v144_v51  ;;  %v9221_v18 = vand.u32 4294901760, %v6549_v11 }
  0x98   :  { %1103 = vmatpush.msrb.mxu2 %v6511_v56  ;;  %1146 = vmatpush.msrb.mxu3 %v6471_v4 }
  0x99   :  { %1169 = vmatpush.msra.mxu0 %v9220_v13  ;;  %1034 = vmatpush.msrb.mxu1 %v1033_v3  ;;  %v1338_v36 = vsub.f32 %v6549_v11, %v9221_v18  ;;  %v1333_v3 = vand.u32 4294901760, %v1332_v47  ;;  %v1051_v13 = vand.u32 4294901760, %v1050_v28  ;;  %v135_v18 = vld [vmem:[#allocation2 + $0x218] sm:$0xff]  ;;  %v6620_v11 = vand.u32 4294901760, %v138_v48 }
  0x9a   :  { %1106 = vmatpush.msrb.mxu2 %v6527_v25  ;;  %1148 = vmatpush.msrb.mxu3 %v6484_v63  ;;  %v6618_v63 = vsub.f32 %v144_v51, %v6594_v45  ;;  %v9225_v47 = vand.u32 4294901760, %v6577_v57  ;;  %v6631_v51 = vsub.f32 %v141_v19, %v6607_v46  ;;  %v6633_v34 = vand.u32 4294901760, %v135_v18 }
  0x9b   :  { %1173 = vmatpush.msra.mxu0 %v9222_v37  ;;  %1040 = vmatpush.msrb.mxu1 %v1039_v55  ;;  %v1339_v28 = vand.u32 4294901760, %v1338_v36  ;;  %v9227_v36 = vand.u32 4294901760, %v6592_v40  ;;  %v6643_v19 = vsub.f32 %v138_v48, %v6620_v11  ;;  %v9228_v37 = vand.u32 4294901760, %v6396_v59 }
  0x9c   :  { %1109 = vmatpush.msrb.mxu2 %v6535_v7  ;;  %1150 = vmatpush.msrb.mxu3 %v6504_v52  ;;  %v1350_v55 = vsub.f32 %v6577_v57, %v9225_v47  ;;  %v9099_v47 = vand.u32 4294901760, %v6618_v63  ;;  %v6656_v48 = vsub.f32 %v135_v18, %v6633_v34  ;;  %v9230_v59 = vand.u32 4294901760, %v6413_v1  ;;  %v123_v1 = vld [vmem:[#allocation2 + $0x1b8] sm:$0xff] }
  0x9d   :  { %1177 = vmatpush.msra.mxu0 %v9224_v15  ;;  %1046 = vmatpush.msrb.mxu1 %v1045_v21  ;;  %v1345_v21 = vand.u32 4294901760, %v1344_v26  ;;  %v1356_v15 = vsub.f32 %v6592_v40, %v9227_v36  ;;  %v9100_v36 = vand.u32 4294901760, %v6631_v51  ;;  %v9231_v18 = vand.u32 4294901760, %v6426_v6 }
  0x9e   :  { %1281 = vmatpush.msra.mxu2 %v6513_v53  ;;  %1152 = vmatpush.msrb.mxu3 %v6507_v41  ;;  %v1351_v26 = vand.u32 4294901760, %v1350_v55  ;;  %v1368_v55 = vsub.f32 %v6618_v63, %v9099_v47  ;;  %v9232_v6 = vand.u32 4294901760, %v6433_v43 }
  0x9f   :  { %1181 = vmatpush.msra.mxu0 %v9226_v10  ;;  %1052 = vmatpush.msrb.mxu1 %v1051_v13  ;;  %v129_v10 = vld [vmem:[#allocation2 + $0x1e8] sm:$0xff] }
  0xa0   :  { %1283 = vmatpush.msra.mxu2 %v6522_v62  ;;  %1334 = vmatpush.msra.mxu3 %v1333_v3  ;;  %v9229_v3 = vand.u32 4294901760, %v6605_v0 }
  0xa1   :  { %1185 = vmatpush.msra.mxu0 %v9228_v37  ;;  %1240 = vmatpush.msra.mxu1 %v6336_v31  ;;  %v126_v31 = vld [vmem:[#allocation2 + $0x1d0] sm:$0xff]  ;;  %v1379_v37 = vand.u32 4294901760, %v6643_v19 }
  0xa2   :  { %1285 = vmatpush.msra.mxu2 %v6542_v8  ;;  %1340 = vmatpush.msra.mxu3 %v1339_v28  ;;  %v1362_v13 = vsub.f32 %v6605_v0, %v9229_v3  ;;  %v1357_v28 = vand.u32 4294901760, %v1356_v15  ;;  %v6666_v3 = vand.u32 4294901760, %v129_v10  ;;  %v1374_v15 = vsub.f32 %v6631_v51, %v9100_v36 }
  0xa3   :  { %1189 = vmatpush.msra.mxu0 %v9230_v59  ;;  %1242 = vmatpush.msra.mxu1 %v6343_v23  ;;  %v6672_v23 = vsub.f32 %v132_v17, %v6648_v22  ;;  %v1385_v59 = vand.u32 4294901760, %v6656_v48  ;;  %v6679_v47 = vand.u32 4294901760, %v126_v31  ;;  %v1380_v17 = vsub.f32 %v6643_v19, %v1379_v37 }
  0xa4   :  { %1287 = vmatpush.msra.mxu2 %v6554_v12  ;;  %1346 = vmatpush.msra.mxu3 %v1345_v21  ;;  %v1363_v21 = vand.u32 4294901760, %v1362_v13  ;;  %v6691_v13 = vand.u32 4294901760, %v123_v1  ;;  %v9233_v36 = vand.u32 4294901760, %v6451_v44  ;;  %v1375_v43 = vand.u32 4294901760, %v1374_v15 }
  0xa5   :  { %1193 = vmatpush.msra.mxu0 %v9231_v18  ;;  %1244 = vmatpush.msra.mxu1 %v6349_v42  ;;  %v1369_v42 = vand.u32 4294901760, %v1368_v55  ;;  %v120_v18 = vld [vmem:[#allocation2 + $0x1a0] sm:$0xff]  ;;  %v9234_v55 = vand.u32 4294901760, %v6456_v50 }
  0xa6   :  { %1289 = vmatpush.msra.mxu2 %v6567_v54  ;;  %1352 = vmatpush.msra.mxu3 %v1351_v26  ;;  %v6689_v26 = vsub.f32 %v129_v10, %v6666_v3  ;;  %v6702_v10 = vsub.f32 %v126_v31, %v6679_v47  ;;  %v6707_v44 = vand.u32 4294901760, %v120_v18  ;;  %v6712_v15 = vsub.f32 %v123_v1, %v6691_v13 }
  0xa7   :  { %1197 = vmatpush.msra.mxu0 %v9232_v6  ;;  %1246 = vmatpush.msra.mxu1 %v6365_v16  ;;  %v1391_v16 = vand.u32 4294901760, %v6672_v23  ;;  %v9235_v31 = vand.u32 4294901760, %v6475_v35  ;;  %v9236_v1 = vand.u32 4294901760, %v6487_v60 }
  0xa8   :  { %1291 = vmatpush.msra.mxu2 %v6579_v33  ;;  %1358 = vmatpush.msra.mxu3 %v1357_v28  ;;  %v1386_v28 = vsub.f32 %v6656_v48, %v1385_v59  ;;  %v1403_v6 = vand.u32 4294901760, %v6702_v10  ;;  %v6728_v35 = vsub.f32 %v120_v18, %v6707_v44 }
  0xa9   :  { %1201 = vmatpush.msra.mxu0 %v9233_v36  ;;  %1248 = vmatpush.msra.mxu1 %v6369_v29  ;;  %v117_v29 = vld [vmem:[#allocation2 + $0x188] sm:$0xff]  ;;  %v1381_v36 = vand.u32 4294901760, %v1380_v17  ;;  %v1409_v17 = vand.u32 4294901760, %v6712_v15 }
  0xaa   :  { %1293 = vmatpush.msra.mxu2 %v6594_v45  ;;  %1364 = vmatpush.msra.mxu3 %v1363_v21  ;;  %v1397_v21 = vand.u32 4294901760, %v6689_v26  ;;  %v1387_v50 = vand.u32 4294901760, %v1386_v28  ;;  %v9238_v28 = vand.u32 4294901760, %v6511_v56 }
  0xab   :  { %1205 = vmatpush.msra.mxu0 %v9234_v55  ;;  %1250 = vmatpush.msra.mxu1 %v6383_v58  ;;  %v1392_v58 = vsub.f32 %v6672_v23, %v1391_v16  ;;  %v1410_v55 = vsub.f32 %v6712_v15, %v1409_v17 }
  0xac   :  { %1295 = vmatpush.msra.mxu2 %v6607_v46  ;;  %1370 = vmatpush.msra.mxu3 %v1369_v42  ;;  %v6722_v42 = vand.u32 4294901760, %v117_v29 }
  0xad   :  { %1209 = vmatpush.msra.mxu0 %v9235_v31  ;;  %1252 = vmatpush.msra.mxu1 %v6400_v5  ;;  %v1398_v5 = vsub.f32 %v6689_v26, %v1397_v21  ;;  %v1393_v60 = vand.u32 4294901760, %v1392_v58  ;;  %v1411_v31 = vand.u32 4294901760, %v1410_v55  ;;  %v9240_v58 = vand.u32 4294901760, %v6535_v7  ;;  %v9242_v7 = vld [vmem:[#allocation21_spill] sm:$0xff]  ;;  %v91_v55 = vld [vmem:[#allocation2 + $0xb8] sm:$0xff] }
  0xae   :  { %1297 = vmatpush.msra.mxu2 %v6620_v11  ;;  %1376 = vmatpush.msra.mxu3 %v1375_v43  ;;  %v9237_v43 = vand.u32 4294901760, %v6497_v32  ;;  %v6743_v18 = vsub.f32 %v117_v29, %v6722_v42  ;;  %v1415_v32 = vand.u32 4294901760, %v6728_v35  ;;  %v9239_v29 = vand.u32 4294901760, %v6527_v25 }
  0xaf   :  { %1213 = vmatpush.msra.mxu0 %v9236_v1  ;;  %1254 = vmatpush.msra.mxu1 %v6407_v39  ;;  %v1404_v39 = vsub.f32 %v6702_v10, %v1403_v6 }
  0xb0   :  { %1299 = vmatpush.msra.mxu2 %v6633_v34  ;;  %1382 = vmatpush.msra.mxu3 %v1381_v36  ;;  %v1421_v36 = vand.u32 4294901760, %v6743_v18 }
  0xb1   :  { %1217 = vmatpush.msra.mxu0 %v9237_v43  ;;  %1256 = vmatpush.msra.mxu1 %v6423_v14  ;;  %v1399_v14 = vand.u32 4294901760, %v1398_v5  ;;  %v1405_v56 = vand.u32 4294901760, %v1404_v39  ;;  %v9244_v5 = vld [vmem:[#allocation14_spill] sm:$0xff]  ;;  %v9245_v43 = vld [vmem:[#allocation11_spill] sm:$0xff]  ;;  %v9248_v39 = vand.u32 4294901760, %v9242_v7 }
  0xb2   :  { %1301 = vmatpush.msra.mxu2 %v6648_v22  ;;  %1388 = vmatpush.msra.mxu3 %v1387_v50  ;;  %v1422_v25 = vsub.f32 %v6743_v18, %v1421_v36  ;;  %v9241_v50 = vld [vmem:[#allocation10_spill] sm:$0xff] }
  0xb3   :  { %1112 = vmatmul.f32.vlgmr.msrb.gmra.mxu2 %v6118_v61  ;;  %1221 = vmatpush.msra.mxu0 %v9238_v28  ;;  %v9251_v28 = vand.u32 4294901760, %v6577_v57 }
  0xb4   :  { %1258 = vmatpush.msra.mxu1 %v6430_v30  ;;  %1303 = vmatpush.msra.mxu2 %v6666_v3  ;;  %v1416_v30 = vsub.f32 %v6728_v35, %v1415_v32  ;;  %v1423_v1 = vand.u32 4294901760, %v1422_v25 }
  0xb5   :  { %1394 = vmatpush.msra.mxu3 %v1393_v60  ;;  %945 = vmatmul.f32.vlgmr.msrb.gmra.mxu0 %v6196_v2  ;;  %v9247_v60 = vld [vmem:[#allocation9_spill] sm:$0xff] }
  0xb6   :  { %1156 = vmatmul.f32.vlgmr.msrb.gmra.mxu3 %v6146_v9  ;;  %1225 = vmatpush.msra.mxu0 %v9239_v29 }
  0xb7   :  { %1260 = vmatpush.msra.mxu1 %v6447_v27  ;;  %1305 = vmatpush.msra.mxu2 %v6679_v47  ;;  %v1417_v27 = vand.u32 4294901760, %v1416_v30  ;;  %v88_v30 = vld [vmem:[#allocation2 + $0xa0] sm:$0xff] }
  0xb8   :  { %1400 = vmatpush.msra.mxu3 %v1399_v14  ;;  %1054 = vmatmul.f32.vlgmr.msrb.gmra.mxu1 %v6094_v38 }
  0xb9   :  { %1229 = vmatpush.msra.mxu0 %v9240_v58  ;;  %1262 = vmatpush.msra.mxu1 %v6463_v49  ;;  %v9243_v49 = vld [vmem:[#allocation20_spill] sm:$0xff] }
  0xba   :  { %1307 = vmatpush.msra.mxu2 %v6691_v13  ;;  %1406 = vmatpush.msra.mxu3 %v1405_v56 }
  0xbb   :  { %1436 = vmatpush.msrb.mxu0 %v6538_v20  ;;  %1264 = vmatpush.msra.mxu1 %v6471_v4  ;;  %v9246_v4 = vand.u32 4294901760, %v6538_v20  ;;  %v9249_v20 = vand.u32 4294901760, %v6565_v24 }
  0xbc   :  { %1309 = vmatpush.msra.mxu2 %v6707_v44  ;;  %1412 = vmatpush.msra.mxu3 %v1411_v31 }
  0xbd   :  { %1117 = vmatmul.f32.gmra.mxu2 %v9241_v50  ;;  %1439 = vmatpush.msrb.mxu0 %v9242_v7  ;;  %v6937_v7 = vand.u32 4294901760, %v91_v55 }
  0xbe   :  { %1266 = vmatpush.msra.mxu1 %v9243_v49  ;;  %1311 = vmatpush.msra.mxu2 %v6722_v42 }
  0xbf   :  { %1418 = vmatpush.msra.mxu3 %v1417_v27  ;;  %953 = vmatmul.f32.gmra.mxu0 %v9244_v5 }
  0xc0   :  { %1162 = vmatmul.f32.gmra.mxu3 %v9245_v43  ;;  %1442 = vmatpush.msrb.mxu0 %v6565_v24  ;;  %v9255_v24 = vand.u32 4294901760, %v6618_v63 }
  0xc1   :  { %1541 = vmatpush.msrb.mxu2 %v9246_v4  ;;  %1268 = vmatpush.msra.mxu1 %v6504_v52  ;;  %v9250_v52 = vld [vmem:[#allocation16_spill] sm:$0xff]  ;;  %v6942_v4 = vand.u32 4294901760, %v88_v30 }
  0xc2   :  { %1424 = vmatpush.msra.mxu3 %v1423_v1  ;;  %1058 = vmatmul.f32.gmra.mxu1 %v9247_v60 }
  0xc3   :  { %1445 = vmatpush.msrb.mxu0 %v6577_v57  ;;  %1545 = vmatpush.msrb.mxu2 %v9248_v39  ;;  %v85_v39 = vld [vmem:[#allocation2 + $0x88] sm:$0xff] }
  0xc4   :  { %1612 = vmatpush.msrb.mxu3 %v6513_v53  ;;  %1270 = vmatpush.msra.mxu1 %v6507_v41  ;;  %v9252_v41 = vld [vmem:[#allocation12_spill] sm:$0xff] }
  0xc5   :  { %1448 = vmatpush.msrb.mxu0 %v6592_v40  ;;  %1549 = vmatpush.msrb.mxu2 %v9249_v20  ;;  %v9264_v20 = vld [vmem:[#allocation15_spill] sm:$0xff] }
  0xc6   :  { %1494 = vmatpush.msrb.mxu1 %v6513_v53  ;;  %1614 = vmatpush.msrb.mxu3 %v6522_v62  ;;  %v9253_v53 = vand.u32 4294901760, %v6592_v40 }
  0xc7   :  { %1317 = vmatmul.f32.vlgmr.msra.gmra.mxu2 %v9250_v52  ;;  %1451 = vmatpush.msrb.mxu0 %v6605_v0 }
  0xc8   :  { %1496 = vmatpush.msrb.mxu1 %v6522_v62  ;;  %1553 = vmatpush.msrb.mxu2 %v9251_v28  ;;  %v9254_v62 = vand.u32 4294901760, %v6605_v0  ;;  %v9258_v0 = vld [vmem:[#allocation8_spill] sm:$0xff] }
  0xc9   :  { %1616 = vmatpush.msrb.mxu3 %v6542_v8  ;;  %1231 = vmatmul.f32.vlgmr.msra.gmra.mxu0 %v6094_v38 }
  0xca   :  { %1426 = vmatmul.f32.vlgmr.msra.gmra.mxu3 %v9252_v41  ;;  %1454 = vmatpush.msrb.mxu0 %v6618_v63 }
  0xcb   :  { %1498 = vmatpush.msrb.mxu1 %v6542_v8  ;;  %1557 = vmatpush.msrb.mxu2 %v9253_v53  ;;  %v6912_v14 = vpop.f32.mrf.mxu3 }
  0xcc   :  { %1618 = vmatpush.msrb.mxu3 %v6554_v12  ;;  %1272 = vmatmul.f32.vlgmr.msra.gmra.mxu1 %v6094_v38  ;;  %9263 = vst [vmem:[#allocation23_spill] sm:$0xff] %v6912_v14  ;;  %v70_v14 = vld [vmem:[#allocation2 + $0x10] sm:$0xff] }
  0xcd   :  { %1457 = vmatpush.msrb.mxu0 %v6631_v51  ;;  %1500 = vmatpush.msrb.mxu1 %v6554_v12  ;;  %v9256_v12 = vand.u32 4294901760, %v6631_v51 }
  0xce   :  { %1561 = vmatpush.msrb.mxu2 %v9254_v62  ;;  %1620 = vmatpush.msrb.mxu3 %v6567_v54 }
  0xcf   :  { %1460 = vmatpush.msrb.mxu0 %v6643_v19  ;;  %1502 = vmatpush.msrb.mxu1 %v6567_v54  ;;  %v115_v54 = vld [vmem:[#allocation2 + $0x178] sm:$0xff]  ;;  %v6866_v19 = vpop.f32.mrf.mxu0 }
  0xd0   :  { %1565 = vmatpush.msrb.mxu2 %v9255_v24  ;;  %1622 = vmatpush.msrb.mxu3 %v6579_v33  ;;  %v6840_v63 = vand.u32 4294901760, %v115_v54  ;;  %9259 = vst [vmem:[#allocation21_spill] sm:$0xff] %v6866_v19  ;;  %v160_v19 = vld [vmem:[#allocation2 + $0x2e0] sm:$0xff] }
  0xd1   :  { %1463 = vmatpush.msrb.mxu0 %v6656_v48  ;;  %1504 = vmatpush.msrb.mxu1 %v6579_v33  ;;  %v112_v33 = vld [vmem:[#allocation2 + $0x160] sm:$0xff] }
  0xd2   :  { %1569 = vmatpush.msrb.mxu2 %v9256_v12  ;;  %1624 = vmatpush.msrb.mxu3 %v6594_v45  ;;  %v6847_v8 = vand.u32 4294901760, %v112_v33  ;;  %v6856_v40 = vsub.f32 %v115_v54, %v6840_v63 }
  0xd3   :  { %1466 = vmatpush.msrb.mxu0 %v6672_v23  ;;  %1506 = vmatpush.msrb.mxu1 %v6594_v45  ;;  %v106_v45 = vld [vmem:[#allocation2 + $0x130] sm:$0xff] }
  0xd4   :  { %1573 = vmatpush.msrb.mxu2 %v1379_v37  ;;  %1626 = vmatpush.msrb.mxu3 %v6607_v46  ;;  %v6864_v51 = vsub.f32 %v112_v33, %v6847_v8  ;;  %v6873_v48 = vand.u32 4294901760, %v106_v45  ;;  %v9107_v37 = vand.u32 4294901760, %v6856_v40 }
  0xd5   :  { %1469 = vmatpush.msrb.mxu0 %v6689_v26  ;;  %1508 = vmatpush.msrb.mxu1 %v6607_v46  ;;  %v109_v46 = vld [vmem:[#allocation2 + $0x148] sm:$0xff] }
  0xd6   :  { %1577 = vmatpush.msrb.mxu2 %v1385_v59  ;;  %1628 = vmatpush.msrb.mxu3 %v6620_v11  ;;  %v6853_v57 = vand.u32 4294901760, %v109_v46  ;;  %v100_v59 = vld [vmem:[#allocation2 + $0x100] sm:$0xff]  ;;  %v9261_v26 = vld [vmem:[#allocation13_spill] sm:$0xff] }
  0xd7   :  { %1235 = vmatmul.f32.gmra.mxu0 %v9247_v60  ;;  %1510 = vmatpush.msrb.mxu1 %v6620_v11  ;;  %v9257_v11 = vld [vmem:[#allocation19_spill] sm:$0xff]  ;;  %v210_v25 = vpop.f32.mrf.mxu0 }
  0xd8   :  { %1472 = vmatpush.msrb.mxu0 %v6702_v10  ;;  %1581 = vmatpush.msrb.mxu2 %v1391_v16  ;;  %v6879_v23 = vsub.f32 %v109_v46, %v6853_v57  ;;  %v97_v16 = vld [vmem:[#allocation2 + $0xe8] sm:$0xff]  ;;  %v9106_v10 = vand.u32 4294901760, %v6864_v51  ;;  %v6962_v46 = vand.u32 4294901760, %v85_v39 }
  0xd9   :  { %1630 = vmatpush.msrb.mxu3 %v6633_v34  ;;  %1512 = vmatpush.msrb.mxu1 %v6633_v34  ;;  %v103_v34 = vld [vmem:[#allocation2 + $0x118] sm:$0xff] }
  0xda   :  { %1475 = vmatpush.msrb.mxu0 %v6712_v15  ;;  %1585 = vmatpush.msrb.mxu2 %v1397_v21  ;;  %v6889_v21 = vpop.f32.mrf.mxu2  ;;  %v6893_v15 = vand.u32 4294901760, %v100_v59  ;;  %9265 = vst [vmem:[#allocation24_spill] sm:$0xff] %v6962_v46 }
  0xdb   :  { %1632 = vmatpush.msrb.mxu3 %v6648_v22  ;;  %1325 = vmatmul.f32.gmra.mxu2 %v9257_v11  ;;  %9262 = vst [vmem:[#allocation22_spill] sm:$0xff] %v6889_v21 }
  0xdc   :  { %1478 = vmatpush.msrb.mxu0 %v6728_v35  ;;  %1514 = vmatpush.msrb.mxu1 %v6648_v22  ;;  %v6868_v22 = vpop.f32.mrf.mxu1  ;;  %v6904_v35 = vand.u32 4294901760, %v97_v16 }
  0xdd   :  { %1589 = vmatpush.msrb.mxu2 %v1403_v6  ;;  %1634 = vmatpush.msrb.mxu3 %v6666_v3  ;;  %9260 = vst [vmem:[#allocation20_spill] sm:$0xff] %v6868_v22  ;;  %v1704_v6 = vsub.f32 %v6856_v40, %v9107_v37 }
  0xde   :  { %1430 = vmatmul.f32.gmra.mxu3 %v9258_v0  ;;  %1481 = vmatpush.msrb.mxu0 %v6743_v18  ;;  %v1710_v18 = vsub.f32 %v6864_v51, %v9106_v10 }
  0xdf   :  { %1516 = vmatpush.msrb.mxu1 %v6666_v3  ;;  %1593 = vmatpush.msrb.mxu2 %v1409_v17  ;;  %v6883_v3 = vand.u32 4294901760, %v103_v34  ;;  %v9105_v17 = vand.u32 4294901760, %v6879_v23  ;;  %v1705_v31 = vand.u32 4294901760, %v1704_v6  ;;  %v9267_v6 = vld [vmem:[#allocation17_spill] sm:$0xff] }
  0xe0   :  { %1636 = vmatpush.msrb.mxu3 %v6679_v47  ;;  %1276 = vmatmul.f32.gmra.mxu1 %v9247_v60  ;;  %v1711_v1 = vand.u32 4294901760, %v1710_v18 }
  0xe1   :  { %1484 = vmatmul.f32.vlgmr.msrb.gmra.mxu0 %v9261_v26  ;;  %1518 = vmatpush.msrb.mxu1 %v6679_v47  ;;  %v6896_v47 = vsub.f32 %v106_v45, %v6873_v48  ;;  %v1716_v58 = vsub.f32 %v6879_v23, %v9105_v17  ;;  %v6965_v45 = vsub.f32 %v91_v55, %v6937_v7  ;;  %v6999_v17 = vpop.f32.mrf.mxu0  ;;  %v154_v26 = vld [vmem:[#allocation2 + $0x2b0] sm:$0xff] }
  0xe2   :  { %1653 = vmatpush.msra.mxu0 %v6840_v63  ;;  %1597 = vmatpush.msrb.mxu2 %v1415_v32  ;;  %v94_v32 = vld [vmem:[#allocation2 + $0xd0] sm:$0xff]  ;;  %v6955_v54 = vpop.f32.mrf.mxu2  ;;  %9269 = vst [vmem:[#allocation27_spill] sm:$0xff] %v6999_v17  ;;  %v163_v17 = vld [vmem:[#allocation2 + $0x2f8] sm:$0xff]  ;;  %v7080_v11 = vand.u32 4294901760, %v154_v26 }
  0xe3   :  { %1638 = vmatpush.msrb.mxu3 %v6691_v13  ;;  %1520 = vmatpush.msrb.mxu1 %v6691_v13  ;;  %v6910_v13 = vsub.f32 %v103_v34, %v6883_v3  ;;  %v6921_v29 = vand.u32 4294901760, %v94_v32  ;;  %v9104_v56 = vand.u32 4294901760, %v6896_v47  ;;  %v1717_v24 = vand.u32 4294901760, %v1716_v58  ;;  %v76_v58 = vld [vmem:[#allocation2 + $0x40] sm:$0xff] }
  0xe4   :  { %1655 = vmatpush.msra.mxu0 %v6847_v8  ;;  %1601 = vmatpush.msrb.mxu2 %v1421_v36  ;;  %v6925_v36 = vsub.f32 %v100_v59, %v6893_v15  ;;  %v315_v27 = vpop.f32.mrf.mxu1  ;;  %v6971_v59 = vsub.f32 %v88_v30, %v6942_v4  ;;  %v7007_v37 = vand.u32 4294901760, %v76_v58  ;;  %v7035_v22 = vand.u32 4294901760, %v163_v17 }
  0xe5   :  { %1640 = vmatpush.msrb.mxu3 %v6707_v44  ;;  %1603 = vmatmul.f32.vlgmr.msrb.gmra.mxu2 %v9252_v41  ;;  %v9102_v49 = vand.u32 4294901760, %v6910_v13  ;;  %v1722_v28 = vsub.f32 %v6896_v47, %v9104_v56  ;;  %v6951_v62 = vsub.f32 %v94_v32, %v6921_v29  ;;  %v73_v56 = vld [vmem:[#allocation2 + $0x28] sm:$0xff] }
  0xe6   :  { %1657 = vmatpush.msra.mxu0 %v6853_v57  ;;  %1808 = vmatpush.msra.mxu2 %v6856_v40  ;;  %v9101_v53 = vand.u32 4294901760, %v6925_v36  ;;  %9271 = vst [vmem:[#allocation29_spill] sm:$0xff] %v7007_v37 }
  0xe7   :  { %1522 = vmatpush.msrb.mxu1 %v6707_v44  ;;  %1642 = vmatpush.msrb.mxu3 %v6722_v42  ;;  %v6933_v44 = vsub.f32 %v97_v16, %v6904_v35  ;;  %v1728_v33 = vsub.f32 %v6910_v13, %v9102_v49  ;;  %v79_v16 = vld [vmem:[#allocation2 + $0x58] sm:$0xff]  ;;  %v1723_v32 = vand.u32 4294901760, %v1722_v28  ;;  %v9108_v55 = vand.u32 4294901760, %v6951_v62 }
  0xe8   :  { %1644 = vmatmul.f32.vlgmr.msrb.gmra.mxu3 %v9252_v41  ;;  %1659 = vmatpush.msra.mxu0 %v6873_v48  ;;  %v1734_v18 = vsub.f32 %v6925_v36, %v9101_v53  ;;  %v6987_v28 = vand.u32 4294901760, %v79_v16  ;;  %v6991_v49 = vsub.f32 %v85_v39, %v6962_v46  ;;  %v316_v53 = vadd.f32 %v315_v27, %v210_v25  ;;  %v145_v41 = vld [vmem:[#allocation2 + $0x268] sm:$0xff] }
  0xe9   :  { %1811 = vmatpush.msra.mxu2 %v6864_v51  ;;  %1866 = vmatpush.msra.mxu3 %v6840_v63  ;;  %v9103_v12 = vand.u32 4294901760, %v6933_v44  ;;  %v1746_v39 = vsub.f32 %v6951_v62, %v9108_v55  ;;  %v9274_v27 = vand.u32 4294901760, %v6971_v59  ;;  %v7030_v55 = vand.u32 4294901760, %v70_v14 }
  0xea   :  { %1524 = vmatpush.msrb.mxu1 %v6722_v42  ;;  %1661 = vmatpush.msra.mxu0 %v6883_v3  ;;  %v82_v42 = vld [vmem:[#allocation2 + $0x70] sm:$0xff]  ;;  %9268 = vst [vmem:[#allocation26_spill] sm:$0xff] %v6987_v28  ;;  %v1735_v10 = vand.u32 4294901760, %v1734_v18  ;;  %v7019_v25 = vsub.f32 %v79_v16, %v6987_v28  ;;  %v7027_v21 = vpop.f32.mrf.mxu2  ;;  %v7033_v16 = vsub.f32 %v76_v58, %v7007_v37 }
  0xeb   :  { %1528 = vmatmul.f32.vlgmr.msrb.gmra.mxu1 %v9264_v20  ;;  %1814 = vmatpush.msra.mxu2 %v6879_v23  ;;  %v6968_v34 = vand.u32 4294901760, %v82_v42  ;;  %v1740_v30 = vsub.f32 %v6933_v44, %v9103_v12  ;;  %9275 = vst [vmem:[#allocation30_spill] sm:$0xff] %v7027_v21 }
  0xec   :  { %1706 = vmatpush.msra.mxu1 %v1705_v31  ;;  %1868 = vmatpush.msra.mxu3 %v6847_v8  ;;  %v6979_v31 = vpop.f32.mrf.mxu3 }
  0xed   :  { %1663 = vmatpush.msra.mxu0 %v6893_v15  ;;  %1817 = vmatpush.msra.mxu2 %v6896_v47  ;;  %9266 = vst [vmem:[#allocation25_spill] sm:$0xff] %v6968_v34  ;;  %v6997_v12 = vsub.f32 %v82_v42, %v6968_v34  ;;  %v9272_v42 = vld [vmem:[#allocation18_spill] sm:$0xff] }
  0xee   :  { %1712 = vmatpush.msra.mxu1 %v1711_v1  ;;  %1870 = vmatpush.msra.mxu3 %v6853_v57  ;;  %v1729_v1 = vand.u32 4294901760, %v1728_v33  ;;  %v7002_v33 = vpop.f32.mrf.mxu1 }
  0xef   :  { %1489 = vmatmul.f32.gmra.mxu0 %v9267_v6  ;;  %1607 = vmatmul.f32.gmra.mxu2 %v9258_v0  ;;  %9270 = vst [vmem:[#allocation28_spill] sm:$0xff] %v7002_v33  ;;  %v7015_v33 = vand.u32 4294901760, %v73_v56  ;;  %v7063_v6 = vsub.f32 %v163_v17, %v7035_v22 }
  0xf0   :  { %1665 = vmatpush.msra.mxu0 %v6904_v35  ;;  %1718 = vmatpush.msra.mxu1 %v1717_v24  ;;  %v1741_v24 = vand.u32 4294901760, %v1740_v30  ;;  %v1758_v30 = vsub.f32 %v6971_v59, %v9274_v27  ;;  %v157_v27 = vld [vmem:[#allocation2 + $0x2c8] sm:$0xff] }
  0xf1   :  { %1820 = vmatpush.msra.mxu2 %v6910_v13  ;;  %1872 = vmatpush.msra.mxu3 %v6873_v48  ;;  %v7046_v21 = vsub.f32 %v73_v56, %v7015_v33  ;;  %9279 = vst [vmem:[#allocation32_spill] sm:$0xff] %v7063_v6  ;;  %v9280_v56 = vand.u32 4294901760, %v7019_v25  ;;  %v9283_v5 = vand.u32 4294901760, %v7063_v6 }
  0xf2   :  { %1648 = vmatmul.f32.gmra.mxu3 %v9258_v0  ;;  %1667 = vmatpush.msra.mxu0 %v6921_v29  ;;  %v151_v0 = vld [vmem:[#allocation2 + $0x298] sm:$0xff] }
  0xf3   :  { %1724 = vmatpush.msra.mxu1 %v1723_v32  ;;  %1823 = vmatpush.msra.mxu2 %v6925_v36  ;;  %v9273_v32 = vand.u32 4294901760, %v6965_v45  ;;  %v7093_v60 = vand.u32 4294901760, %v151_v0 }
  0xf4   :  { %1874 = vmatpush.msra.mxu3 %v6883_v3  ;;  %1534 = vmatmul.f32.gmra.mxu1 %v9272_v42  ;;  %v375_v42 = vadd.f32 %v6955_v54, %v316_v53  ;;  %v7048_v20 = vpop.f32.mrf.mxu3  ;;  %v1759_v53 = vand.u32 4294901760, %v1758_v30  ;;  %v9278_v54 = vand.u32 4294901760, %v6997_v12  ;;  %v7065_v30 = vand.u32 4294901760, %v157_v27 }
  0xf5   :  { %1669 = vmatpush.msra.mxu0 %v6937_v7  ;;  %1730 = vmatpush.msra.mxu1 %v1729_v1  ;;  %v1752_v18 = vsub.f32 %v6965_v45, %v9273_v32  ;;  %v1747_v32 = vand.u32 4294901760, %v1746_v39  ;;  %v9276_v39 = vand.u32 4294901760, %v6991_v49  ;;  %9277 = vst [vmem:[#allocation31_spill] sm:$0xff] %v7048_v20  ;;  %v7060_v20 = vsub.f32 %v70_v14, %v7030_v55 }
  0xf6   :  { %1826 = vmatpush.msra.mxu2 %v6933_v44  ;;  %1876 = vmatpush.msra.mxu3 %v6893_v15  ;;  %v533_v58 = vpop.f32.mrf.mxu1  ;;  %v1776_v14 = vsub.f32 %v7019_v25, %v9280_v56  ;;  %v7089_v52 = vsub.f32 %v157_v27, %v7065_v30  ;;  %v139_v27 = vld [vmem:[#allocation2 + $0x238] sm:$0xff] }
  0xf7   :  { %1671 = vmatpush.msra.mxu0 %v6942_v4  ;;  %1736 = vmatpush.msra.mxu1 %v1735_v10  ;;  %v1753_v10 = vand.u32 4294901760, %v1752_v18  ;;  %v1764_v1 = vsub.f32 %v6991_v49, %v9276_v39  ;;  %v7055_v18 = vand.u32 4294901760, %v160_v19  ;;  %v492_v39 = vpop.f32.mrf.mxu0  ;;  %v9284_v43 = vand.u32 4294901760, %v7060_v20 }
  0xf8   :  { %1829 = vmatpush.msra.mxu2 %v6951_v62  ;;  %1878 = vmatpush.msra.mxu3 %v6904_v35 }
  0xf9   :  { %1673 = vmatpush.msra.mxu0 %v6962_v46  ;;  %1742 = vmatpush.msra.mxu1 %v1741_v24  ;;  %v1770_v24 = vsub.f32 %v6997_v12, %v9278_v54  ;;  %v420_v54 = vadd.f32 %v6979_v31, %v375_v42  ;;  %v7078_v42 = vsub.f32 %v160_v19, %v7055_v18 }
  0xfa   :  { %1832 = vmatpush.msra.mxu2 %v6965_v45  ;;  %1880 = vmatpush.msra.mxu3 %v6921_v29  ;;  %v1794_v50 = vsub.f32 %v7060_v20, %v9284_v43 }
  0xfb   :  { %1675 = vmatpush.msra.mxu0 %v6968_v34  ;;  %1748 = vmatpush.msra.mxu1 %v1747_v32  ;;  %v1765_v32 = vand.u32 4294901760, %v1764_v1  ;;  %v1771_v31 = vand.u32 4294901760, %v1770_v24  ;;  %v582_v1 = vpop.f32.mrf.mxu2  ;;  %v148_v24 = vld [vmem:[#allocation2 + $0x280] sm:$0xff]  ;;  %v493_v19 = vadd.f32 %v492_v39, %v420_v54  ;;  %v7103_v39 = vsub.f32 %v154_v26, %v7080_v11 }
  0xfc   :  { %1835 = vmatpush.msra.mxu2 %v6971_v59  ;;  %1882 = vmatpush.msra.mxu3 %v6937_v7  ;;  %v7105_v54 = vand.u32 4294901760, %v148_v24 }
  0xfd   :  { %1677 = vmatpush.msra.mxu0 %v6987_v28  ;;  %1754 = vmatpush.msra.mxu1 %v1753_v10  ;;  %v9281_v10 = vand.u32 4294901760, %v7033_v16  ;;  %v534_v26 = vadd.f32 %v533_v58, %v493_v19  ;;  %v9288_v58 = vand.u32 4294901760, %v7078_v42  ;;  %v7150_v19 = vand.u32 4294901760, %v139_v27 }
  0xfe   :  { %1838 = vmatpush.msra.mxu2 %v6991_v49  ;;  %1884 = vmatpush.msra.mxu3 %v6942_v4 }
  0xff   :  { %1679 = vmatpush.msra.mxu0 %v7007_v37  ;;  %1760 = vmatpush.msra.mxu1 %v1759_v53  ;;  %v1782_v56 = vsub.f32 %v7033_v16, %v9281_v10  ;;  %v1777_v53 = vand.u32 4294901760, %v1776_v14  ;;  %v9282_v10 = vand.u32 4294901760, %v7046_v21  ;;  %v687_v14 = vpop.f32.mrf.mxu3 }
 0x100   :  { %1841 = vmatpush.msra.mxu2 %v6997_v12  ;;  %1886 = vmatpush.msra.mxu3 %v6962_v46  ;;  %v9285_v46 = vand.u32 4294901760, %v6856_v40  ;;  %v7135_v40 = vsub.f32 %v148_v24, %v7105_v54 }
 0x101   :  { %1681 = vmatpush.msra.mxu0 %v7015_v33  ;;  %1766 = vmatpush.msra.mxu1 %v1765_v32  ;;  %v1788_v17 = vsub.f32 %v7046_v21, %v9282_v10  ;;  %v1783_v32 = vand.u32 4294901760, %v1782_v56  ;;  %v2076_v10 = vsub.f32 %v7063_v6, %v9283_v5  ;;  %v7120_v56 = vand.u32 4294901760, %v145_v41  ;;  %v7124_v5 = vpop.f32.mrf.mxu0  ;;  %v7126_v6 = vpop.f32.mrf.mxu1 }
 0x102   :  { %1844 = vmatpush.msra.mxu2 %v7019_v25  ;;  %1888 = vmatpush.msra.mxu3 %v6968_v34  ;;  %v142_v34 = vld [vmem:[#allocation2 + $0x250] sm:$0xff]  ;;  %9286 = vst [vmem:[#allocation33_spill] sm:$0xff] %v7124_v5  ;;  %v9290_v5 = vand.u32 4294901760, %v7089_v52 }
 0x103   :  { %1683 = vmatpush.msra.mxu0 %v7030_v55  ;;  %1772 = vmatpush.msra.mxu1 %v1771_v31  ;;  %v7118_v31 = vsub.f32 %v151_v0, %v7093_v60  ;;  %v1789_v43 = vand.u32 4294901760, %v1788_v17  ;;  %9287 = vst [vmem:[#allocation34_spill] sm:$0xff] %v7126_v6  ;;  %v2082_v0 = vsub.f32 %v7078_v42, %v9288_v58  ;;  %v9289_v17 = vand.u32 4294901760, %v6864_v51  ;;  %v136_v51 = vld [vmem:[#allocation2 + $0x220] sm:$0xff] }
 0x104   :  { %1847 = vmatpush.msra.mxu2 %v7033_v16  ;;  %1890 = vmatpush.msra.mxu3 %v6987_v28  ;;  %v1795_v6 = vand.u32 4294901760, %v1794_v50  ;;  %v583_v28 = vadd.f32 %v582_v1, %v534_v26  ;;  %v7148_v58 = vsub.f32 %v145_v41, %v7120_v56  ;;  %v7155_v50 = vpop.f32.mrf.mxu2 }
 0x105   :  { %1913 = vmatpush.msrb.mxu0 %v9285_v46  ;;  %1778 = vmatpush.msra.mxu1 %v1777_v53  ;;  %v7137_v46 = vand.u32 4294901760, %v142_v34  ;;  %v2077_v53 = vand.u32 4294901760, %v2076_v10  ;;  %v2083_v1 = vand.u32 4294901760, %v2082_v0  ;;  %v9292_v10 = vand.u32 4294901760, %v7103_v39 }
 0x106   :  { %1850 = vmatpush.msra.mxu2 %v7046_v21  ;;  %1892 = vmatpush.msra.mxu3 %v7007_v37  ;;  %v2088_v37 = vsub.f32 %v7089_v52, %v9290_v5  ;;  %v688_v24 = vadd.f32 %v687_v14, %v583_v28  ;;  %v9294_v0 = vand.u32 4294901760, %v7118_v31  ;;  %v9118_v41 = vand.u32 4294901760, %v7148_v58 }
 0x107   :  { %1917 = vmatpush.msrb.mxu0 %v9289_v17  ;;  %1784 = vmatpush.msra.mxu1 %v1783_v32  ;;  %v9291_v32 = vand.u32 4294901760, %v6879_v23  ;;  %v2094_v26 = vsub.f32 %v7103_v39, %v9292_v10  ;;  %v7163_v5 = vsub.f32 %v142_v34, %v7137_v46  ;;  %v9293_v23 = vand.u32 4294901760, %v6896_v47 }
 0x108   :  { %1853 = vmatpush.msra.mxu2 %v7060_v20  ;;  %1894 = vmatpush.msra.mxu3 %v7015_v33  ;;  %v2089_v17 = vand.u32 4294901760, %v2088_v37  ;;  %v2100_v10 = vsub.f32 %v7118_v31, %v9294_v0  ;;  %v7175_v34 = vsub.f32 %v139_v27, %v7150_v19  ;;  %v9295_v47 = vand.u32 4294901760, %v6910_v13  ;;  %v130_v0 = vld [vmem:[#allocation2 + $0x1f0] sm:$0xff] }
 0x109   :  { %1921 = vmatpush.msrb.mxu0 %v9291_v32  ;;  %1790 = vmatpush.msra.mxu1 %v1789_v43  ;;  %v7168_v32 = vand.u32 4294901760, %v136_v51  ;;  %v133_v43 = vld [vmem:[#allocation2 + $0x208] sm:$0xff]  ;;  %v746_v37 = vpop.f32.mrf.mxu0  ;;  %v9297_v28 = vand.u32 4294901760, %v7135_v40  ;;  %v9298_v13 = vand.u32 4294901760, %v6925_v36  ;;  %v9299_v36 = vand.u32 4294901760, %v6933_v44 }
 0x10a   :  { %2025 = vmatpush.msrb.mxu2 %v7035_v22  ;;  %1896 = vmatpush.msra.mxu3 %v7030_v55  ;;  %v7187_v27 = vand.u32 4294901760, %v133_v43  ;;  %v9301_v44 = vand.u32 4294901760, %v6951_v62 }
 0x10b   :  { %1925 = vmatpush.msrb.mxu0 %v9293_v23  ;;  %1796 = vmatpush.msra.mxu1 %v1795_v6  ;;  %v7180_v23 = vpop.f32.mrf.mxu3  ;;  %v2095_v6 = vand.u32 4294901760, %v2094_v26  ;;  %v2106_v14 = vsub.f32 %v7135_v40, %v9297_v28  ;;  %v2101_v26 = vand.u32 4294901760, %v2100_v10  ;;  %v2112_v28 = vsub.f32 %v7148_v58, %v9118_v41 }
 0x10c   :  { %2027 = vmatpush.msrb.mxu2 %v7055_v18  ;;  %2078 = vmatpush.msrb.mxu3 %v2077_v53  ;;  %9296 = vst [vmem:[#allocation35_spill] sm:$0xff] %v7180_v23  ;;  %v2123_v53 = vand.u32 4294901760, %v7175_v34  ;;  %v127_v23 = vld [vmem:[#allocation2 + $0x1d8] sm:$0xff] }
 0x10d   :  { %1929 = vmatpush.msrb.mxu0 %v9295_v47  ;;  %1984 = vmatpush.msrb.mxu1 %v6840_v63  ;;  %v791_v63 = vpop.f32.mrf.mxu1  ;;  %v7193_v47 = vsub.f32 %v136_v51, %v7168_v32  ;;  %v2107_v51 = vand.u32 4294901760, %v2106_v14  ;;  %v7216_v41 = vand.u32 4294901760, %v127_v23  ;;  %v9302_v14 = vand.u32 4294901760, %v6965_v45 }
 0x10e   :  { %2029 = vmatpush.msrb.mxu2 %v7065_v30  ;;  %2084 = vmatpush.msrb.mxu3 %v2083_v1  ;;  %v747_v1 = vadd.f32 %v746_v37, %v688_v24  ;;  %v7210_v37 = vsub.f32 %v133_v43, %v7187_v27  ;;  %v2124_v43 = vsub.f32 %v7175_v34, %v2123_v53 }
 0x10f   :  { %1933 = vmatpush.msrb.mxu0 %v9298_v13  ;;  %1986 = vmatpush.msrb.mxu1 %v6847_v8  ;;  %v7203_v8 = vand.u32 4294901760, %v130_v0  ;;  %v124_v13 = vld [vmem:[#allocation2 + $0x1c0] sm:$0xff] }
 0x110   :  { %2031 = vmatpush.msrb.mxu2 %v7080_v11  ;;  %2090 = vmatpush.msrb.mxu3 %v2089_v17  ;;  %v792_v24 = vadd.f32 %v791_v63, %v747_v1  ;;  %v9300_v17 = vand.u32 4294901760, %v7163_v5  ;;  %v7228_v62 = vand.u32 4294901760, %v124_v13  ;;  %v121_v63 = vld [vmem:[#allocation2 + $0x1a8] sm:$0xff] }
 0x111   :  { %1937 = vmatpush.msrb.mxu0 %v9299_v36  ;;  %1988 = vmatpush.msrb.mxu1 %v6853_v57  ;;  %v864_v57 = vpop.f32.mrf.mxu2  ;;  %v2129_v36 = vand.u32 4294901760, %v7193_v47 }
 0x112   :  { %2033 = vmatpush.msrb.mxu2 %v7093_v60  ;;  %2096 = vmatpush.msrb.mxu3 %v2095_v6  ;;  %v2118_v10 = vsub.f32 %v7163_v5, %v9300_v17  ;;  %v2113_v6 = vand.u32 4294901760, %v2112_v28  ;;  %v865_v1 = vadd.f32 %v864_v57, %v792_v24  ;;  %v2135_v28 = vand.u32 4294901760, %v7210_v37 }
 0x113   :  { %1941 = vmatpush.msrb.mxu0 %v9301_v44  ;;  %1990 = vmatpush.msrb.mxu1 %v6873_v48  ;;  %v7226_v48 = vsub.f32 %v130_v0, %v7203_v8  ;;  %v9303_v17 = vand.u32 4294901760, %v6971_v59  ;;  %v905_v45 = vpop.f32.mrf.mxu3  ;;  %v7239_v0 = vsub.f32 %v127_v23, %v7216_v41  ;;  %v118_v44 = vld [vmem:[#allocation2 + $0x190] sm:$0xff]  ;;  %v7242_v24 = vand.u32 4294901760, %v121_v63 }
 0x114   :  { %2035 = vmatpush.msrb.mxu2 %v7105_v54  ;;  %2102 = vmatpush.msrb.mxu3 %v2101_v26  ;;  %v2119_v26 = vand.u32 4294901760, %v2118_v10  ;;  %v9304_v59 = vand.u32 4294901760, %v6991_v49  ;;  %v7249_v10 = vsub.f32 %v124_v13, %v7228_v62  ;;  %v7252_v23 = vadd.f32 %v905_v45, %v865_v1 }
 0x115   :  { %1945 = vmatpush.msrb.mxu0 %v9302_v14  ;;  %1992 = vmatpush.msrb.mxu1 %v6883_v3  ;;  %v2130_v3 = vsub.f32 %v7193_v47, %v2129_v36  ;;  %v2136_v57 = vsub.f32 %v7210_v37, %v2135_v28  ;;  %v9305_v49 = vand.u32 4294901760, %v6997_v12  ;;  %v2147_v13 = vand.u32 4294901760, %v7239_v0 }
 0x116   :  { %2037 = vmatpush.msrb.mxu2 %v7120_v56  ;;  %2108 = vmatpush.msrb.mxu3 %v2107_v51  ;;  %v2125_v51 = vand.u32 4294901760, %v2124_v43  ;;  %v7265_v43 = vsub.f32 %v121_v63, %v7242_v24  ;;  %v9306_v14 = vand.u32 4294901760, %v7019_v25  ;;  %v7275_v1 = vand.u32 2147483647, %v7252_v23 }
 0x117   :  { %1949 = vmatpush.msrb.mxu0 %v9303_v17  ;;  %1994 = vmatpush.msrb.mxu1 %v6893_v15  ;;  %v2141_v15 = vand.u32 4294901760, %v7226_v48  ;;  %v2137_v63 = vand.u32 4294901760, %v2136_v57  ;;  %v9307_v25 = vand.u32 4294901760, %v7033_v16  ;;  %v9308_v16 = vand.u32 4294901760, %v7046_v21  ;;  %v9312_v57 = vld [vmem:[#allocation32_spill] sm:$0xff] }
 0x118   :  { %2039 = vmatpush.msrb.mxu2 %v7137_v46  ;;  %2114 = vmatpush.msrb.mxu3 %v2113_v6  ;;  %v7257_v6 = vand.u32 4294901760, %v118_v44 }
 0x119   :  { %1953 = vmatpush.msrb.mxu0 %v9304_v59  ;;  %1996 = vmatpush.msrb.mxu1 %v6904_v35  ;;  %v2131_v35 = vand.u32 4294901760, %v2130_v3  ;;  %v2142_v12 = vsub.f32 %v7226_v48, %v2141_v15  ;;  %v9311_v59 = vld [vmem:[#allocation25_spill] sm:$0xff] }
 0x11a   :  { %2041 = vmatpush.msrb.mxu2 %v7150_v19  ;;  %2120 = vmatpush.msrb.mxu3 %v2119_v26  ;;  %v7280_v26 = vsub.f32 %v118_v44, %v7257_v6  ;;  %v9310_v44 = vand.u32 4294901760, %v7060_v20  ;;  %v9315_v20 = vld [vmem:[#allocation11_spill] sm:$0xff] }
 0x11b   :  { %1957 = vmatpush.msrb.mxu0 %v9305_v49  ;;  %1998 = vmatpush.msrb.mxu1 %v6921_v29  ;;  %v2153_v29 = vand.u32 4294901760, %v7249_v10  ;;  %v2143_v17 = vand.u32 4294901760, %v2142_v12  ;;  %v9313_v49 = vld [vmem:[#allocation10_spill] sm:$0xff] }
 0x11c   :  { %2043 = vmatpush.msrb.mxu2 %v7168_v32  ;;  %2126 = vmatpush.msrb.mxu3 %v2125_v51 }
 0x11d   :  { %1856 = vmatmul.f32.vlgmr.msra.gmra.mxu2 %v6118_v61  ;;  %1961 = vmatpush.msrb.mxu0 %v9306_v14  ;;  %v2148_v61 = vsub.f32 %v7239_v0, %v2147_v13 }
 0x11e   :  { %2000 = vmatpush.msrb.mxu1 %v6937_v7  ;;  %2045 = vmatpush.msrb.mxu2 %v7187_v27  ;;  %v2159_v7 = vand.u32 4294901760, %v7265_v43 }
 0x11f   :  { %2132 = vmatpush.msrb.mxu3 %v2131_v35  ;;  %1689 = vmatmul.f32.vlgmr.msra.gmra.mxu0 %v6196_v2  ;;  %v2154_v2 = vsub.f32 %v7249_v10, %v2153_v29  ;;  %v2149_v45 = vand.u32 4294901760, %v2148_v61  ;;  %v9314_v35 = vld [vmem:[#allocation26_spill] sm:$0xff]  ;;  %v9317_v61 = vld [vmem:[#allocation29_spill] sm:$0xff] }
 0x120   :  { %1900 = vmatmul.f32.vlgmr.msra.gmra.mxu3 %v6146_v9  ;;  %1965 = vmatpush.msrb.mxu0 %v9307_v25  ;;  %v2165_v9 = vand.u32 4294901760, %v7280_v26  ;;  %v2160_v3 = vsub.f32 %v7265_v43, %v2159_v7  ;;  %v9318_v25 = vand.u32 4294901760, %v9312_v57 }
 0x121   :  { %2002 = vmatpush.msrb.mxu1 %v6942_v4  ;;  %2047 = vmatpush.msrb.mxu2 %v7203_v8  ;;  %v9309_v4 = vld [vmem:[#allocation24_spill] sm:$0xff]  ;;  %v2155_v51 = vand.u32 4294901760, %v2154_v2  ;;  %v9320_v2 = vand.u32 4294901760, %v7078_v42 }
 0x122   :  { %2138 = vmatpush.msrb.mxu3 %v2137_v63  ;;  %2546 = vrot.lane.b32.xlu1 %v7275_v1, %s5728_s22  ;;  %v2166_v21 = vsub.f32 %v7280_v26, %v2165_v9  ;;  %v2161_v14 = vand.u32 4294901760, %v2160_v3  ;;  %v9316_v63 = vld [vmem:[#allocation14_spill] sm:$0xff]  ;;  %v9325_v3 = vand.u32 4294901760, %v7118_v31 }
 0x123   :  { %1798 = vmatmul.f32.vlgmr.msra.gmra.mxu1 %v6094_v38  ;;  %1969 = vmatpush.msrb.mxu0 %v9308_v16  ;;  %v9321_v16 = vand.u32 4294901760, %v7089_v52 }
 0x124   :  { %2004 = vmatpush.msrb.mxu1 %v9309_v4  ;;  %2049 = vmatpush.msrb.mxu2 %v7216_v41  ;;  %v2167_v12 = vand.u32 4294901760, %v2166_v21 }
 0x125   :  { %2144 = vmatpush.msrb.mxu3 %v2143_v17  ;;  %1973 = vmatpush.msrb.mxu0 %v9310_v44  ;;  %v9319_v17 = vld [vmem:[#allocation9_spill] sm:$0xff]  ;;  %v9326_v44 = vand.u32 4294901760, %v7135_v40 }
 0x126   :  { %2006 = vmatpush.msrb.mxu1 %v9311_v59  ;;  %2051 = vmatpush.msrb.mxu2 %v7228_v62 }
 0x127   :  { %2150 = vmatpush.msrb.mxu3 %v2149_v45  ;;  %2180 = vmatpush.msra.mxu0 %v9312_v57 }
 0x128   :  { %1861 = vmatmul.f32.gmra.mxu2 %v9313_v49  ;;  %2008 = vmatpush.msrb.mxu1 %v9314_v35 }
 0x129   :  { %2053 = vmatpush.msrb.mxu2 %v7242_v24  ;;  %2156 = vmatpush.msrb.mxu3 %v2155_v51 }
 0x12a   :  { %2183 = vmatpush.msra.mxu0 %v7078_v42  ;;  %1906 = vmatmul.f32.gmra.mxu3 %v9315_v20  ;;  %v9323_v42 = vand.u32 4294901760, %v7103_v39 }
 0x12b   :  { %1697 = vmatmul.f32.gmra.mxu0 %v9316_v63  ;;  %2010 = vmatpush.msrb.mxu1 %v9317_v61 }
 0x12c   :  { %2055 = vmatpush.msrb.mxu2 %v7257_v6  ;;  %2162 = vmatpush.msrb.mxu3 %v2161_v14 }
 0x12d   :  { %2186 = vmatpush.msra.mxu0 %v7089_v52  ;;  %1802 = vmatmul.f32.gmra.mxu1 %v9319_v17 }
 0x12e   :  { %2285 = vmatpush.msra.mxu2 %v9318_v25  ;;  %2168 = vmatpush.msrb.mxu3 %v2167_v12 }
 0x12f   :  { %2012 = vmatpush.msrb.mxu1 %v7015_v33  ;;  %2189 = vmatpush.msra.mxu0 %v7103_v39  ;;  %v9322_v33 = vld [vmem:[#allocation16_spill] sm:$0xff] }
 0x130   :  { %2289 = vmatpush.msra.mxu2 %v9320_v2  ;;  %2356 = vmatpush.msra.mxu3 %v7035_v22 }
 0x131   :  { %2014 = vmatpush.msrb.mxu1 %v7030_v55  ;;  %2192 = vmatpush.msra.mxu0 %v7118_v31 }
 0x132   :  { %2293 = vmatpush.msra.mxu2 %v9321_v16  ;;  %v946_v45 = vpop.f32.mrf.mxu0  ;;  %2358 = vmatpush.msra.mxu3 %v7055_v18 }
 0x133   :  { %2238 = vmatpush.msra.mxu1 %v7035_v22  ;;  %2061 = vmatmul.f32.vlgmr.msrb.gmra.mxu2 %v9322_v33  ;;  %v9324_v22 = vld [vmem:[#allocation12_spill] sm:$0xff] }
 0x134   :  { %2195 = vmatpush.msra.mxu0 %v7135_v40  ;;  %2297 = vmatpush.msra.mxu2 %v9323_v42 }
 0x135   :  { %2240 = vmatpush.msra.mxu1 %v7055_v18  ;;  %2360 = vmatpush.msra.mxu3 %v7065_v30  ;;  %v1055_v55 = vpop.f32.mrf.mxu1 }
 0x136   :  { %1975 = vmatmul.f32.vlgmr.msrb.gmra.mxu0 %v6094_v38  ;;  %2170 = vmatmul.f32.vlgmr.msrb.gmra.mxu3 %v9324_v22  ;;  %v1056_v52 = vadd.f32 %v1055_v55, %v946_v45  ;;  %v1113_v4 = vpop.f32.mrf.mxu2 }
 0x137   :  { %2198 = vmatpush.msra.mxu0 %v7148_v58  ;;  %2242 = vmatpush.msra.mxu1 %v7065_v30  ;;  %v9327_v30 = vand.u32 4294901760, %v7148_v58 }
 0x138   :  { %2301 = vmatpush.msra.mxu2 %v9325_v3  ;;  %2362 = vmatpush.msra.mxu3 %v7080_v11  ;;  %v1114_v18 = vadd.f32 %v1113_v4, %v1056_v52 }
 0x139   :  { %2016 = vmatmul.f32.vlgmr.msrb.gmra.mxu1 %v6094_v38  ;;  %2201 = vmatpush.msra.mxu0 %v7163_v5  ;;  %v1157_v39 = vpop.f32.mrf.mxu3  ;;  %v9328_v38 = vld [vmem:[#allocation19_spill] sm:$0xff] }
 0x13a   :  { %2244 = vmatpush.msra.mxu1 %v7080_v11  ;;  %2305 = vmatpush.msra.mxu2 %v9326_v44  ;;  %v1158_v51 = vadd.f32 %v1157_v39, %v1114_v18  ;;  %v9329_v11 = vand.u32 4294901760, %v7163_v5 }
 0x13b   :  { %2364 = vmatpush.msra.mxu3 %v7093_v60  ;;  %2204 = vmatpush.msra.mxu0 %v7175_v34 }
 0x13c   :  { %2246 = vmatpush.msra.mxu1 %v7093_v60  ;;  %2309 = vmatpush.msra.mxu2 %v9327_v30  ;;  %v954_v31 = vpop.f32.mrf.mxu0  ;;  %v9330_v60 = vld [vmem:[#allocation8_spill] sm:$0xff] }
 0x13d   :  { %2366 = vmatpush.msra.mxu3 %v7105_v54  ;;  %2069 = vmatmul.f32.gmra.mxu2 %v9328_v38 }
 0x13e   :  { %2207 = vmatpush.msra.mxu0 %v7193_v47  ;;  %2248 = vmatpush.msra.mxu1 %v7105_v54 }
 0x13f   :  { %2313 = vmatpush.msra.mxu2 %v9329_v11  ;;  %2368 = vmatpush.msra.mxu3 %v7120_v56  ;;  %v1059_v40 = vpop.f32.mrf.mxu1 }
 0x140   :  { %1979 = vmatmul.f32.gmra.mxu0 %v9319_v17  ;;  %2174 = vmatmul.f32.gmra.mxu3 %v9330_v60  ;;  %v1118_v58 = vpop.f32.mrf.mxu2 }
 0x141   :  { %2210 = vmatpush.msra.mxu0 %v7210_v37  ;;  %2250 = vmatpush.msra.mxu1 %v7120_v56  ;;  %v9332_v37 = vld [vmem:[#allocation17_spill] sm:$0xff] }
 0x142   :  { %2317 = vmatpush.msra.mxu2 %v2123_v53  ;;  %2370 = vmatpush.msra.mxu3 %v7137_v46  ;;  %v9331_v53 = vld [vmem:[#allocation13_spill] sm:$0xff] }
 0x143   :  { %2020 = vmatmul.f32.gmra.mxu1 %v9319_v17  ;;  %2213 = vmatpush.msra.mxu0 %v7226_v48  ;;  %v1163_v54 = vpop.f32.mrf.mxu3 }
 0x144   :  { %2252 = vmatpush.msra.mxu1 %v7137_v46  ;;  %2321 = vmatpush.msra.mxu2 %v2129_v36  ;;  %v9333_v36 = vld [vmem:[#allocation15_spill] sm:$0xff] }
 0x145   :  { %2372 = vmatpush.msra.mxu3 %v7150_v19  ;;  %2216 = vmatpush.msra.mxu0 %v7239_v0 }
 0x146   :  { %2254 = vmatpush.msra.mxu1 %v7150_v19  ;;  %2325 = vmatpush.msra.mxu2 %v2135_v28  ;;  %v1232_v56 = vpop.f32.mrf.mxu0  ;;  %v9334_v28 = vld [vmem:[#allocation18_spill] sm:$0xff] }
 0x147   :  { %2374 = vmatpush.msra.mxu3 %v7168_v32  ;;  %2219 = vmatpush.msra.mxu0 %v7249_v10  ;;  %v1233_v5 = vadd.f32 %v1232_v56, %v1158_v51 }
 0x148   :  { %2256 = vmatpush.msra.mxu1 %v7168_v32  ;;  %2329 = vmatpush.msra.mxu2 %v2141_v15 }
 0x149   :  { %2376 = vmatpush.msra.mxu3 %v7187_v27  ;;  %2222 = vmatpush.msra.mxu0 %v7265_v43  ;;  %v1273_v46 = vpop.f32.mrf.mxu1 }
 0x14a   :  { %2258 = vmatpush.msra.mxu1 %v7187_v27  ;;  %2333 = vmatpush.msra.mxu2 %v2147_v13  ;;  %v1274_v19 = vadd.f32 %v1273_v46, %v1233_v5  ;;  %v1318_v34 = vpop.f32.mrf.mxu2 }
 0x14b   :  { %2378 = vmatpush.msra.mxu3 %v7203_v8  ;;  %2225 = vmatpush.msra.mxu0 %v7280_v26 }
 0x14c   :  { %2260 = vmatpush.msra.mxu1 %v7203_v8  ;;  %2337 = vmatpush.msra.mxu2 %v2153_v29  ;;  %v1319_v32 = vadd.f32 %v1318_v34, %v1274_v19 }
 0x14d   :  { %2380 = vmatpush.msra.mxu3 %v7216_v41  ;;  %2228 = vmatmul.f32.vlgmr.msra.gmra.mxu0 %v9331_v53  ;;  %v1427_v27 = vpop.f32.mrf.mxu3 }
 0x14e   :  { %2262 = vmatpush.msra.mxu1 %v7216_v41  ;;  %2341 = vmatpush.msra.mxu2 %v2159_v7  ;;  %v1428_v47 = vadd.f32 %v1427_v27, %v1319_v32  ;;  %v1060_v41 = vadd.f32 %v1059_v40, %v954_v31 }
 0x14f   :  { %2382 = vmatpush.msra.mxu3 %v7228_v62 }
 0x150   :  { %2264 = vmatpush.msra.mxu1 %v7228_v62  ;;  %2345 = vmatpush.msra.mxu2 %v2165_v9  ;;  %v1119_v48 = vadd.f32 %v1118_v58, %v1060_v41 }
 0x151   :  { %2384 = vmatpush.msra.mxu3 %v7242_v24  ;;  %2347 = vmatmul.f32.vlgmr.msra.gmra.mxu2 %v9324_v22 }
 0x152   :  { %2266 = vmatpush.msra.mxu1 %v7242_v24  ;;  %v1164_v62 = vadd.f32 %v1163_v54, %v1119_v48 }
 0x153   :  { %2386 = vmatpush.msra.mxu3 %v7257_v6 }
 0x154   :  { %2388 = vmatmul.f32.vlgmr.msra.gmra.mxu3 %v9324_v22  ;;  %2268 = vmatpush.msra.mxu1 %v7257_v6  ;;  %v1236_v8 = vpop.f32.mrf.mxu0 }
 0x155   :  { %2233 = vmatmul.f32.gmra.mxu0 %v9332_v37  ;;  %2272 = vmatmul.f32.vlgmr.msra.gmra.mxu1 %v9333_v36  ;;  %v1237_v13 = vadd.f32 %v1236_v8, %v1164_v62 }
 0x159   :  { %2351 = vmatmul.f32.gmra.mxu2 %v9330_v60 }
 0x15c   :  { %2392 = vmatmul.f32.gmra.mxu3 %v9330_v60 }
 0x15d   :  { %2278 = vmatmul.f32.gmra.mxu1 %v9334_v28  ;;  %v1277_v0 = vpop.f32.mrf.mxu1 }
 0x15e   :  { %v1485_v24 = vpop.f32.mrf.mxu0  ;;  %v1326_v15 = vpop.f32.mrf.mxu2  ;;  %v1278_v6 = vadd.f32 %v1277_v0, %v1237_v13 }
 0x15f   :  { %v1486_v10 = vadd.f32 %v1485_v24, %v1428_v47 }
 0x160   :  { %v1327_v29 = vadd.f32 %v1326_v15, %v1278_v6 }
 0x161   :  { %v1431_v43 = vpop.f32.mrf.mxu3 }
 0x162   :  { %v1432_v57 = vadd.f32 %v1431_v43, %v1327_v29 }
 0x168   :  { %v1529_v26 = vpop.f32.mrf.mxu1  ;;  %v1604_v7 = vpop.f32.mrf.mxu2 }
 0x169   :  { %v1530_v9 = vadd.f32 %v1529_v26, %v1486_v10 }
 0x16b   :  { %v1605_v59 = vadd.f32 %v1604_v7, %v1530_v9  ;;  %v1645_v21 = vpop.f32.mrf.mxu3 }
 0x16c   :  { %v1490_v49 = vpop.f32.mrf.mxu0 }
 0x16d   :  { %v7419_v35 = vadd.f32 %v1645_v21, %v1605_v59  ;;  %v1491_v14 = vadd.f32 %v1490_v49, %v1432_v57 }
 0x171   :  { %v1535_v20 = vpop.f32.mrf.mxu1 }
 0x172   :  { %v1536_v12 = vadd.f32 %v1535_v20, %v1491_v14  ;;  %v1608_v63 = vpop.f32.mrf.mxu2 }
 0x174   :  { %v1609_v61 = vadd.f32 %v1608_v63, %v1536_v12 }
 0x175   :  { %v1649_v25 = vpop.f32.mrf.mxu3 }
 0x176   :  { %v7421_v17 = vadd.f32 %v1649_v25, %v1609_v61 }
 0x178   :  { %v7424_v2 = vand.u32 2147483647, %v7421_v17 }
 0x17a   :  { %2440 = vrot.lane.b32.xlu0 %v7424_v2, %s5729_s0  ;;  %2548 = vrot.lane.b32.xlu1 %v7424_v2, %s5728_s22 }
 0x19c   :  { %v1690_v16 = vpop.f32.mrf.mxu0 }
 0x1a0   :  { %v1799_v45 = vpop.f32.mrf.mxu1  ;;  %v1857_v42 = vpop.f32.mrf.mxu2 }
 0x1a1   :  { %v1800_v33 = vadd.f32 %v1799_v45, %v1690_v16 }
 0x1a3   :  { %v1858_v55 = vadd.f32 %v1857_v42, %v1800_v33  ;;  %v1901_v22 = vpop.f32.mrf.mxu3 }
 0x1a5   :  { %v1902_v52 = vadd.f32 %v1901_v22, %v1858_v55 }
 0x1a8   :  { %v1698_v4 = vpop.f32.mrf.mxu0 }
 0x1aa   :  { %v1803_v3 = vpop.f32.mrf.mxu1 }
 0x1ab   :  { %v1862_v18 = vpop.f32.mrf.mxu2  ;;  %v1804_v58 = vadd.f32 %v1803_v3, %v1698_v4 }
 0x1ad   :  { %v1907_v39 = vpop.f32.mrf.mxu3  ;;  %v1863_v56 = vadd.f32 %v1862_v18, %v1804_v58 }
 0x1af   :  { %v1908_v5 = vadd.f32 %v1907_v39, %v1863_v56 }
 0x1b3   :  { %v1976_v44 = vpop.f32.mrf.mxu0 }
 0x1b4   :  { %v1977_v51 = vadd.f32 %v1976_v44, %v1902_v52 }
 0x1b6   :  { %v2017_v30 = vpop.f32.mrf.mxu1  ;;  %v2062_v31 = vpop.f32.mrf.mxu2 }
 0x1b7   :  { %v2018_v38 = vadd.f32 %v2017_v30, %v1977_v51 }
 0x1b9   :  { %v2063_v11 = vadd.f32 %v2062_v31, %v2018_v38  ;;  %v2171_v40 = vpop.f32.mrf.mxu3 }
 0x1bb   :  { %v2172_v60 = vadd.f32 %v2171_v40, %v2063_v11 }
 0x1bd   :  { %v1980_v54 = vpop.f32.mrf.mxu0 }
 0x1be   :  { %v1981_v34 = vadd.f32 %v1980_v54, %v1908_v5 }
 0x1c0   :  { %v2021_v46 = vpop.f32.mrf.mxu1  ;;  %v2070_v53 = vpop.f32.mrf.mxu2 }
 0x1c1   :  { %v2022_v27 = vadd.f32 %v2021_v46, %v1981_v34 }
 0x1c3   :  { %v2175_v47 = vpop.f32.mrf.mxu3  ;;  %v2071_v8 = vadd.f32 %v2070_v53, %v2022_v27 }
 0x1c5   :  { %v2176_v28 = vadd.f32 %v2175_v47, %v2071_v8 }
 0x1ca   :  { %v2229_v19 = vpop.f32.mrf.mxu0 }
 0x1cb   :  { %v2230_v32 = vadd.f32 %v2229_v19, %v2172_v60 }
 0x1d2   :  { %v2273_v41 = vpop.f32.mrf.mxu1  ;;  %v2234_v62 = vpop.f32.mrf.mxu0 }
 0x1d3   :  { %v2274_v37 = vadd.f32 %v2273_v41, %v2230_v32  ;;  %v2235_v15 = vadd.f32 %v2234_v62, %v2176_v28 }
 0x1d4   :  { %v2348_v36 = vpop.f32.mrf.mxu2 }
 0x1d5   :  { %v2349_v48 = vadd.f32 %v2348_v36, %v2274_v37 }
 0x1d7   :  { %v2389_v0 = vpop.f32.mrf.mxu3 }
 0x1d8   :  { %v7430_v24 = vadd.f32 %v2389_v0, %v2349_v48 }
 0x1da   :  { %v2279_v10 = vpop.f32.mrf.mxu1 }
 0x1db   :  { %v2280_v13 = vadd.f32 %v2279_v10, %v2235_v15 }
 0x1dc   :  { %v2352_v43 = vpop.f32.mrf.mxu2 }
 0x1dd   :  { %v2353_v6 = vadd.f32 %v2352_v43, %v2280_v13 }
 0x1df   :  { %v2393_v29 = vpop.f32.mrf.mxu3 }
 0x1e0   :  { %v7432_v26 = vadd.f32 %v2393_v29, %v2353_v6 }
 0x1e2   :  { %v2437_v7 = vand.u32 2147483647, %v7432_v26 }
 0x1e4   :  { %2442 = vrot.lane.b32.xlu0 %v2437_v7, %s5729_s0 }
 0x1ec   :  { %v2441_v9 = vpop.permute.xlu0 %2440 }
 0x256   :  { %v2443_v59 = vpop.permute.xlu0 %2442 }
 0x257   :  { %v2444_v21 = vsel %vm2405_vm0, %v2441_v9, %v2443_v59  ;;  %v2448_v57 = vmax.f32 %v7424_v2, %v2443_v59  ;;  %v2450_v44 = vmin.f32 %v7424_v2, %v2443_v59 }
 0x258   :  { %v2447_v49 = vmax.f32 %v7275_v1, %v2444_v21  ;;  %v2449_v31 = vmin.f32 %v7275_v1, %v2444_v21 }
 0x259   :  { %v2452_v14 = vmax.f32 %v2448_v57, 1e-30 }
 0x25a   :  { %v2451_v20 = vmax.f32 %v2447_v49, 1e-30 }
 0x25b   :  { %5659 = vrcp.f32 %v2452_v14  ;;  %v2479_v33 = vand.u32 2147483648, %v2452_v14  ;;  %v2477_v22 = vand.u32 2147483647, %v2452_v14  ;;  %vm2473_vm3 = vweird.f32 %v2452_v14 }
 0x25c   :  { %5661 = vrcp.f32 %v2451_v20  ;;  %v2464_v42 = vand.u32 2147483648, %v2451_v20  ;;  %v2462_v4 = vand.u32 2147483647, %v2451_v20  ;;  %vm2458_vm4 = vweird.f32 %v2451_v20 }
 0x25d   :  { %v2480_v39 = vor.u32 1.1754944e-38, %v2479_v33  ;;  %vm2478_vm7 = vcmp.eq.f32.partialorder %v2477_v22, 8.507059e+37 }
 0x25e   :  { %v2465_v51 = vor.u32 1.1754944e-38, %v2464_v42  ;;  %vm2463_vm8 = vcmp.eq.f32.partialorder %v2462_v4, 8.507059e+37 }
 0x261   :  { %v5660_v12 = vpop.eup %5659 }
 0x262   :  { %v5662_v63 = vpop.eup %5661  ;;  %v2469_v61 = vmul.f32 %v5660_v12, %v2452_v14  ;;  %vm2474_vm1 = vweird.f32 %v5660_v12 }
 0x263   :  { %v2454_v25 = vmul.f32 %v5662_v63, %v2451_v20  ;;  %vm2459_vm2 = vweird.f32 %v5662_v63  ;;  %vm2475_vm5 = vmor %vm2473_vm3, %vm2474_vm1 }
 0x264   :  { %v2470_v16 = vsub.f32 1.0, %v2469_v61  ;;  %vm2460_vm6 = vmor %vm2458_vm4, %vm2459_vm2  ;;  %vm2550_vm4 = vcmask 130048  }
 0x265   :  { %v2455_v45 = vsub.f32 1.0, %v2454_v25 }
 0x266   :  { %v2471_v55 = vmul.f32 %v5660_v12, %v2470_v16 }
 0x267   :  { %v2456_v52 = vmul.f32 %v5662_v63, %v2455_v45 }
 0x268   :  { %v2472_v3 = vadd.f32 %v5660_v12, %v2471_v55 }
 0x269   :  { %v2457_v18 = vadd.f32 %v5662_v63, %v2456_v52 }
 0x26a   :  { %v2476_v30 = vsel %vm2475_vm5, %v5660_v12, %v2472_v3 }
 0x26b   :  { %v2461_v38 = vsel %vm2460_vm6, %v5662_v63, %v2457_v18  ;;  %v2481_v11 = vsel %vm2478_vm7, %v2480_v39, %v2476_v30  ;;  %vm2579_vm7 = vcmp.lt.f32.partialorder %v7421_v17, 0.0 }
 0x26c   :  { %v2466_v40 = vsel %vm2463_vm8, %v2465_v51, %v2461_v38  ;;  %v7443_v60 = vmul.f32 %v2481_v11, %v2450_v44  ;;  %vm2578_vm8 = vcmp.lt.f32.partialorder %v7252_v23, 0.0 }
 0x26d   :  { %v7445_v58 = vmul.f32 %v2466_v40, %v2449_v31 }
 0x26e   :  { %v2488_v54 = vadd.f32 1.0, %v7443_v60  ;;  %v5601_v28 = vadd.f32 -1.0, %v7443_v60  ;;  %vm2484_vm2 = vcmp.gt.f32.partialorder %v7443_v60, 0.41421357 }
 0x26f   :  { %v2487_v56 = vadd.f32 1.0, %v7445_v58  ;;  %v5600_v13 = vadd.f32 -1.0, %v7445_v58  ;;  %vm2483_vm3 = vcmp.gt.f32.partialorder %v7445_v58, 0.41421357 }
 0x270   :  { %5663 = vrcp.f32 %v2488_v54  ;;  %v2515_v1 = vand.u32 2147483648, %v2488_v54  ;;  %v2513_v47 = vand.u32 2147483647, %v2488_v54  ;;  %vm2509_vm11 = vweird.f32 %v2488_v54 }
 0x271   :  { %5665 = vrcp.f32 %v2487_v56  ;;  %v2500_v41 = vand.u32 2147483648, %v2487_v56  ;;  %v2498_v37 = vand.u32 2147483647, %v2487_v56  ;;  %vm2494_vm13 = vweird.f32 %v2487_v56 }
 0x272   :  { %v2516_v48 = vor.u32 1.1754944e-38, %v2515_v1  ;;  %vm2514_vm14 = vcmp.eq.f32.partialorder %v2513_v47, 8.507059e+37 }
 0x273   :  { %v2501_v15 = vor.u32 1.1754944e-38, %v2500_v41  ;;  %vm2499_vm1 = vcmp.eq.f32.partialorder %v2498_v37, 8.507059e+37  ;;  %v5731_v41 = vmov 4   ;;  %v5733_v37 = vmov 3  }
 0x274   :  { %5649 = vset.pattern.permute.xlu1 %v5731_v41 }
 0x276   :  { %v5664_v5 = vpop.eup %5663 }
 0x277   :  { %v5666_v46 = vpop.eup %5665  ;;  %v2505_v19 = vmul.f32 %v5664_v5, %v2488_v54  ;;  %vm2510_vm9 = vweird.f32 %v5664_v5  ;;  %v2547_v54 = vpop.permute.xlu1 %2546 }
 0x278   :  { %v2490_v34 = vmul.f32 %v5666_v46, %v2487_v56  ;;  %vm2495_vm10 = vweird.f32 %v5666_v46  ;;  %vm2511_vm12 = vmor %vm2509_vm11, %vm2510_vm9  ;;  %vm2554_vm5 = vcmp.gt.f32.partialorder %v7424_v2, %v2547_v54  ;;  %v7480_v2 = vld [vmem:[%s9032_s4] sm:$0xff]  ;;  %s5737_s4 = smov 120   ;;  %vm2602_vm9 = vcmp.lt.f32.partialorder %v7432_v26, 0.0 }
 0x279   :  { %v2506_v32 = vsub.f32 1.0, %v2505_v19  ;;  %vm2496_vm15 = vmor %vm2494_vm13, %vm2495_vm10  ;;  %v2814_v26 = vld [vmem:[%s9033_s5] sm:$0xff]  ;;  %vm2661_vm10 = vcmask 990208   ;;  %vm2634_vm11 = vcmask 998400   ;;  %vm2638_vm13 = vcmask 80896  }
 0x27a   :  { %v2491_v53 = vsub.f32 1.0, %v2490_v34 }
 0x27b   :  { %v2507_v27 = vmul.f32 %v5664_v5, %v2506_v32 }
 0x27c   :  { %v2492_v8 = vmul.f32 %v5666_v46, %v2491_v53 }
 0x27d   :  { %v2508_v36 = vadd.f32 %v5664_v5, %v2507_v27 }
 0x27e   :  { %v2493_v62 = vadd.f32 %v5666_v46, %v2492_v8  ;;  %v5732_v8 = vmov 1  }
 0x27f   :  { %v2512_v0 = vsel %vm2511_vm12, %v5664_v5, %v2508_v36  ;;  %v2549_v5 = vpop.permute.xlu1 %2548  ;;  %5651 = vset.pattern.permute.xlu0 %v5732_v8  ;;  %v5734_v36 = vmov 2   ;;  %vm2665_vm12 = vcmask 72704  }
 0x280   :  { %v2517_v10 = vsel %vm2514_vm14, %v2516_v48, %v2512_v0  ;;  %v2497_v43 = vsel %vm2496_vm15, %v5666_v46, %v2493_v62  ;;  %vm2704_vm14 = vcmask 924672   ;;  %vm2708_vm15 = vcmask 7168  }
 0x281   :  { %v2518_v6 = vmul.f32 %v5601_v28, %v2517_v10  ;;  %v2502_v29 = vsel %vm2499_vm1, %v2501_v15, %v2497_v43  ;;  %vm2679_vm1 = vcmask 982016  }
 0x282   :  { %v2503_v9 = vmul.f32 %v5600_v13, %v2502_v29 }
 0x283   :  { %v2520_v59 = vsel %vm2484_vm2, %v2518_v6, %v7443_v60  ;;  %v2551_v60 = vsel %vm2550_vm4, %v2547_v54, %v2549_v5 }
 0x284   :  { %v2522_v21 = vmul.f32 %v2520_v59, %v2520_v59  ;;  %v2519_v57 = vsel %vm2483_vm3, %v2503_v9, %v7445_v58  ;;  %vm2555_vm6 = vcmp.gt.f32.partialorder %v2437_v7, %v2551_v60  ;;  %v9126_v7 = vmov 0  }
 0x285   :  { %v2521_v49 = vmul.f32 %v2519_v57, %v2519_v57  ;;  %5650 = vset.pattern.permute.xlu2 %v9126_v7  ;;  %v5735_v9 = vmov 6  }
 0x286   :  { %v2524_v14 = vmul.f32 0.080537446, %v2522_v21 }
 0x287   :  { %v2523_v20 = vmul.f32 0.080537446, %v2521_v49 }
 0x288   :  { %v5603_v12 = vadd.f32 -0.13877685, %v2524_v14 }
 0x289   :  { %v5602_v63 = vadd.f32 -0.13877685, %v2523_v20 }
 0x28a   :  { %v2528_v61 = vmul.f32 %v5603_v12, %v2522_v21 }
 0x28b   :  { %v2527_v25 = vmul.f32 %v5602_v63, %v2521_v49 }
 0x28c   :  { %v2530_v16 = vadd.f32 0.19977711, %v2528_v61 }
 0x28d   :  { %v2529_v45 = vadd.f32 0.19977711, %v2527_v25  ;;  %v5743_v25 = vmov 7  }
 0x28e   :  { %v2532_v33 = vmul.f32 %v2530_v16, %v2522_v21 }
 0x28f   :  { %v2531_v42 = vmul.f32 %v2529_v45, %v2521_v49 }
 0x290   :  { %v5605_v55 = vadd.f32 -0.3333295, %v2532_v33 }
 0x291   :  { %v5604_v22 = vadd.f32 -0.3333295, %v2531_v42  ;;  %v5746_v42 = vmov 8  }
 0x292   :  { %v2536_v52 = vmul.f32 %v5605_v55, %v2522_v21 }
 0x293   :  { %v2535_v4 = vmul.f32 %v5604_v22, %v2521_v49  ;;  %v5265_v22 = vld [vmem:[%s9036_s8] sm:$0xff] }
 0x294   :  { %v2538_v3 = vmul.f32 %v2536_v52, %v2520_v59 }
 0x295   :  { %v2537_v18 = vmul.f32 %v2535_v4, %v2519_v57  ;;  %v7525_v4 = vmul.f32 %v7419_v35, %v7419_v35 }
 0x296   :  { %v2540_v39 = vadd.f32 %v2538_v3, %v2520_v59  ;;  %v5736_v59 = vmov 5   ;;  %v2398_v3 = vmul.f32 %v7430_v24, %v7430_v24  ;;  %v2625_v24 = vld [vmem:[%s9034_s6] ss:$2 sm:$0x3] }
 0x297   :  { %v2539_v44 = vadd.f32 %v2537_v18, %v2519_v57 }
 0x298   :  { %v2542_v51 = vadd.f32 0.7853982, %v2540_v39 }
 0x299   :  { %v2541_v30 = vadd.f32 0.7853982, %v2539_v44 }
 0x29a   :  { %v2544_v31 = vsel %vm2484_vm2, %v2542_v51, %v2540_v39  ;;  %vm2683_vm2 = vcmask 64512  }
 0x29b   :  { %2571 = vrot.lane.b32.xlu1 %v2544_v31, %s5728_s22  ;;  %v2543_v38 = vsel %vm2483_vm3, %v2541_v30, %v2539_v44  ;;  %v2557_v40 = vsub.f32 1.5707964, %v2544_v31  ;;  %vm2761_vm3 = vcmask 850944  }
 0x29c   :  { %2569 = vrot.lane.b32.xlu0 %v2543_v38, %s5728_s22  ;;  %v2556_v11 = vsub.f32 1.5707964, %v2543_v38 }
 0x29e   :  { %2560 = vrot.lane.b32.xlu2 %v2556_v11, %s5728_s22 }
 0x2a6   :  { %2562 = vrot.lane.b32.xlu2 %v2557_v40, %s5728_s22 }
 0x2f8   :  { %v2561_v56 = vpop.permute.xlu2 %2560 }
 0x300   :  { %v2563_v46 = vpop.permute.xlu2 %2562 }
 0x301   :  { %v2564_v34 = vsel %vm2550_vm4, %v2561_v56, %v2563_v46  ;;  %v2641_v46 = vperm.slane %v2625_v24, 0 }
 0x30d   :  { %v2572_v19 = vpop.permute.xlu1 %2571 }
 0x30e   :  { %v2570_v58 = vpop.permute.xlu0 %2569 }
 0x30f   :  { %v2573_v32 = vsel %vm2550_vm4, %v2570_v58, %v2572_v19  ;;  %v2576_v1 = vsel %vm2554_vm5, %v2561_v56, %v2570_v58  ;;  %v2642_v19 = vperm.slane %v2625_v24, 1  ;;  %vm2741_vm5 = vcmask 908288  }
 0x310   :  { %v2577_v53 = vsel %vm2555_vm6, %v2564_v34, %v2573_v32  ;;  %2593 = vrot.lane.b32.xlu1 %v2576_v1, %s5729_s0  ;;  %v2580_v27 = vsub.f32 3.1415927, %v2576_v1  ;;  %v5606_v1 = vld [vmem:[%s9034_s6 + $0x1] ss:$2 sm:$0x3]  ;;  %vm2745_vm6 = vcmask 121856  }
 0x311   :  { %v2581_v47 = vsub.f32 3.1415927, %v2577_v53 }
 0x312   :  { %2584 = vrot.lane.b32.xlu2 %v2580_v27, %s5729_s0 }
 0x313   :  { %2586 = vrot.lane.b32.xlu0 %v2581_v47, %s5729_s0 }
 0x318   :  { %2721 = vperm.xlu1 %5649, %v7480_v2  }
 0x31a   :  { %2595 = vrot.lane.b32.xlu2 %v2577_v53, %s5729_s0 }
 0x31b   :  { %2668 = vperm.xlu0 %5651, %v7480_v2  }
 0x320   :  { %5652 = vset.pattern.permute.xlu1 %v5734_v36 }
 0x321   :  { %2693 = vperm.xlu1 %5652, %v7480_v2  }
 0x322   :  { %2650 = vperm.xlu2 %5650, %v7480_v2  }
 0x323   :  { %5654 = vset.pattern.permute.xlu0 %v5736_v59 }
 0x329   :  { %5655 = vset.pattern.permute.xlu1 %v5735_v9 }
 0x32a   :  { %5653 = vset.pattern.permute.xlu2 %v5733_v37  ;;  %v7549_v37 = vperm.slane %v5606_v1, 1 }
 0x32b   :  { %2713 = vperm.xlu2 %5653, %v7480_v2  }
 0x333   :  { %5657 = vset.pattern.permute.xlu2 %v5746_v42 }
 0x36c   :  { %v2585_v48 = vpop.permute.xlu2 %2584 }
 0x374   :  { %v2596_v28 = vpop.permute.xlu2 %2595 }
 0x37c   :  { %v7501_v23 = vpop.permute.xlu2 %2650 }
 0x382   :  { %v2594_v62 = vpop.permute.xlu1 %2593 }
 0x383   :  { %v2597_v15 = vsel %vm2405_vm0, %v2594_v62, %v2596_v28  ;;  %v2686_v62 = vperm.slane %v5606_v1, 0  ;;  %v3473_v1 = vld [vmem:[#allocation4 + $0xa0] sm:$0xff] }
 0x385   :  { %v2587_v0 = vpop.permute.xlu0 %2586  ;;  %v7505_v57 = vpop.permute.xlu2 %2713 }
 0x386   :  { %v2588_v10 = vsel %vm2405_vm0, %v2585_v48, %v2587_v0  ;;  %v2601_v13 = vsel %vm2579_vm7, %v2587_v0, %v2596_v28 }
 0x387   :  { %2618 = vrot.lane.b32.xlu0 %v2601_v13, %s5728_s22  ;;  %v2600_v43 = vsel %vm2578_vm8, %v2588_v10, %v2597_v15  ;;  %v2604_v6 = vsub.f32 0.0, %v2601_v13  ;;  %vm2802_vm8 = vcmask 48128  }
 0x388   :  { %2616 = vrot.lane.b32.xlu2 %v2600_v43, %s5728_s22  ;;  %v2603_v29 = vsub.f32 0.0, %v2600_v43 }
 0x389   :  { %2609 = vrot.lane.b32.xlu1 %v2604_v6, %s5728_s22 }
 0x38a   :  { %v2722_v14 = vpop.permute.xlu1 %2721 }
 0x38d   :  { %v7503_v21 = vpop.permute.xlu0 %2668 }
 0x38f   :  { %2607 = vrot.lane.b32.xlu0 %v2603_v29, %s5728_s22 }
 0x391   :  { %2769 = vperm.xlu1 %5655, %v7480_v2  }
 0x393   :  { %v7509_v61 = vpop.permute.xlu1 %2693 }
 0x397   :  { %2750 = vperm.xlu0 %5654, %v7480_v2  }
 0x399   :  { %5656 = vset.pattern.permute.xlu1 %v5743_v25 }
 0x39f   :  { %5658 = vset.pattern.permute.xlu0 %v9126_v7 }
 0x3e2   :  { %v2617_v20 = vpop.permute.xlu2 %2616 }
 0x3f9   :  { %v2619_v49 = vpop.permute.xlu0 %2618 }
 0x3fa   :  { %v2620_v45 = vsel %vm2550_vm4, %v2617_v20, %v2619_v49 }
 0x3fb   :  { %v2610_v16 = vpop.permute.xlu1 %2609 }
 0x401   :  { %v2608_v12 = vpop.permute.xlu0 %2607 }
 0x402   :  { %v2623_v63 = vsel %vm2579_vm7, %v2608_v12, %v2617_v20  ;;  %v2611_v17 = vsel %vm2550_vm4, %v2608_v12, %v2610_v16  ;;  %vm2798_vm7 = vcmask 834560  }
 0x403   :  { %2675 = vrot.lane.b32.xlu0 %v2623_v63, %s5737_s4  ;;  %2657 = vrot.lane.b32.xlu1 %v2623_v63, %s5738_s10  ;;  %v2624_v33 = vsel %vm2602_vm9, %v2611_v17, %v2620_v45  ;;  %v2724_v52 = vmul.f32 %v2722_v14, %v2623_v63  ;;  %v7535_v44 = vpop.permute.xlu1 %2769  ;;  %vm2780_vm9 = vcmask 842752  }
 0x404   :  { %2630 = vrot.lane.b32.xlu2 %v2623_v63, %s5739_s11  ;;  %v2725_v55 = vmul.f32 %v2722_v14, %v2624_v33 }
 0x409   :  { %v7537_v51 = vpop.permute.xlu0 %2750 }
 0x40b   :  { %2737 = vrot.lane.b32.xlu0 %v2623_v63, %s5740_s12  ;;  %2700 = vrot.lane.b32.xlu1 %v2623_v63, %s5741_s13 }
 0x40c   :  { %2776 = vrot.lane.b32.xlu2 %v2623_v63, %s5742_s14 }
 0x413   :  { %2757 = vrot.lane.b32.xlu1 %v2623_v63, %s5744_s15  ;;  %2632 = vrot.lane.b32.xlu0 %v2624_v33, %s5739_s11 }
 0x414   :  { %2794 = vrot.lane.b32.xlu2 %v2623_v63, %s5745_s16 }
 0x41b   :  { %2677 = vrot.lane.b32.xlu1 %v2624_v33, %s5737_s4  ;;  %2730 = vrot.lane.b32.xlu0 %v2725_v55, %s5729_s0 }
 0x41c   :  { %2659 = vrot.lane.b32.xlu2 %v2624_v33, %s5738_s10 }
 0x423   :  { %2739 = vrot.lane.b32.xlu1 %v2624_v33, %s5740_s12  ;;  %2796 = vrot.lane.b32.xlu0 %v2624_v33, %s5745_s16 }
 0x424   :  { %2702 = vrot.lane.b32.xlu2 %v2624_v33, %s5741_s13 }
 0x42b   :  { %2778 = vrot.lane.b32.xlu1 %v2624_v33, %s5742_s14  ;;  %2817 = vperm.xlu0 %5658, %v2814_v26  }
 0x42c   :  { %2759 = vrot.lane.b32.xlu2 %v2624_v33, %s5744_s15 }
 0x433   :  { %2787 = vperm.xlu1 %5656, %v7480_v2   ;;  %5268 = vperm.xlu0 %5658, %v5265_v22  }
 0x434   :  { %2728 = vrot.lane.b32.xlu2 %v2724_v52, %s5729_s0 }
 0x43b   :  { %2401 = vrot.lane.b32.xlu1 %v7525_v4, %s5729_s0 }
 0x43c   :  { %2807 = vperm.xlu2 %5657, %v7480_v2  }
 0x444   :  { %2403 = vrot.lane.b32.xlu2 %v2398_v3, %s5729_s0 }
 0x45e   :  { %v2631_v18 = vpop.permute.xlu2 %2630 }
 0x466   :  { %v7533_v39 = vpop.permute.xlu2 %2776 }
 0x46e   :  { %v7539_v30 = vpop.permute.xlu2 %2794 }
 0x475   :  { %v2676_v35 = vpop.permute.xlu0 %2675  ;;  %v2658_v31 = vpop.permute.xlu1 %2657 }
 0x476   :  { %v2660_v38 = vpop.permute.xlu2 %2659 }
 0x477   :  { %v2662_v56 = vsel %vm2661_vm10, %v2658_v31, %v2660_v38  ;;  %v2672_v10 = vmul.f32 %v7503_v21, %v2660_v38  ;;  %vm2784_vm10 = vcmask 56320  }
 0x478   :  { %v2666_v34 = vsel %vm2665_vm12, 0.0, %v2662_v56  ;;  %v3483_v56 = vld [vmem:[#allocation4 + $0xf0] sm:$0xff] }
 0x479   :  { %v2671_v2 = vmul.f32 %v7503_v21, %v2666_v34  ;;  %v7567_v34 = vand.u32 4294901760, %v3483_v56 }
 0x47b   :  { %3529 = vmatpush.msrb.mxu0 %v7567_v34  ;;  %3725 = vmatpush.msrb.mxu3 %v7567_v34 }
 0x47d   :  { %v2738_v11 = vpop.permute.xlu0 %2737  ;;  %v2701_v40 = vpop.permute.xlu1 %2700 }
 0x47e   :  { %v2703_v54 = vpop.permute.xlu2 %2702 }
 0x47f   :  { %v2705_v41 = vsel %vm2704_vm14, %v2701_v40, %v2703_v54  ;;  %v2711_v6 = vmul.f32 %v2703_v54, %v2642_v19 }
 0x480   :  { %v2709_v28 = vsel %vm2708_vm15, 0.0, %v2705_v41 }
 0x481   :  { %v2710_v9 = vmul.f32 %v2709_v28, %v2641_v46  ;;  %v2717_v25 = vmul.f32 %v7505_v57, %v2711_v6  ;;  %v3471_v28 = vld [vmem:[#allocation4 + $0x90] sm:$0xff] }
 0x483   :  { %v2716_v21 = vmul.f32 %v7505_v57, %v2710_v9 }
 0x485   :  { %v2758_v5 = vpop.permute.xlu1 %2757  ;;  %v2633_v60 = vpop.permute.xlu0 %2632 }
 0x486   :  { %v2635_v58 = vsel %vm2634_vm11, %v2631_v18, %v2633_v60  ;;  %v2646_v27 = vmul.f32 %v2642_v19, %v2633_v60  ;;  %v2760_v47 = vpop.permute.xlu2 %2759  ;;  %v3479_v60 = vld [vmem:[#allocation4 + $0xd0] sm:$0xff] }
 0x487   :  { %v2639_v32 = vsel %vm2638_vm13, 0.0, %v2635_v58  ;;  %v2762_v14 = vsel %vm2761_vm3, %v2758_v5, %v2760_v47  ;;  %v2765_v17 = vsel %vm2683_vm2, %v2760_v47, 0.0  ;;  %v3481_v5 = vld [vmem:[#allocation4 + $0xe0] sm:$0xff] }
 0x488   :  { %v2645_v53 = vmul.f32 %v2641_v46, %v2639_v32  ;;  %v2654_v36 = vmul.f32 %v7501_v23, %v2646_v27  ;;  %v2766_v45 = vmul.f32 %v2762_v14, %v2641_v46  ;;  %v2767_v31 = vmul.f32 %v2765_v17, %v2642_v19  ;;  %v3477_v19 = vld [vmem:[#allocation4 + $0xc0] sm:$0xff]  ;;  %v3475_v32 = vld [vmem:[#allocation4 + $0xb0] sm:$0xff] }
 0x489   :  { %v7573_v27 = vand.u32 4294901760, %v3477_v19  ;;  %v7575_v47 = vand.u32 4294901760, %v3475_v32 }
 0x48a   :  { %v2653_v8 = vmul.f32 %v7501_v23, %v2645_v53  ;;  %v2674_v59 = vadd.f32 %v2672_v10, %v2654_v36  ;;  %v2772_v40 = vmul.f32 %v7535_v44, %v2766_v45  ;;  %v7571_v53 = vand.u32 4294901760, %v3479_v60  ;;  %v3467_v45 = vld [vmem:[#allocation4 + $0x70] sm:$0xff] }
 0x48c   :  { %v2673_v48 = vadd.f32 %v2671_v2, %v2653_v8  ;;  %v7577_v2 = vand.u32 4294901760, %v3473_v1  ;;  %v7593_v10 = vsub.f32 %v3479_v60, %v7571_v53 }
 0x48d   :  { %v2678_v0 = vpop.permute.xlu1 %2677  ;;  %v2731_v15 = vpop.permute.xlu0 %2730 }
 0x48e   :  { %v2680_v13 = vsel %vm2679_vm1, %v2676_v35, %v2678_v0  ;;  %v2691_v43 = vmul.f32 %v7549_v37, %v2678_v0  ;;  %v2729_v63 = vpop.permute.xlu2 %2728  ;;  %v2773_v0 = vmul.f32 %v7535_v44, %v2767_v31  ;;  %v3583_v44 = vand.u32 4294901760, %v7593_v10 }
 0x48f   :  { %v2684_v29 = vsel %vm2683_vm2, 0.0, %v2680_v13  ;;  %v2732_v52 = vsel %vm2405_vm0, %v2729_v63, %v2731_v15 }
 0x490   :  { %v2690_v49 = vmul.f32 %v2686_v62, %v2684_v29  ;;  %v2697_v23 = vmul.f32 %v7509_v61, %v2691_v43  ;;  %v7602_v29 = vsub.f32 %v3475_v32, %v7575_v47  ;;  %v3459_v32 = vld [vmem:[#allocation4 + $0x30] sm:$0xff] }
 0x492   :  { %v2696_v20 = vmul.f32 %v7509_v61, %v2690_v49  ;;  %v2699_v12 = vadd.f32 %v2697_v23, %v2674_v59  ;;  %v7609_v59 = vsub.f32 %v3473_v1, %v7577_v2  ;;  %v7611_v49 = vand.u32 4294901760, %v3471_v28  ;;  %v3469_v23 = vld [vmem:[#allocation4 + $0x80] sm:$0xff] }
 0x493   :  { %v3595_v63 = vand.u32 4294901760, %v7602_v29 }
 0x494   :  { %v2698_v16 = vadd.f32 %v2696_v20, %v2673_v48  ;;  %v2719_v26 = vadd.f32 %v2717_v25, %v2699_v12  ;;  %v7583_v48 = vsub.f32 %v3483_v56, %v7567_v34  ;;  %v7631_v17 = vsub.f32 %v3471_v28, %v7611_v49 }
 0x495   :  { %v2740_v33 = vpop.permute.xlu1 %2739  ;;  %v2797_v42 = vpop.permute.xlu0 %2796 }
 0x496   :  { %v2718_v55 = vadd.f32 %v2716_v21, %v2698_v16  ;;  %v2742_v22 = vsel %vm2741_vm5, %v2738_v11, %v2740_v33  ;;  %v2746_v61 = vsel %vm2745_vm6, %v2740_v33, 0.0  ;;  %v2799_v35 = vsel %vm2798_vm7, %v7539_v30, %v2797_v42  ;;  %v2808_v41 = vpop.permute.xlu2 %2807  ;;  %3672 = vmatpush.msrb.mxu2 %v7583_v48  ;;  %v3465_v33 = vld [vmem:[#allocation4 + $0x60] sm:$0xff] }
 0x497   :  { %v2747_v3 = vmul.f32 %v2742_v22, %v2686_v62  ;;  %v2748_v18 = vmul.f32 %v2746_v61, %v7549_v37  ;;  %v2736_v54 = vadd.f32 %v2731_v15, %v2719_v26  ;;  %v2803_v24 = vsel %vm2802_vm8, %v2797_v42, 0.0 }
 0x498   :  { %v2735_v57 = vadd.f32 %v2732_v52, %v2718_v55  ;;  %v2804_v11 = vmul.f32 %v2799_v35, %v2686_v62  ;;  %v7569_v30 = vand.u32 4294901760, %v3481_v5  ;;  %v2805_v8 = vmul.f32 %v2803_v24, %v7549_v37  ;;  %v3463_v35 = vld [vmem:[#allocation4 + $0x50] sm:$0xff] }
 0x499   :  { %v2753_v38 = vmul.f32 %v7537_v51, %v2747_v3  ;;  %v2754_v46 = vmul.f32 %v7537_v51, %v2748_v18  ;;  %v7596_v37 = vsub.f32 %v3477_v19, %v7573_v27  ;;  %v3571_v43 = vand.u32 4294901760, %v7583_v48 }
 0x49a   :  { %v7586_v62 = vsub.f32 %v3481_v5, %v7569_v30  ;;  %v7590_v15 = vmul.f32 %v2808_v41, %v2804_v11  ;;  %3531 = vmatpush.msrb.mxu0 %v7569_v30  ;;  %3727 = vmatpush.msrb.mxu3 %v7569_v30  ;;  %v2811_v14 = vmul.f32 %v2808_v41, %v2805_v8  ;;  %v3601_v16 = vand.u32 4294901760, %v7609_v59 }
 0x49b   :  { %v2755_v58 = vadd.f32 %v2753_v38, %v2735_v57  ;;  %v2756_v13 = vadd.f32 %v2754_v46, %v2736_v54  ;;  %v3589_v9 = vand.u32 4294901760, %v7596_v37  ;;  %v3572_v20 = vsub.f32 %v7583_v48, %v3571_v43  ;;  %v3461_v54 = vld [vmem:[#allocation4 + $0x40] sm:$0xff] }
 0x49c   :  { %v3577_v6 = vand.u32 4294901760, %v7586_v62  ;;  %3533 = vmatpush.msrb.mxu0 %v7571_v53  ;;  %3675 = vmatpush.msrb.mxu2 %v7586_v62  ;;  %v3584_v21 = vsub.f32 %v7593_v10, %v3583_v44  ;;  %v7635_v22 = vand.u32 4294901760, %v3469_v23  ;;  %v3596_v3 = vsub.f32 %v7602_v29, %v3595_v63 }
 0x49d   :  { %v2779_v51 = vpop.permute.xlu1 %2778  ;;  %v7580_v36 = vadd.f32 %v2772_v40, %v2755_v58  ;;  %v3590_v25 = vsub.f32 %v7596_v37, %v3589_v9  ;;  %3729 = vmatpush.msrb.mxu3 %v7571_v53  ;;  %v2775_v42 = vadd.f32 %v2773_v0, %v2756_v13  ;;  %v3573_v55 = vand.u32 4294901760, %v3572_v20 }
 0x49e   :  { %v3578_v12 = vsub.f32 %v7586_v62, %v3577_v6  ;;  %3535 = vmatpush.msrb.mxu0 %v7573_v27  ;;  %3678 = vmatpush.msrb.mxu2 %v7593_v10  ;;  %v2781_v61 = vsel %vm2780_vm9, %v7533_v39, %v2779_v51  ;;  %v2785_v52 = vsel %vm2784_vm10, %v2779_v51, 0.0  ;;  %v3607_v18 = vand.u32 4294901760, %v7631_v17 }
 0x49f   :  { %3731 = vmatpush.msrb.mxu3 %v7573_v27  ;;  %3574 = vmatpush.msrb.mxu1 %v3573_v55  ;;  %v3585_v31 = vand.u32 4294901760, %v3584_v21  ;;  %v7647_v38 = vsub.f32 %v3469_v23, %v7635_v22  ;;  %v7650_v39 = vand.u32 4294901760, %v3467_v45  ;;  %v7652_v40 = vand.u32 4294901760, %v3465_v33  ;;  %v2818_v21 = vpop.permute.xlu0 %2817 }
 0x4a0   :  { %v3579_v26 = vand.u32 4294901760, %v3578_v12  ;;  %3537 = vmatpush.msrb.mxu0 %v7575_v47  ;;  %v3591_v56 = vand.u32 4294901760, %v3590_v25  ;;  %v3602_v5 = vsub.f32 %v7609_v59, %v3601_v16  ;;  %3681 = vmatpush.msrb.mxu2 %v7596_v37  ;;  %v7667_v19 = vand.u32 4294901760, %v3463_v35  ;;  %v3457_v12 = vld [vmem:[#allocation4 + $0x20] sm:$0xff] }
 0x4a1   :  { %3733 = vmatpush.msrb.mxu3 %v7575_v47  ;;  %v9134_v60 = vand.u32 4294901760, %v7647_v38  ;;  %v7661_v46 = vsub.f32 %v3467_v45, %v7650_v39  ;;  %v7665_v58 = vsub.f32 %v3465_v33, %v7652_v40  ;;  %v3608_v8 = vsub.f32 %v7631_v17, %v3607_v18 }
 0x4a2   :  { %3580 = vmatpush.msrb.mxu1 %v3579_v26  ;;  %3539 = vmatpush.msrb.mxu0 %v7577_v2  ;;  %v7673_v51 = vand.u32 4294901760, %v3461_v54  ;;  %v3597_v28 = vand.u32 4294901760, %v3596_v3  ;;  %v7680_v13 = vsub.f32 %v3463_v35, %v7667_v19  ;;  %v7683_v20 = vand.u32 4294901760, %v3459_v32  ;;  %v3455_v35 = vld [vmem:[#allocation4 + $0x10] sm:$0xff] }
 0x4a3   :  { %3684 = vmatpush.msrb.mxu2 %v7602_v29  ;;  %3735 = vmatpush.msrb.mxu3 %v7577_v2  ;;  %v9128_v0 = vand.u32 4294901760, %v7661_v46  ;;  %v3603_v25 = vand.u32 4294901760, %v3602_v5  ;;  %v3614_v45 = vsub.f32 %v7647_v38, %v9134_v60  ;;  %v9125_v33 = vand.u32 4294901760, %v7665_v58 }
 0x4a4   :  { %3586 = vmatpush.msrb.mxu1 %v3585_v31  ;;  %3541 = vmatpush.msrb.mxu0 %v7611_v49  ;;  %v7709_v3 = vand.u32 4294901760, %v3457_v12  ;;  %v3453_v31 = vld [vmem:[#allocation4] sm:$0xff]  ;;  %v5751_v62 = vmov 920167782  }
 0x4a5   :  { %v2788_v57 = vpop.permute.xlu1 %2787  ;;  %3687 = vmatpush.msrb.mxu2 %v7609_v59  ;;  %3737 = vmatpush.msrb.mxu3 %v7611_v49  ;;  %v3620_v55 = vsub.f32 %v7661_v46, %v9128_v0 }
 0x4a6   :  { %v2790_v24 = vmul.f32 %v2788_v57, %v2781_v61  ;;  %v2791_v11 = vmul.f32 %v2788_v57, %v2785_v52  ;;  %3592 = vmatpush.msrb.mxu1 %v3591_v56  ;;  %3543 = vmatpush.msrb.mxu0 %v7635_v22  ;;  %v9124_v61 = vand.u32 4294901760, %v7680_v13  ;;  %v7707_v52 = vsub.f32 %v3459_v32, %v7683_v20 }
 0x4a7   :  { %3690 = vmatpush.msrb.mxu2 %v7631_v17  ;;  %3739 = vmatpush.msrb.mxu3 %v7635_v22  ;;  %v7720_v56 = vsub.f32 %v3457_v12, %v7709_v3  ;;  %v3621_v32 = vand.u32 4294901760, %v3620_v55 }
 0x4a8   :  { %v2792_v1 = vadd.f32 %v2790_v24, %v7580_v36  ;;  %v2793_v41 = vadd.f32 %v2791_v11, %v2775_v42  ;;  %v3609_v42 = vand.u32 4294901760, %v3608_v8  ;;  %3598 = vmatpush.msrb.mxu1 %v3597_v28  ;;  %3545 = vmatpush.msrb.mxu0 %v7650_v39  ;;  %v3626_v24 = vsub.f32 %v7665_v58, %v9125_v33 }
 0x4a9   :  { %3693 = vmatpush.msrb.mxu2 %v7647_v38  ;;  %3741 = vmatpush.msrb.mxu3 %v7650_v39  ;;  %v3632_v8 = vsub.f32 %v7680_v13, %v9124_v61  ;;  %v9119_v28 = vand.u32 4294901760, %v7707_v52  ;;  %v9120_v12 = vand.u32 4294901760, %v7720_v56  ;;  %v9336_v61 = vld [vmem:[#allocation20_spill] sm:$0xff] }
 0x4aa   :  { %v2812_v36 = vadd.f32 %v7590_v15, %v2792_v1  ;;  %v2813_v23 = vadd.f32 %v2811_v14, %v2793_v41  ;;  %v7693_v15 = vsub.f32 %v3461_v54, %v7673_v51  ;;  %3604 = vmatpush.msrb.mxu1 %v3603_v25  ;;  %v3615_v54 = vand.u32 4294901760, %v3614_v45  ;;  %3547 = vmatpush.msrb.mxu0 %v7652_v40 }
 0x4ab   :  { %v7722_v1 = vand.u32 4294901760, %v3455_v35  ;;  %3696 = vmatpush.msrb.mxu2 %v7661_v46  ;;  %3743 = vmatpush.msrb.mxu3 %v7652_v40  ;;  %v3627_v25 = vand.u32 4294901760, %v3626_v24  ;;  %v3644_v24 = vsub.f32 %v7707_v52, %v9119_v28 }
 0x4ac   :  { %v7695_v14 = vadd.f32 %v2818_v21, %v2813_v23  ;;  %v7702_v26 = vadd.f32 %v2818_v21, %v2812_v36  ;;  %v9122_v11 = vand.u32 4294901760, %v7693_v15  ;;  %3610 = vmatpush.msrb.mxu1 %v3609_v42  ;;  %3549 = vmatpush.msrb.mxu0 %v7667_v19  ;;  %v7732_v36 = vand.u32 4294901760, %v3453_v31 }
 0x4ad   :  { %v7736_v21 = vsub.f32 %v3455_v35, %v7722_v1  ;;  %3699 = vmatpush.msrb.mxu2 %v7665_v58  ;;  %3745 = vmatpush.msrb.mxu3 %v7667_v19 }
 0x4ae   :  { %v2979_v57 = vand.u32 2139095040, %v7695_v14  ;;  %v2825_v41 = vand.u32 2139095040, %v7702_v26  ;;  %3616 = vmatpush.msrb.mxu1 %v3615_v54  ;;  %v3638_v45 = vsub.f32 %v7693_v15, %v9122_v11  ;;  %3551 = vmatpush.msrb.mxu0 %v7673_v51  ;;  %v7745_v42 = vsub.f32 %v3453_v31, %v7732_v36 }
 0x4af   :  { %3702 = vmatpush.msrb.mxu2 %v7680_v13  ;;  %3747 = vmatpush.msrb.mxu3 %v7673_v51  ;;  %v3633_v54 = vand.u32 4294901760, %v3632_v8  ;;  %v3650_v31 = vsub.f32 %v7720_v56, %v9120_v12 }
 0x4b0   :  { %v2980_v5 = vshrl.u32 %v2979_v57, 23  ;;  %v9121_v57 = vand.u32 4294901760, %v7736_v21  ;;  %v2826_v35 = vshrl.u32 %v2825_v41, 23  ;;  %3622 = vmatpush.msrb.mxu1 %v3621_v32  ;;  %3553 = vmatpush.msrb.mxu0 %v7683_v20  ;;  %v3639_v41 = vand.u32 4294901760, %v3638_v45 }
 0x4b1   :  { %3705 = vmatpush.msrb.mxu2 %v7693_v15  ;;  %3749 = vmatpush.msrb.mxu3 %v7683_v20  ;;  %v3651_v45 = vand.u32 4294901760, %v3650_v31 }
 0x4b2   :  { %v5610_v23 = vadd.s32 4294967169, %v2980_v5  ;;  %v9123_v5 = vand.u32 4294901760, %v7745_v42  ;;  %3628 = vmatpush.msrb.mxu1 %v3627_v25  ;;  %3555 = vmatpush.msrb.mxu0 %v7709_v3  ;;  %v5607_v12 = vadd.s32 4294967169, %v2826_v35 }
 0x4b3   :  { %3708 = vmatpush.msrb.mxu2 %v7707_v52  ;;  %3751 = vmatpush.msrb.mxu3 %v7709_v3 }
 0x4b4   :  { %v2986_v55 = vadd.s32 1, %v5610_v23  ;;  %v3656_v23 = vsub.f32 %v7736_v21, %v9121_v57  ;;  %v3662_v28 = vsub.f32 %v7745_v42, %v9123_v5  ;;  %3634 = vmatpush.msrb.mxu1 %v3633_v54  ;;  %v3645_v57 = vand.u32 4294901760, %v3644_v24  ;;  %3557 = vmatpush.msrb.mxu0 %v7722_v1 }
 0x4b5   :  { %3711 = vmatpush.msrb.mxu2 %v7720_v56  ;;  %3753 = vmatpush.msrb.mxu3 %v7722_v1  ;;  %v9129_v5 = vand.u32 2147483647, %v7695_v14  ;;  %v9137_v54 = vmov 683565275  }
 0x4b6   :  { %vm2987_vm11 = vcmp.gt.s32.totalorder %v2986_v55, 0  ;;  %3640 = vmatpush.msrb.mxu1 %v3639_v41  ;;  %3559 = vmatpush.msrb.mxu0 %v7732_v36  ;;  %v3663_v35 = vand.u32 4294901760, %v3662_v28  ;;  %v9132_v28 = vmov 2131351028  }
 0x4b7   :  { %v2988_v32 = vsel %vm2987_vm11, %v2986_v55, 0  ;;  %v3657_v55 = vand.u32 4294901760, %v3656_v23  ;;  %3714 = vmatpush.msrb.mxu2 %v7736_v21  ;;  %v9335_v23 = vld [vmem:[#allocation21_spill] sm:$0xff]  ;;  %v2983_v33 = vand.u32 8388607, %v9129_v5  ;;  %3755 = vmatpush.msrb.mxu3 %v7732_v36 }
 0x4b8   :  { %v2990_v8 = vand.u32 31, %v2988_v32  ;;  %v7770_v11 = vshrl.u32 %v2988_v32, 5  ;;  %3766 = vmatpush.msra.mxu0 %v3571_v43  ;;  %v9130_v32 = vmov 2475754826   ;;  %v312_v41 = vadd.f32 %v9336_v61, %v9335_v23  ;;  %3646 = vmatpush.msrb.mxu1 %v3645_v57 }
 0x4b9   :  { %v2984_v61 = vor.u32 8388608, %v2983_v33  ;;  %v9135_v57 = vmov 2102212464   ;;  %3717 = vmatpush.msrb.mxu2 %v7745_v42  ;;  %v5752_v33 = vmov 1326507024  }
 0x4ba   :  { %v7772_v25 = vsub.s32 32, %v2990_v8  ;;  %v2993_v24 = vshll.u32 %v9137_v54, %v2990_v8  ;;  %3770 = vmatpush.msra.mxu0 %v3577_v6  ;;  %v2996_v43 = vshll.u32 %v9130_v32, %v2990_v8  ;;  %v2999_v0 = vshll.u32 %v9132_v28, %v2990_v8  ;;  %3652 = vmatpush.msrb.mxu1 %v3651_v45 }
 0x4bb   :  { %v3002_v5 = vshll.u32 %v9135_v57, %v2990_v8  ;;  %v3005_v45 = vshll.u32 %v5751_v62, %v2990_v8  ;;  %vm3008_vm12 = vcmp.lt.s32.totalorder %v7770_v11, 1  ;;  %vm3011_vm13 = vcmp.lt.s32.totalorder %v7770_v11, 4 }
 0x4bc   :  { %v2994_v31 = vshrl.u32 %v9130_v32, %v7772_v25  ;;  %v2997_v7 = vshrl.u32 %v9132_v28, %v7772_v25  ;;  %v3000_v23 = vshrl.u32 %v9135_v57, %v7772_v25  ;;  %v3003_v6 = vshrl.u32 %v5751_v62, %v7772_v25  ;;  %3774 = vmatpush.msra.mxu0 %v3583_v44  ;;  %v9337_v28 = vld [vmem:[#allocation22_spill] sm:$0xff] }
 0x4bd   :  { %v3006_v32 = vshrl.u32 %v5752_v33, %v7772_v25  ;;  %v370_v60 = vadd.f32 %v9337_v28, %v312_v41  ;;  %3658 = vmatpush.msrb.mxu1 %v3657_v55  ;;  %vm3010_vm14 = vcmp.lt.s32.totalorder %v7770_v11, 3  ;;  %vm3009_vm1 = vcmp.lt.s32.totalorder %v7770_v11, 2 }
 0x4be   :  { %v7791_v48 = vor.u32 %v2994_v31, %v2993_v24  ;;  %v2832_v24 = vadd.s32 1, %v5607_v12  ;;  %v2998_v31 = vor.u32 %v2997_v7, %v2996_v43  ;;  %v3001_v57 = vor.u32 %v3000_v23, %v2999_v0  ;;  %3778 = vmatpush.msra.mxu0 %v3589_v9  ;;  %v9340_v23 = vld [vmem:[#allocation27_spill] sm:$0xff] }
 0x4bf   :  { %v3004_v54 = vor.u32 %v3003_v6, %v3002_v5  ;;  %v3007_v12 = vor.u32 %v3006_v32, %v3005_v45  ;;  %3664 = vmatpush.msrb.mxu1 %v3663_v35  ;;  %v7821_v0 = vshll.u32 %v2984_v61, 8  ;;  %v9338_v5 = vld [vmem:[#allocation23_spill] sm:$0xff] }
 0x4c0   :  { %v3016_v7 = vsel %vm3008_vm12, %v7791_v48, %v2998_v31  ;;  %v3020_v44 = vsel %vm3008_vm12, %v2998_v31, %v3001_v57  ;;  %vm2833_vm15 = vcmp.gt.s32.totalorder %v2832_v24, 0  ;;  %3782 = vmatpush.msra.mxu0 %v3595_v63  ;;  %v414_v8 = vadd.f32 %v9338_v5, %v370_v60 }
 0x4c1   :  { %v3017_v10 = vsel %vm3011_vm13, %v3004_v54, 920167782  ;;  %3833 = vmatpush.msra.mxu1 %v7567_v34  ;;  %v3021_v9 = vsel %vm3011_vm13, %v3007_v12, 1326507024  ;;  %v3025_v34 = vand.u32 65535, %v7821_v0  ;;  %v3026_v63 = vshrl.u32 %v7821_v0, 16 }
 0x4c2   :  { %v3018_v37 = vsel %vm3010_vm14, %v3001_v57, %v3017_v10  ;;  %v3022_v35 = vsel %vm3010_vm14, %v3004_v54, %v3021_v9  ;;  %3786 = vmatpush.msra.mxu0 %v3601_v16  ;;  %v2834_v41 = vsel %vm2833_vm15, %v2832_v24, 0  ;;  %v3013_v16 = vsel %vm3011_vm13, %v3001_v57, 2102212464 }
 0x4c3   :  { %v3019_v55 = vsel %vm3009_vm1, %v3016_v7, %v3018_v37  ;;  %3835 = vmatpush.msra.mxu1 %v7569_v30  ;;  %v3023_v29 = vsel %vm3009_vm1, %v3020_v44, %v3022_v35  ;;  %v9339_v30 = vmov 683565275   ;;  %v489_v6 = vadd.f32 %v9340_v23, %v414_v8 }
 0x4c4   :  { %v3049_v32 = vand.u32 65535, %v3019_v55  ;;  %v3050_v60 = vshrl.u32 %v3019_v55, 16  ;;  %v3027_v43 = vand.u32 65535, %v3023_v29  ;;  %v3028_v28 = vshrl.u32 %v3023_v29, 16  ;;  %3790 = vmatpush.msra.mxu0 %v3607_v18 }
 0x4c5   :  { %3837 = vmatpush.msra.mxu1 %v7571_v53  ;;  %v2992_v59 = vshrl.u32 %v9339_v30, %v7772_v25  ;;  %v7852_v24 = vand.u32 31, %v2834_v41  ;;  %v9341_v25 = vand.u32 4294901760, %v7647_v38  ;;  %v3014_v57 = vsel %vm3010_vm14, %v2998_v31, %v3013_v16 }
 0x4c6   :  { %v3052_v54 = vmul.u32 %v3050_v60, %v3025_v34  ;;  %v3053_v61 = vmul.u32 %v3049_v32, %v3026_v63  ;;  %v3030_v45 = vmul.u32 %v3028_v28, %v3025_v34  ;;  %v3031_v12 = vmul.u32 %v3027_v43, %v3026_v63 }
 0x4c7   :  { %3839 = vmatpush.msra.mxu1 %v7573_v27  ;;  %v3012_v53 = vsel %vm3008_vm12, %v2992_v59, %v7791_v48  ;;  %v3051_v17 = vmul.u32 %v3049_v32, %v3025_v34  ;;  %3794 = vmatpush.msra.mxu0 %v9341_v25  ;;  %v3029_v7 = vmul.u32 %v3027_v43, %v3025_v34  ;;  %v9342_v5 = vand.u32 4294901760, %v7661_v46 }
 0x4c8   :  { %v3055_v18 = vshll.u32 %v3052_v54, 16  ;;  %v3032_v10 = vmul.u32 %v3028_v28, %v3026_v63  ;;  %v3033_v44 = vshll.u32 %v3030_v45, 16  ;;  %v3054_v37 = vmul.u32 %v3050_v60, %v3026_v63  ;;  %v9346_v28 = vld [vmem:[#allocation28_spill] sm:$0xff] }
 0x4c9   :  { %3841 = vmatpush.msra.mxu1 %v7575_v47  ;;  %v3057_v9 = vshll.u32 %v3053_v61, 16  ;;  %3798 = vmatpush.msra.mxu0 %v9342_v5  ;;  %v3035_v48 = vshll.u32 %v3031_v12, 16  ;;  %v9343_v38 = vmov 0   ;;  %v7867_v35 = vsub.s32 32, %v7852_v24 }
 0x4ca   :  { %vm3059_vm2 = vc.u32 %v3051_v17, %v3055_v18  ;;  %v3061_v27 = vadd.s32 %v3055_v18, %v3051_v17  ;;  %vm3037_vm3 = vc.u32 %v3029_v7, %v3033_v44  ;;  %v3039_v8 = vadd.s32 %v3033_v44, %v3029_v7 }
 0x4cb   :  { %v3060_v55 = vsel %vm3059_vm2, 1, %v9343_v38  ;;  %3843 = vmatpush.msra.mxu1 %v7577_v2  ;;  %v3038_v31 = vsel %vm3037_vm3, 1, %v9343_v38  ;;  %v9344_v34 = vand.u32 4294901760, %v7665_v58  ;;  %v3015_v46 = vsel %vm3009_vm1, %v3012_v53, %v3014_v57 }
 0x4cc   :  { %v3062_v47 = vadd.s32 %v3060_v55, %v3054_v37  ;;  %vm3063_vm5 = vc.u32 %v3061_v27, %v3057_v9  ;;  %v3040_v29 = vadd.s32 %v3038_v31, %v3032_v10  ;;  %vm3041_vm6 = vc.u32 %v3039_v8, %v3035_v48 }
 0x4cd   :  { %3802 = vmatpush.msra.mxu0 %v9344_v34  ;;  %v3064_v63 = vsel %vm3063_vm5, 1, %v9343_v38  ;;  %3845 = vmatpush.msra.mxu1 %v7611_v49  ;;  %v3042_v32 = vsel %vm3041_vm6, 1, %v9343_v38  ;;  %v3056_v60 = vshrl.u32 %v3052_v54, 16  ;;  %v9345_v43 = vand.u32 4294901760, %v7680_v13 }
 0x4ce   :  { %v3066_v2 = vadd.s32 %v3064_v63, %v3062_v47  ;;  %v530_v59 = vadd.f32 %v9346_v28, %v489_v6  ;;  %v3034_v58 = vshrl.u32 %v3030_v45, 16  ;;  %v3044_v16 = vadd.s32 %v3042_v32, %v3040_v29 }
 0x4cf   :  { %3806 = vmatpush.msra.mxu0 %v9345_v43  ;;  %3847 = vmatpush.msra.mxu1 %v7635_v22  ;;  %v3058_v11 = vshrl.u32 %v3053_v61, 16  ;;  %v3069_v53 = vmul.u32 %v7821_v0, %v3015_v46  ;;  %v2822_v17 = vand.u32 2147483647, %v7702_v26  ;;  %v9347_v49 = vand.u32 4294901760, %v7693_v15  ;;  %v9356_v43 = vld [vmem:[#allocation31_spill] sm:$0xff] }
 0x4d0   :  { %v3067_v23 = vadd.s32 %v3066_v2, %v3056_v60  ;;  %v3036_v54 = vshrl.u32 %v3031_v12, 16  ;;  %v3045_v18 = vadd.s32 %v3044_v16, %v3034_v58  ;;  %v7886_v25 = vadd.s32 %v3061_v27, %v3057_v9 }
 0x4d1   :  { %3810 = vmatpush.msra.mxu0 %v9347_v49  ;;  %v9348_v13 = vmov 2131351028   ;;  %v7890_v45 = vshrl.u32 %v2834_v41, 5  ;;  %3849 = vmatpush.msra.mxu1 %v7650_v39  ;;  %v2839_v0 = vshll.u32 %v9339_v30, %v7852_v24  ;;  %v9349_v61 = vmov 2475754826   ;;  %v7970_v49 = vpop.permute.xlu2 %2403 }
 0x4d2   :  { %v2843_v6 = vshrl.u32 %v9348_v13, %v7867_v35  ;;  %v3068_v22 = vadd.s32 %v3067_v23, %v3058_v11  ;;  %v2840_v57 = vshrl.u32 %v9349_v61, %v7867_v35  ;;  %v9350_v15 = vand.u32 4294901760, %v7707_v52 }
 0x4d3   :  { %v7899_v12 = vadd.s32 %v3045_v18, %v3036_v54  ;;  %v2842_v7 = vshll.u32 %v9349_v61, %v7852_v24  ;;  %v2845_v41 = vshll.u32 %v9348_v13, %v7852_v24  ;;  %v9351_v39 = vmov 2102212464   ;;  %3851 = vmatpush.msra.mxu1 %v7652_v40  ;;  %v9357_v18 = vld [vmem:[#allocation33_spill] sm:$0xff] }
 0x4d4   :  { %3814 = vmatpush.msra.mxu0 %v9350_v15  ;;  %v2846_v10 = vshrl.u32 %v9351_v39, %v7867_v35  ;;  %v3072_v44 = vadd.s32 1, %v3068_v22  ;;  %v2829_v37 = vand.u32 8388607, %v2822_v17  ;;  %v2848_v52 = vshll.u32 %v9351_v39, %v7852_v24 }
 0x4d5   :  { %v2849_v9 = vshrl.u32 %v5751_v62, %v7867_v35  ;;  %v9352_v27 = vand.u32 4294901760, %v7720_v56  ;;  %vm3071_vm7 = vc.u32 %v7899_v12, %v7886_v25  ;;  %v7918_v5 = vor.u32 %v2843_v6, %v2842_v7  ;;  %3853 = vmatpush.msra.mxu1 %v7667_v19  ;;  %v9355_v19 = vld [vmem:[#allocation30_spill] sm:$0xff] }
 0x4d6   :  { %v7920_v48 = vor.u32 %v2846_v10, %v2845_v41  ;;  %v2851_v40 = vshll.u32 %v5751_v62, %v7852_v24  ;;  %v3073_v8 = vsel %vm3071_vm7, %v3072_v44, %v3068_v22  ;;  %v2852_v31 = vshrl.u32 %v5752_v33, %v7867_v35  ;;  %v9358_v7 = vld [vmem:[#allocation34_spill] sm:$0xff] }
 0x4d7   :  { %3818 = vmatpush.msra.mxu0 %v9352_v27  ;;  %v2850_v55 = vor.u32 %v2849_v9, %v2848_v52  ;;  %v9353_v56 = vand.u32 4294901760, %v7736_v21  ;;  %v3074_v47 = vadd.s32 %v3073_v8, %v3069_v53  ;;  %v7929_v34 = vor.u32 %v2840_v57, %v2839_v0  ;;  %3855 = vmatpush.msra.mxu1 %v7673_v51 }
 0x4d8   :  { %v2830_v46 = vor.u32 8388608, %v2829_v37  ;;  %v2853_v29 = vor.u32 %v2852_v31, %v2851_v40  ;;  %vm2857_vm8 = vcmp.lt.s32.totalorder %v7890_v45, 4  ;;  %v9354_v62 = vand.u32 4294901760, %v7745_v42 }
 0x4d9   :  { %3822 = vmatpush.msra.mxu0 %v9353_v56  ;;  %v575_v24 = vadd.f32 %v9355_v19, %v530_v59  ;;  %v3075_v63 = vadd.s32 536870912, %v3074_v47  ;;  %vm2854_vm9 = vcmp.lt.s32.totalorder %v7890_v45, 1  ;;  %v2863_v21 = vsel %vm2857_vm8, %v2850_v55, 920167782  ;;  %3857 = vmatpush.msra.mxu1 %v7683_v20 }
 0x4da   :  { %vm2856_vm10 = vcmp.lt.s32.totalorder %v7890_v45, 3  ;;  %v2866_v33 = vsel %vm2854_vm9, %v7918_v5, %v7920_v48  ;;  %v2862_v42 = vsel %vm2854_vm9, %v7929_v34, %v7918_v5  ;;  %v2867_v60 = vsel %vm2857_vm8, %v2853_v29, 1326507024 }
 0x4db   :  { %3826 = vmatpush.msra.mxu0 %v9354_v62  ;;  %v7945_v51 = vshrl.u32 %v3075_v63, 30  ;;  %v2864_v32 = vsel %vm2856_vm10, %v7920_v48, %v2863_v21  ;;  %vm2855_vm11 = vcmp.lt.s32.totalorder %v7890_v45, 2  ;;  %v2868_v2 = vsel %vm2856_vm10, %v2850_v55, %v2867_v60  ;;  %3859 = vmatpush.msra.mxu1 %v7709_v3 }
 0x4dc   :  { %v7959_v20 = vshll.u32 %v2830_v46, 8  ;;  %v684_v28 = vadd.f32 %v9356_v43, %v575_v24  ;;  %v2869_v58 = vsel %vm2855_vm11, %v2866_v33, %v2868_v2  ;;  %v2865_v16 = vsel %vm2855_vm11, %v2862_v42, %v2864_v32 }
 0x4dd   :  { %v3077_v59 = vshll.u32 %v7945_v51, 30  ;;  %v2873_v23 = vand.u32 65535, %v2869_v58  ;;  %v2874_v53 = vshrl.u32 %v2869_v58, 16  ;;  %3861 = vmatpush.msra.mxu1 %v7722_v1  ;;  %v2896_v61 = vshrl.u32 %v2865_v16, 16 }
 0x4de   :  { %v2871_v11 = vand.u32 65535, %v7959_v20  ;;  %v2872_v3 = vshrl.u32 %v7959_v20, 16  ;;  %v742_v13 = vadd.f32 %v9357_v18, %v684_v28  ;;  %v7977_v57 = vadd.f32 %v7970_v49, %v7525_v4 }
 0x4df   :  { %v3078_v54 = vsub.s32 %v3074_v47, %v3077_v59  ;;  %3863 = vmatpush.msra.mxu1 %v7732_v36  ;;  %v2895_v10 = vand.u32 65535, %v2865_v16  ;;  %v3070_v46 = vadd.s32 %v7886_v25, %v7899_v12  ;;  %v2838_v25 = vshrl.u32 %v9339_v30, %v7867_v35 }
 0x4e0   :  { %v2876_v6 = vmul.u32 %v2874_v53, %v2871_v11  ;;  %v2877_v0 = vmul.u32 %v2873_v23, %v2872_v3  ;;  %v2875_v15 = vmul.u32 %v2873_v23, %v2871_v11  ;;  %v786_v41 = vadd.f32 %v9358_v7, %v742_v13 }
 0x4e1   :  { %vm3079_vm12 = vcmp.lt.s32.totalorder %v3078_v54, 0  ;;  %v3080_v22 = vsub.s32 0, %v3078_v54  ;;  %v2878_v37 = vmul.u32 %v2874_v53, %v2872_v3  ;;  %v2898_v27 = vmul.u32 %v2896_v61, %v2871_v11  ;;  %v9359_v53 = vld [vmem:[#allocation35_spill] sm:$0xff] }
 0x4e2   :  { %v2879_v1 = vshll.u32 %v2876_v6, 16  ;;  %v2881_v52 = vshll.u32 %v2877_v0, 16  ;;  %5667 = vrsqrt.f32 %v7977_v57  ;;  %v861_v4 = vadd.f32 %v7155_v50, %v786_v41 }
 0x4e3   :  { %v3081_v39 = vsel %vm3079_vm12, %v3080_v22, %v3078_v54  ;;  %v2899_v55 = vmul.u32 %v2895_v10, %v2872_v3  ;;  %v2897_v56 = vmul.u32 %v2895_v10, %v2871_v11  ;;  %v2901_v47 = vshll.u32 %v2898_v27, 16 }
 0x4e4   :  { %v3082_v44 = vclz %v3081_v39  ;;  %vm2883_vm13 = vc.u32 %v2875_v15, %v2879_v1  ;;  %v2885_v9 = vadd.s32 %v2879_v1, %v2875_v15  ;;  %v2880_v62 = vshrl.u32 %v2876_v6, 16  ;;  %v2402_v6 = vpop.permute.xlu1 %2401 }
 0x4e5   :  { %v2884_v36 = vsel %vm2883_vm13, 1, %v9343_v38  ;;  %v2900_v21 = vmul.u32 %v2896_v61, %v2872_v3  ;;  %vm2905_vm1 = vc.u32 %v2897_v56, %v2901_v47  ;;  %v2903_v50 = vshll.u32 %v2899_v55, 16 }
 0x4e6   :  { %v5611_v40 = vadd.s32 4294967294, %v3082_v44  ;;  %v2886_v8 = vadd.s32 %v2884_v36, %v2878_v37  ;;  %vm2887_vm14 = vc.u32 %v2885_v9, %v2881_v52  ;;  %v2906_v42 = vsel %vm2905_vm1, 1, %v9343_v38 }
 0x4e7   :  { %v2888_v31 = vsel %vm2887_vm14, 1, %v9343_v38  ;;  %v2907_v32 = vadd.s32 %v2901_v47, %v2897_v56  ;;  %v2908_v59 = vadd.s32 %v2906_v42, %v2900_v21  ;;  %v2859_v12 = vsel %vm2857_vm8, %v7920_v48, 2102212464 }
 0x4e8   :  { %vm5612_vm15 = vcmp.lt.s32.totalorder %v5611_v40, 0  ;;  %v2890_v19 = vadd.s32 %v2888_v31, %v2886_v8  ;;  %v5668_v60 = vpop.eup %5667  ;;  %v2882_v11 = vshrl.u32 %v2877_v0, 16  ;;  %v2902_v18 = vshrl.u32 %v2898_v27, 16 }
 0x4e9   :  { %v3085_v29 = vsel %vm5612_vm15, 0, %v5611_v40  ;;  %vm2909_vm2 = vc.u32 %v2907_v32, %v2903_v50  ;;  %v2424_v3 = vmul.f32 %v5668_v60, %v7977_v57  ;;  %v2858_v30 = vsel %vm2854_vm9, %v2838_v25, %v7929_v34 }
 0x4ea   :  { %v3086_v24 = vsub.s32 32, %v3085_v29  ;;  %v3090_v63 = vsub.s32 4294967266, %v3085_v29  ;;  %v3087_v33 = vshll.u32 %v3078_v54, %v3085_v29  ;;  %v2891_v28 = vadd.s32 %v2890_v19, %v2880_v62 }
 0x4eb   :  { %v2910_v23 = vsel %vm2909_vm2, 1, %v9343_v38  ;;  %v902_v54 = vadd.f32 %v9359_v53, %v861_v4  ;;  %v2860_v35 = vsel %vm2856_vm10, %v7918_v5, %v2859_v12  ;;  %v2904_v0 = vshrl.u32 %v2899_v55, 16 }
 0x4ec   :  { %v3088_v2 = vshrl.u32 %v3070_v46, %v3086_v24  ;;  %v3091_v43 = vadd.s32 127, %v3090_v63  ;;  %v2912_v13 = vadd.s32 %v2910_v23, %v2908_v59  ;;  %v8001_v48 = vadd.s32 %v2891_v28, %v2882_v11 }
 0x4ed   :  { %v8003_v1 = vadd.s32 %v2907_v32, %v2903_v50  ;;  %v2406_v7 = vsel %vm2405_vm0, %v2402_v6, %v7970_v49  ;;  %v2425_v41 = vmul.f32 %v5668_v60, %v2424_v3  ;;  %v2861_v39 = vsel %vm2855_vm11, %v2858_v30, %v2860_v35 }
 0x4ee   :  { %v3089_v58 = vor.u32 %v3088_v2, %v3087_v33  ;;  %v3092_v16 = vshll.u32 %v3091_v43, 23  ;;  %v2913_v38 = vadd.s32 %v2912_v13, %v2902_v18  ;;  %v2396_v10 = vmul.f32 %v902_v54, %v902_v54 }
 0x4ef   :  { %vm2917_vm3 = vc.u32 %v8001_v48, %v8003_v1  ;;  %v2915_v36 = vmul.u32 %v7959_v20, %v2861_v39  ;;  %v2426_v9 = vmul.f32 0.5, %v2425_v41  ;;  %vm2978_vm5 = vcmp.lt.s32.totalorder %v7695_v14, 0 }
 0x4f0   :  { %v3093_v22 = vor.u32 4788187, %v3092_v16  ;;  %v3096_v15 = vcvt.s32.f32 %v3089_v58  ;;  %v2914_v34 = vadd.s32 %v2913_v38, %v2904_v0  ;;  %v8011_v37 = vadd.f32 %v2406_v7, %v2396_v10 }
 0x4f1   :  { %v3100_v49 = vsub.s32 4, %v7945_v51  ;;  %v9360_v45 = vand.u32 2147483647, %v7695_v14  ;;  %v2427_v56 = vsub.f32 1.5, %v2426_v9  ;;  %vm2430_vm7 = vcmp.eq.f32.partialorder %v7977_v57, inf }
 0x4f2   :  { %v3094_v61 = vand.u32 2147483647, %v3093_v22  ;;  %v2918_v5 = vadd.s32 1, %v2914_v34  ;;  %5669 = vrsqrt.f32 %v8011_v37  ;;  %vm2432_vm8 = vcmp.eq.f32.partialorder %v7977_v57, 0.0 }
 0x4f3   :  { %vm2977_vm0 = vcmp.le.f32.partialorder %v9360_v45, 0.7853982  ;;  %v3101_v20 = vsel %vm2978_vm5, %v3100_v49, %v7945_v51  ;;  %v2428_v21 = vmul.f32 %v5668_v60, %v2427_v56  ;;  %v2433_v18 = vand.u32 2147483648, %v7977_v57 }
 0x4f4   :  { %v3097_v44 = vmul.f32 %v3096_v15, %v3094_v61  ;;  %v2919_v27 = vsel %vm2917_vm3, %v2918_v5, %v2914_v34  ;;  %v3103_v62 = vsel %vm2977_vm0, 0, %v3101_v20  ;;  %vm3119_vm9 = vweird.f32 %v7695_v14 }
 0x4f5   :  { %v2920_v4 = vadd.s32 %v2919_v27, %v2915_v36  ;;  %v3431_v2 = vadd.s32 3, %v3103_v62  ;;  %v2429_v59 = vmul.f32 %v2428_v21, %v7977_v57  ;;  %v3120_v16 = vand.u32 3, %v3103_v62 }
 0x4f6   :  { %v3098_v52 = vxor.u32 2147483648, %v3097_v44  ;;  %v2916_v61 = vadd.s32 %v8003_v1, %v8001_v48  ;;  %vm2824_vm2 = vcmp.lt.s32.totalorder %v7702_v26, 0  ;;  %vm2823_vm3 = vcmp.le.f32.partialorder %v2822_v17, 0.7853982 }
 0x4f7   :  { %v2921_v31 = vadd.s32 536870912, %v2920_v4  ;;  %v3432_v60 = vand.u32 3, %v3431_v2  ;;  %v2431_v3 = vsel %vm2430_vm7, %v7977_v57, %v2429_v59  ;;  %vm3121_vm10 = vcmp.lt.s32.totalorder %v3120_v16, 2 }
 0x4f8   :  { %v3099_v40 = vsel %vm2978_vm5, %v3098_v52, %v3097_v44  ;;  %v8024_v33 = vpop.eup %5669  ;;  %vm3122_vm11 = vcmp.eq.s32.totalorder %v3120_v16, 0  ;;  %vm3125_vm12 = vcmp.eq.s32.totalorder %v3120_v16, 2  ;;  %v2434_v9 = vsel %vm2432_vm8, %v2433_v18, %v2431_v3  ;;  %v3515_v16 = vld [vmem:[#allocation4 + $0x1f0] sm:$0xff] }
 0x4f9   :  { %v3102_v8 = vsel %vm2977_vm0, %v7695_v14, %v3099_v40  ;;  %v8021_v29 = vshrl.u32 %v2921_v31, 30  ;;  %v2412_v25 = vmul.f32 %v8024_v33, %v8011_v37  ;;  %vm3433_vm13 = vcmp.lt.s32.totalorder %v3432_v60, 2  ;;  %v3507_v18 = vld [vmem:[#allocation4 + $0x1b0] sm:$0xff] }
 0x4fa   :  { %v3104_v55 = vmul.f32 %v3102_v8, %v3102_v8  ;;  %vm3434_vm15 = vcmp.eq.s32.totalorder %v3432_v60, 0  ;;  %vm3437_vm1 = vcmp.eq.s32.totalorder %v3432_v60, 2  ;;  %vm2418_vm5 = vcmp.eq.f32.partialorder %v8011_v37, inf  ;;  %v3511_v60 = vld [vmem:[#allocation4 + $0x1d0] sm:$0xff] }
 0x4fb   :  { %v2923_v63 = vshll.u32 %v8021_v29, 30  ;;  %v2413_v30 = vmul.f32 %v8024_v33, %v2412_v25  ;;  %v2946_v57 = vsub.s32 4, %v8021_v29  ;;  %v2421_v59 = vand.u32 2147483648, %v8011_v37 }
 0x4fc   :  { %v3105_v47 = vmul.f32 -0.001358992, %v3104_v55  ;;  %v3112_v46 = vmul.f32 -0.00019511016, %v3104_v55  ;;  %vm2420_vm0 = vcmp.eq.f32.partialorder %v8011_v37, 0.0 }
 0x4fd   :  { %v2924_v32 = vsub.s32 %v2920_v4, %v2923_v63  ;;  %v2414_v4 = vmul.f32 0.5, %v2413_v30  ;;  %v2947_v14 = vsel %vm2824_vm2, %v2946_v57, %v8021_v29  ;;  %v8075_v30 = vand.u32 4294901760, %v3507_v18 }
 0x4fe   :  { %v3106_v19 = vadd.f32 0.041655596, %v3105_v47  ;;  %v3113_v24 = vadd.f32 0.008332121, %v3112_v46 }
 0x4ff   :  { %vm2925_vm6 = vcmp.lt.s32.totalorder %v2924_v32, 0  ;;  %v2926_v51 = vsub.s32 0, %v2924_v32  ;;  %v2415_v56 = vsub.f32 1.5, %v2414_v4 }
 0x500   :  { %v3107_v50 = vmul.f32 %v3106_v19, %v3104_v55  ;;  %v3114_v42 = vmul.f32 %v3113_v24, %v3104_v55  ;;  %v2949_v24 = vsel %vm2823_vm3, 0, %v2947_v14  ;;  %v3501_v14 = vld [vmem:[#allocation4 + $0x180] sm:$0xff] }
 0x501   :  { %v2927_v11 = vsel %vm2925_vm6, %v2926_v51, %v2924_v32  ;;  %v2416_v46 = vmul.f32 %v8024_v33, %v2415_v56  ;;  %v8056_v29 = vand.u32 3, %v2949_v24 }
 0x502   :  { %v3108_v43 = vadd.f32 -0.4999988, %v3107_v50  ;;  %v3115_v28 = vadd.f32 -0.16666654, %v3114_v42  ;;  %v2928_v23 = vclz %v2927_v11  ;;  %v3513_v11 = vld [vmem:[#allocation4 + $0x1e0] sm:$0xff] }
 0x503   :  { %v2417_v21 = vmul.f32 %v2416_v46, %v8011_v37  ;;  %vm2968_vm6 = vcmp.eq.s32.totalorder %v8056_v29, 0  ;;  %vm2971_vm7 = vcmp.eq.s32.totalorder %v8056_v29, 2  ;;  %vm2967_vm8 = vcmp.lt.s32.totalorder %v8056_v29, 2  ;;  %v3493_v29 = vld [vmem:[#allocation4 + $0x140] sm:$0xff] }
 0x504   :  { %v3109_v12 = vmul.f32 %v3108_v43, %v3104_v55  ;;  %v3116_v58 = vmul.f32 %v3115_v28, %v3104_v55  ;;  %v5608_v13 = vadd.s32 4294967294, %v2928_v23  ;;  %v8068_v3 = vand.u32 4294901760, %v3513_v11 }
 0x505   :  { %v2419_v33 = vsel %vm2418_vm5, %v8011_v37, %v2417_v21  ;;  %v3509_v37 = vld [vmem:[#allocation4 + $0x1c0] sm:$0xff] }
 0x506   :  { %v3110_v53 = vadd.f32 1.0, %v3109_v12  ;;  %v3117_v54 = vadd.f32 1.0, %v3116_v58  ;;  %vm5609_vm14 = vcmp.lt.s32.totalorder %v5608_v13, 0  ;;  %v8061_v58 = vsel %vm2420_vm0, %v2421_v59, %v2419_v33  ;;  %v3497_v21 = vld [vmem:[#allocation4 + $0x160] sm:$0xff]  ;;  %v3491_v33 = vld [vmem:[#allocation4 + $0x130] sm:$0xff] }
 0x507   :  { %v2931_v38 = vsel %vm5609_vm14, 0, %v5608_v13  ;;  %v3505_v13 = vld [vmem:[#allocation4 + $0x1a0] sm:$0xff] }
 0x508   :  { %v3118_v6 = vmul.f32 %v3117_v54, %v3102_v8  ;;  %v3126_v22 = vxor.u32 2147483648, %v3110_v53  ;;  %v2932_v15 = vsub.s32 32, %v2931_v38  ;;  %v2936_v7 = vsub.s32 4294967266, %v2931_v38 }
 0x509   :  { %v2933_v10 = vshll.u32 %v2924_v32, %v2931_v38  ;;  %v3276_v32 = vadd.s32 3, %v2949_v24  ;;  %v8066_v54 = vand.u32 4294901760, %v3515_v16 }
 0x50a   :  { %v3123_v35 = vxor.u32 2147483648, %v3118_v6  ;;  %v3127_v0 = vsel %vm3125_vm12, %v3126_v22, %v3118_v6  ;;  %v3439_v39 = vsel %vm3437_vm1, %v3126_v22, %v3118_v6  ;;  %v2934_v52 = vshrl.u32 %v2916_v61, %v2932_v15 }
 0x50b   :  { %v2937_v36 = vadd.s32 127, %v2936_v7  ;;  %v3277_v51 = vand.u32 3, %v3276_v32  ;;  %v8071_v6 = vand.u32 4294901760, %v3511_v60  ;;  %v8073_v22 = vand.u32 4294901760, %v3509_v37  ;;  %3870 = vmatpush.msra.mxu2 %v8066_v54 }
 0x50c   :  { %v3436_v41 = vsel %vm3434_vm15, %v3110_v53, %v3123_v35  ;;  %v3124_v34 = vsel %vm3122_vm11, %v3110_v53, %v3123_v35  ;;  %v2935_v45 = vor.u32 %v2934_v52, %v2933_v10  ;;  %v8077_v35 = vand.u32 4294901760, %v3505_v13 }
 0x50d   :  { %v3440_v44 = vsel %vm3433_vm13, %v3436_v41, %v3439_v39  ;;  %v3128_v5 = vsel %vm3121_vm10, %v3124_v34, %v3127_v0  ;;  %v2938_v40 = vshll.u32 %v2937_v36, 23  ;;  %vm2965_vm10 = vweird.f32 %v7702_v26  ;;  %3872 = vmatpush.msra.mxu2 %v8068_v3 }
 0x50e   :  { %v3441_v49 = vsel %vm3119_vm9, nan, %v3440_v44  ;;  %v3129_v48 = vsel %vm3119_vm9, nan, %v3128_v5  ;;  %v2942_v31 = vcvt.s32.f32 %v2935_v45  ;;  %vm3278_vm9 = vcmp.lt.s32.totalorder %v3277_v51, 2 }
 0x50f   :  { %v3443_v1 = vmul.f32 %v3441_v49, %v2434_v9  ;;  %v8044_v27 = vmul.f32 %v3129_v48, %v2434_v9  ;;  %v2939_v8 = vor.u32 4788187, %v2938_v40  ;;  %v8080_v61 = vsub.f32 %v3515_v16, %v8066_v54  ;;  %3874 = vmatpush.msra.mxu2 %v8071_v6 }
 0x510   :  { %v8083_v15 = vsub.f32 %v3513_v11, %v8068_v3  ;;  %v8087_v7 = vsub.f32 %v3511_v60, %v8071_v6  ;;  %v8090_v41 = vsub.f32 %v3509_v37, %v8073_v22  ;;  %v8093_v39 = vsub.f32 %v3507_v18, %v8075_v30 }
 0x511   :  { %3448 = vrot.lane.b32.xlu2 %v3443_v1, %s5728_s22  ;;  %v2940_v55 = vand.u32 2147483647, %v2939_v8  ;;  %v8096_v34 = vsub.f32 %v3505_v13, %v8077_v35  ;;  %v3912_v5 = vand.u32 4294901760, %v8080_v61  ;;  %vm3279_vm11 = vcmp.eq.s32.totalorder %v3277_v51, 0  ;;  %3876 = vmatpush.msra.mxu2 %v8073_v22 }
 0x512   :  { %v3918_v52 = vand.u32 4294901760, %v8083_v15  ;;  %v3924_v36 = vand.u32 4294901760, %v8087_v7  ;;  %v3930_v9 = vand.u32 4294901760, %v8090_v41  ;;  %v3936_v49 = vand.u32 4294901760, %v8093_v39 }
 0x513   :  { %v2943_v20 = vmul.f32 %v2942_v31, %v2940_v55  ;;  %vm3282_vm12 = vcmp.eq.s32.totalorder %v3277_v51, 2  ;;  %v3913_v1 = vsub.f32 %v8080_v61, %v3912_v5  ;;  %v3942_v45 = vand.u32 4294901760, %v8096_v34  ;;  %3878 = vmatpush.msra.mxu2 %v8075_v30 }
 0x514   :  { %v3919_v4 = vsub.f32 %v8083_v15, %v3918_v52  ;;  %v3925_v8 = vsub.f32 %v8087_v7, %v3924_v36  ;;  %v3931_v55 = vsub.f32 %v8090_v41, %v3930_v9  ;;  %v3937_v24 = vsub.f32 %v8093_v39, %v3936_v49 }
 0x515   :  { %v2944_v47 = vxor.u32 2147483648, %v2943_v20  ;;  %3880 = vmatpush.msra.mxu2 %v8077_v35  ;;  %v8156_v60 = vand.u32 4294901760, %v3493_v29  ;;  %vm3525_vm13 = vcmask 261120  }
 0x516   :  { %v3932_v51 = vand.u32 4294901760, %v3931_v55 }
 0x517   :  { %v2945_v62 = vsel %vm2824_vm2, %v2944_v47, %v2943_v20  ;;  %v3914_v20 = vand.u32 4294901760, %v3913_v1  ;;  %v3503_v47 = vld [vmem:[#allocation4 + $0x190] sm:$0xff] }
 0x518   :  { %v2948_v19 = vsel %vm2823_vm3, %v7702_v26, %v2945_v62  ;;  %v8139_v59 = vand.u32 4294901760, %v3503_v47  ;;  %v8141_v26 = vand.u32 4294901760, %v3501_v14 }
 0x519   :  { %v2950_v63 = vmul.f32 %v2948_v19, %v2948_v19  ;;  %3915 = vmatpush.msra.mxu3 %v3914_v20 }
 0x51a   :  { %v8161_v37 = vsub.f32 %v3501_v14, %v8141_v26  ;;  %3882 = vmatpush.msra.mxu2 %v8139_v59 }
 0x51b   :  { %v2951_v50 = vmul.f32 -0.001358992, %v2950_v63  ;;  %v2958_v42 = vmul.f32 -0.00019511016, %v2950_v63 }
 0x51c   :  { %3884 = vmatpush.msra.mxu2 %v8141_v26 }
 0x51d   :  { %v2952_v2 = vadd.f32 0.041655596, %v2951_v50  ;;  %v2959_v43 = vadd.f32 0.008332121, %v2958_v42  ;;  %v3495_v50 = vld [vmem:[#allocation4 + $0x150] sm:$0xff] }
 0x51e   :  { %v8148_v16 = vand.u32 4294901760, %v3495_v50 }
 0x51f   :  { %v2953_v28 = vmul.f32 %v2952_v2, %v2950_v63  ;;  %v2960_v17 = vmul.f32 %v2959_v43, %v2950_v63  ;;  %v3926_v2 = vand.u32 4294901760, %v3925_v8  ;;  %v3943_v43 = vsub.f32 %v8096_v34, %v3942_v45 }
 0x521   :  { %v2954_v25 = vadd.f32 -0.4999988, %v2953_v28  ;;  %v2961_v12 = vadd.f32 -0.16666654, %v2960_v17  ;;  %v3944_v1 = vand.u32 4294901760, %v3943_v43 }
 0x523   :  { %v2955_v23 = vmul.f32 %v2954_v25, %v2950_v63  ;;  %v2962_v53 = vmul.f32 %v2961_v12, %v2950_v63  ;;  %v3499_v63 = vld [vmem:[#allocation4 + $0x170] sm:$0xff]  ;;  %v8146_v12 = vand.u32 4294901760, %v3497_v21 }
 0x524   :  { %v8143_v25 = vand.u32 4294901760, %v3499_v63 }
 0x525   :  { %v2956_v0 = vadd.f32 1.0, %v2955_v23  ;;  %v2963_v38 = vadd.f32 1.0, %v2962_v53  ;;  %v8158_v23 = vand.u32 4294901760, %v3491_v33  ;;  %v3938_v53 = vand.u32 4294901760, %v3937_v24  ;;  %v3487_v24 = vld [vmem:[#allocation4 + $0x110] sm:$0xff] }
 0x526   :  { %v8164_v18 = vsub.f32 %v3499_v63, %v8143_v25  ;;  %v8167_v13 = vsub.f32 %v3497_v21, %v8146_v12  ;;  %3886 = vmatpush.msra.mxu2 %v8143_v25  ;;  %v3485_v63 = vld [vmem:[#allocation4 + $0x100] sm:$0xff] }
 0x527   :  { %v2964_v10 = vmul.f32 %v2963_v38, %v2948_v19  ;;  %v2972_v44 = vxor.u32 2147483648, %v2956_v0  ;;  %v3920_v19 = vand.u32 4294901760, %v3919_v4 }
 0x528   :  { %v3960_v4 = vand.u32 4294901760, %v8164_v18  ;;  %v3966_v8 = vand.u32 4294901760, %v8167_v13  ;;  %3888 = vmatpush.msra.mxu2 %v8146_v12 }
 0x529   :  { %v2969_v48 = vxor.u32 2147483648, %v2964_v10  ;;  %v3284_v40 = vsel %vm3282_vm12, %v2972_v44, %v2964_v10  ;;  %v2973_v56 = vsel %vm2971_vm7, %v2972_v44, %v2964_v10  ;;  %3921 = vmatpush.msra.mxu3 %v3920_v19  ;;  %v8176_v44 = vsub.f32 %v3495_v50, %v8148_v16 }
 0x52a   :  { %v3967_v50 = vsub.f32 %v8167_v13, %v3966_v8  ;;  %3890 = vmatpush.msra.mxu2 %v8148_v16 }
 0x52b   :  { %v3281_v31 = vsel %vm3279_vm11, %v2956_v0, %v2969_v48  ;;  %v2970_v57 = vsel %vm2968_vm6, %v2956_v0, %v2969_v48  ;;  %3927 = vmatpush.msra.mxu3 %v3926_v2  ;;  %v3489_v0 = vld [vmem:[#allocation4 + $0x120] sm:$0xff]  ;;  %v8179_v48 = vsub.f32 %v3493_v29, %v8156_v60  ;;  %v3972_v14 = vand.u32 4294901760, %v8176_v44 }
 0x52c   :  { %v3285_v46 = vsel %vm3278_vm9, %v3281_v31, %v3284_v40  ;;  %v2974_v62 = vsel %vm2967_vm8, %v2970_v57, %v2973_v56  ;;  %v3954_v40 = vand.u32 4294901760, %v8161_v37  ;;  %v8193_v57 = vsub.f32 %v3491_v33, %v8158_v23  ;;  %3892 = vmatpush.msra.mxu2 %v8156_v60 }
 0x52d   :  { %v3286_v42 = vsel %vm2965_vm10, nan, %v3285_v46  ;;  %v2975_v32 = vsel %vm2965_vm10, nan, %v2974_v62  ;;  %3933 = vmatpush.msra.mxu3 %v3932_v51  ;;  %v8195_v56 = vand.u32 4294901760, %v3489_v0  ;;  %v3978_v19 = vand.u32 4294901760, %v8179_v48 }
 0x52e   :  { %v3442_v28 = vmul.f32 %v3286_v42, %v8061_v58  ;;  %v3130_v17 = vmul.f32 %v2975_v32, %v8061_v58  ;;  %v8154_v58 = vsub.f32 %v3503_v47, %v8139_v59  ;;  %v3955_v20 = vsub.f32 %v8161_v37, %v3954_v40  ;;  %3894 = vmatpush.msra.mxu2 %v8158_v23 }
 0x52f   :  { %3939 = vmatpush.msra.mxu3 %v3938_v53  ;;  %v3961_v47 = vsub.f32 %v8164_v18, %v3960_v4  ;;  %v3984_v32 = vand.u32 4294901760, %v8193_v57  ;;  %v8219_v2 = vsub.f32 %v3489_v0, %v8195_v56  ;;  %v3973_v29 = vsub.f32 %v8176_v44, %v3972_v14 }
 0x530   :  { %3446 = vrot.lane.b32.xlu1 %v3442_v28, %s5728_s22  ;;  %v8151_v11 = vand.u32 4294901760, %v3130_v17  ;;  %v3948_v10 = vand.u32 4294901760, %v8154_v58  ;;  %v3956_v21 = vand.u32 4294901760, %v3955_v20  ;;  %v8226_v33 = vand.u32 4294901760, %v3487_v24  ;;  %3896 = vmatpush.msra.mxu2 %v8195_v56 }
 0x531   :  { %3945 = vmatpush.msra.mxu3 %v3944_v1  ;;  %v3962_v43 = vand.u32 4294901760, %v3961_v47  ;;  %v8228_v28 = vand.u32 4294901760, %v3485_v63  ;;  %v3968_v51 = vand.u32 4294901760, %v3967_v50  ;;  %v3990_v53 = vand.u32 4294901760, %v8219_v2 }
 0x532   :  { %v8171_v38 = vsub.f32 %v3130_v17, %v8151_v11  ;;  %3666 = vmatmul.f32.vlgmr.msrb.gmra.mxu1 %v8151_v11  ;;  %v3949_v31 = vsub.f32 %v8154_v58, %v3948_v10  ;;  %v3979_v17 = vsub.f32 %v8179_v48, %v3978_v19  ;;  %v8238_v0 = vsub.f32 %v3487_v24, %v8226_v33 }
 0x533   :  { %4066 = vmatpush.msrb.mxu1 %v8066_v54  ;;  %v8241_v1 = vsub.f32 %v3485_v63, %v8228_v28  ;;  %v3985_v20 = vsub.f32 %v8193_v57, %v3984_v32  ;;  %3898 = vmatpush.msra.mxu2 %v8226_v33 }
 0x534   :  { %3720 = vmatmul.f32.vlgmr.msrb.gmra.mxu2 %v8171_v38  ;;  %v8187_v55 = vand.u32 4294901760, %v8171_v38  ;;  %v3950_v62 = vand.u32 4294901760, %v3949_v31  ;;  %v3974_v31 = vand.u32 4294901760, %v3973_v29  ;;  %v3996_v47 = vand.u32 4294901760, %v8238_v0 }
 0x535   :  { %4068 = vmatpush.msrb.mxu1 %v8068_v3  ;;  %v4002_v24 = vand.u32 4294901760, %v8241_v1  ;;  %v3986_v63 = vand.u32 4294901760, %v3985_v20  ;;  %3900 = vmatpush.msra.mxu2 %v8228_v28 }
 0x536   :  { %3759 = vmatmul.f32.vlgmr.msrb.gmra.mxu3 %v8187_v55  ;;  %v3563_v46 = vsub.f32 %v8171_v38, %v8187_v55 }
 0x537   :  { %4070 = vmatpush.msrb.mxu1 %v8071_v6  ;;  %3951 = vmatpush.msra.mxu3 %v3950_v62  ;;  %v3991_v62 = vsub.f32 %v8219_v2, %v3990_v53 }
 0x538   :  { %v8215_v42 = vand.u32 4294901760, %v3563_v46  ;;  %v3980_v46 = vand.u32 4294901760, %v3979_v17  ;;  %4107 = vmatpush.msrb.mxu2 %v3912_v5 }
 0x539   :  { %3957 = vmatpush.msra.mxu3 %v3956_v21  ;;  %4072 = vmatpush.msrb.mxu1 %v8073_v22  ;;  %v3997_v21 = vsub.f32 %v8238_v0, %v3996_v47  ;;  %v3992_v50 = vand.u32 4294901760, %v3991_v62 }
 0x53a   :  { %3565 = vmatmul.f32.vlgmr.msrb.gmra.mxu0 %v8215_v42  ;;  %3865 = vmatmul.f32.vlgmr.msra.gmra.mxu1 %v8151_v11 }
 0x53b   :  { %4013 = vmatpush.msrb.mxu0 %v8080_v61  ;;  %3963 = vmatpush.msra.mxu3 %v3962_v43  ;;  %v4003_v43 = vsub.f32 %v8241_v1, %v4002_v24  ;;  %v3998_v29 = vand.u32 4294901760, %v3997_v21  ;;  %v3517_v61 = vld [vmem:[#allocation4 + $0x200] sm:$0xff] }
 0x53c   :  { %4074 = vmatpush.msrb.mxu1 %v8075_v30  ;;  %4111 = vmatpush.msrb.mxu2 %v3918_v52 }
 0x53d   :  { %4016 = vmatpush.msrb.mxu0 %v8083_v15  ;;  %3969 = vmatpush.msra.mxu3 %v3968_v51  ;;  %v4004_v17 = vand.u32 4294901760, %v4003_v43  ;;  %v3470_v43 = vld [vmem:[#allocation4 + $0x88] sm:$0xff] }
 0x53e   :  { %4076 = vmatpush.msrb.mxu1 %v8077_v35  ;;  %4115 = vmatpush.msrb.mxu2 %v3924_v36 }
 0x53f   :  { %4019 = vmatpush.msrb.mxu0 %v8087_v7  ;;  %3975 = vmatpush.msra.mxu3 %v3974_v31  ;;  %v8349_v7 = vand.u32 4294901760, %v3517_v61 }
 0x540   :  { %4078 = vmatpush.msrb.mxu1 %v8139_v59  ;;  %4119 = vmatpush.msrb.mxu2 %v3930_v9 }
 0x541   :  { %4022 = vmatpush.msrb.mxu0 %v8090_v41  ;;  %3981 = vmatpush.msra.mxu3 %v3980_v46  ;;  %v8360_v5 = vsub.f32 %v3517_v61, %v8349_v7  ;;  %v3472_v46 = vld [vmem:[#allocation4 + $0x98] sm:$0xff] }
 0x542   :  { %3828 = vmatmul.f32.vlgmr.msra.gmra.mxu0 %v8151_v11  ;;  %4080 = vmatpush.msrb.mxu1 %v8141_v26 }
 0x543   :  { %4025 = vmatpush.msrb.mxu0 %v8093_v39  ;;  %3987 = vmatpush.msra.mxu3 %v3986_v63 }
 0x544   :  { %4082 = vmatpush.msrb.mxu1 %v8143_v25  ;;  %4123 = vmatpush.msrb.mxu2 %v3936_v49  ;;  %v4271_v49 = vand.u32 4294901760, %v8360_v5 }
 0x545   :  { %4028 = vmatpush.msrb.mxu0 %v8096_v34  ;;  %3993 = vmatpush.msra.mxu3 %v3992_v50 }
 0x546   :  { %4084 = vmatpush.msrb.mxu1 %v8146_v12  ;;  %4127 = vmatpush.msrb.mxu2 %v3942_v45 }
 0x547   :  { %4031 = vmatpush.msrb.mxu0 %v8154_v58  ;;  %3999 = vmatpush.msra.mxu3 %v3998_v29 }
 0x548   :  { %4086 = vmatpush.msrb.mxu1 %v8148_v16  ;;  %4131 = vmatpush.msrb.mxu2 %v3948_v10 }
 0x549   :  { %4034 = vmatpush.msrb.mxu0 %v8161_v37  ;;  %4005 = vmatpush.msra.mxu3 %v4004_v17  ;;  %v3482_v37 = vld [vmem:[#allocation4 + $0xe8] sm:$0xff] }
 0x54a   :  { %4088 = vmatpush.msrb.mxu1 %v8156_v60  ;;  %4135 = vmatpush.msrb.mxu2 %v3954_v40 }
 0x54b   :  { %4037 = vmatpush.msrb.mxu0 %v8164_v18  ;;  %4174 = vmatpush.msrb.mxu3 %v8066_v54  ;;  %v3523_v54 = vld [vmem:[#allocation4 + $0x230] sm:$0xff]  ;;  %v3480_v18 = vld [vmem:[#allocation4 + $0xd8] sm:$0xff] }
 0x54c   :  { %4090 = vmatpush.msrb.mxu1 %v8158_v23  ;;  %4139 = vmatpush.msrb.mxu2 %v3960_v4 }
 0x54d   :  { %4040 = vmatpush.msrb.mxu0 %v8167_v13  ;;  %4176 = vmatpush.msrb.mxu3 %v8068_v3  ;;  %v8339_v3 = vand.u32 4294901760, %v3523_v54  ;;  %v8377_v13 = vand.u32 4294901760, %v3482_v37 }
 0x54e   :  { %4092 = vmatpush.msrb.mxu1 %v8195_v56  ;;  %4143 = vmatpush.msrb.mxu2 %v3966_v8 }
 0x54f   :  { %4043 = vmatpush.msrb.mxu0 %v8176_v44  ;;  %4178 = vmatpush.msrb.mxu3 %v8071_v6  ;;  %v3521_v6 = vld [vmem:[#allocation4 + $0x220] sm:$0xff]  ;;  %v3478_v44 = vld [vmem:[#allocation4 + $0xc8] sm:$0xff]  ;;  %v8385_v8 = vsub.f32 %v3482_v37, %v8377_v13 }
 0x550   :  { %4094 = vmatpush.msrb.mxu1 %v8226_v33  ;;  %4147 = vmatpush.msrb.mxu2 %v3972_v14 }
 0x551   :  { %4046 = vmatpush.msrb.mxu0 %v8179_v48  ;;  %4180 = vmatpush.msrb.mxu3 %v8073_v22  ;;  %v8343_v22 = vsub.f32 %v3523_v54, %v8339_v3  ;;  %v8382_v48 = vand.u32 4294901760, %v3480_v18 }
 0x552   :  { %4096 = vmatpush.msrb.mxu1 %v8228_v28  ;;  %4151 = vmatpush.msrb.mxu2 %v3978_v19 }
 0x553   :  { %4049 = vmatpush.msrb.mxu0 %v8193_v57  ;;  %4182 = vmatpush.msrb.mxu3 %v8075_v30  ;;  %v8345_v30 = vand.u32 4294901760, %v3521_v6  ;;  %v4253_v41 = vand.u32 4294901760, %v8343_v22  ;;  %v8387_v57 = vand.u32 4294901760, %v3478_v44 }
 0x554   :  { %4155 = vmatpush.msrb.mxu2 %v3984_v32 }
 0x555   :  { %4052 = vmatpush.msrb.mxu0 %v8219_v2  ;;  %4184 = vmatpush.msrb.mxu3 %v8077_v35  ;;  %v3519_v35 = vld [vmem:[#allocation4 + $0x210] sm:$0xff]  ;;  %v8354_v39 = vsub.f32 %v3521_v6, %v8345_v30  ;;  %v4254_v52 = vsub.f32 %v8343_v22, %v4253_v41  ;;  %v8408_v31 = vsub.f32 %v3478_v44, %v8387_v57  ;;  %v8438_v6 = vand.u32 4294901760, %v3472_v46 }
 0x556   :  { %4159 = vmatpush.msrb.mxu2 %v3990_v53  ;;  %v8347_v15 = vand.u32 4294901760, %v3519_v35 }
 0x557   :  { %4055 = vmatpush.msrb.mxu0 %v8238_v0  ;;  %4186 = vmatpush.msrb.mxu3 %v8139_v59  ;;  %v4259_v36 = vand.u32 4294901760, %v8354_v39  ;;  %v4255_v45 = vand.u32 4294901760, %v4254_v52  ;;  %v3474_v0 = vld [vmem:[#allocation4 + $0xa8] sm:$0xff]  ;;  %v9151_v54 = vand.u32 4294901760, %v8408_v31 }
 0x558   :  { %4163 = vmatpush.msrb.mxu2 %v3996_v47  ;;  %v8357_v34 = vsub.f32 %v3519_v35, %v8347_v15  ;;  %v8422_v63 = vand.u32 4294901760, %v3474_v0 }
 0x559   :  { %4058 = vmatpush.msrb.mxu0 %v8241_v1  ;;  %4188 = vmatpush.msrb.mxu3 %v8141_v26  ;;  %v4260_v59 = vsub.f32 %v8354_v39, %v4259_v36 }
 0x55a   :  { %4167 = vmatpush.msrb.mxu2 %v4002_v24  ;;  %v4265_v9 = vand.u32 4294901760, %v8357_v34  ;;  %4256 = vmatpush.msra.mxu1 %v4255_v45  ;;  %v8450_v45 = vsub.f32 %v3474_v0, %v8422_v63 }
 0x55b   :  { %4190 = vmatpush.msrb.mxu3 %v8143_v25  ;;  %4223 = vmatpush.msra.mxu0 %v8339_v3  ;;  %v4272_v25 = vsub.f32 %v8360_v5, %v4271_v49 }
 0x55c   :  { %v4266_v26 = vsub.f32 %v8357_v34, %v4265_v9 }
 0x55d   :  { %4192 = vmatpush.msrb.mxu3 %v8146_v12  ;;  %4225 = vmatpush.msra.mxu0 %v8345_v30  ;;  %v4261_v12 = vand.u32 4294901760, %v4260_v59  ;;  %v4273_v58 = vand.u32 4294901760, %v4272_v25  ;;  %v8452_v59 = vand.u32 4294901760, %v3470_v43 }
 0x55f   :  { %4194 = vmatpush.msrb.mxu3 %v8148_v16  ;;  %4227 = vmatpush.msra.mxu0 %v8347_v15  ;;  %v4267_v16 = vand.u32 4294901760, %v4266_v26  ;;  %v3468_v26 = vld [vmem:[#allocation4 + $0x78] sm:$0xff]  ;;  %v8476_v37 = vsub.f32 %v3470_v43, %v8452_v59 }
 0x560   :  { %4262 = vmatpush.msra.mxu1 %v4261_v12  ;;  %v4457_v12 = vsub.f32 %v8408_v31, %v9151_v54 }
 0x561   :  { %4196 = vmatpush.msrb.mxu3 %v8156_v60  ;;  %4229 = vmatpush.msra.mxu0 %v8349_v7  ;;  %v3484_v60 = vld [vmem:[#allocation4 + $0xf8] sm:$0xff] }
 0x562   :  { %4268 = vmatpush.msra.mxu1 %v4267_v16  ;;  %v8466_v16 = vsub.f32 %v3472_v46, %v8438_v6  ;;  %v3458_v46 = vld [vmem:[#allocation4 + $0x28] sm:$0xff] }
 0x563   :  { %4198 = vmatpush.msrb.mxu3 %v8158_v23  ;;  %v8375_v23 = vand.u32 4294901760, %v3484_v60 }
 0x564   :  { %4274 = vmatpush.msra.mxu1 %v4273_v58  ;;  %v3466_v58 = vld [vmem:[#allocation4 + $0x68] sm:$0xff] }
 0x565   :  { %4200 = vmatpush.msrb.mxu3 %v8195_v56  ;;  %v8380_v10 = vsub.f32 %v3484_v60, %v8375_v23  ;;  %v3476_v56 = vld [vmem:[#allocation4 + $0xb8] sm:$0xff]  ;;  %v9147_v60 = vand.u32 4294901760, %v8450_v45  ;;  %v8483_v44 = vand.u32 4294901760, %v3466_v58 }
 0x566   :  { %v8400_v53 = vand.u32 4294901760, %v3476_v56 }
 0x567   :  { %4202 = vmatpush.msrb.mxu3 %v8226_v33  ;;  %v9154_v32 = vand.u32 4294901760, %v8380_v10 }
 0x568   :  { %v8429_v50 = vsub.f32 %v3476_v56, %v8400_v53 }
 0x569   :  { %4204 = vmatpush.msrb.mxu3 %v8228_v28  ;;  %v8396_v28 = vsub.f32 %v3480_v18, %v8382_v48  ;;  %v4439_v47 = vsub.f32 %v8380_v10, %v9154_v32  ;;  %v3464_v18 = vld [vmem:[#allocation4 + $0x58] sm:$0xff]  ;;  %v3502_v32 = vld [vmem:[#allocation4 + $0x188] sm:$0xff] }
 0x56a   :  { %v8492_v56 = vand.u32 4294901760, %v3464_v18 }
 0x56b   :  { %v3449_v40 = vpop.permute.xlu2 %3448  ;;  %v9152_v24 = vand.u32 4294901760, %v8396_v28  ;;  %v4440_v35 = vand.u32 4294901760, %v4439_v47 }
 0x56d   :  { %v4451_v52 = vsub.f32 %v8396_v28, %v9152_v24 }
 0x5a2   :  { %v3447_v4 = vpop.permute.xlu1 %3446 }
 0x5a3   :  { %v3450_v14 = vsel %vm2550_vm4, %v3447_v4, %v3449_v40  ;;  %v3452_v19 = vsel %vm2550_vm4, %v8044_v27, %v3447_v4  ;;  %v9153_v27 = vand.u32 4294901760, %v8385_v8  ;;  %v9145_v40 = vand.u32 4294901760, %v8466_v16  ;;  %v3462_v4 = vld [vmem:[#allocation4 + $0x48] sm:$0xff] }
 0x5a4   :  { %v3526_v2 = vsel %vm3525_vm13, %v3450_v14, 0  ;;  %v8393_v33 = vand.u32 4294901760, %v3452_v19  ;;  %v4469_v14 = vsub.f32 %v8450_v45, %v9147_v60  ;;  %v8504_v0 = vand.u32 4294901760, %v3462_v4  ;;  %v3510_v60 = vld [vmem:[#allocation4 + $0x1c8] sm:$0xff] }
 0x5a5   :  { %v8398_v51 = vand.u32 4294901760, %v3526_v2  ;;  %v4445_v17 = vsub.f32 %v8385_v8, %v9153_v27  ;;  %v4475_v47 = vsub.f32 %v8466_v16, %v9145_v40  ;;  %v3512_v40 = vld [vmem:[#allocation4 + $0x1d8] sm:$0xff] }
 0x5a6   :  { %v8403_v1 = vsub.f32 %v3452_v19, %v8393_v33  ;;  %4007 = vmatmul.f32.vlgmr.msra.gmra.mxu3 %v8393_v33  ;;  %v9143_v19 = vand.u32 4294901760, %v8476_v37 }
 0x5a7   :  { %9361 = vst [vmem:[#allocation24_spill] sm:$0xff] %v8398_v51  ;;  %v8411_v20 = vsub.f32 %v3526_v2, %v8398_v51  ;;  %4323 = vmatpush.msra.mxu3 %v8339_v3  ;;  %v4446_v25 = vand.u32 4294901760, %v4445_v17  ;;  %v3460_v2 = vld [vmem:[#allocation4 + $0x38] sm:$0xff] }
 0x5a8   :  { %9362 = vst [vmem:[#allocation25_spill] sm:$0xff] %v8403_v1  ;;  %4061 = vmatmul.f32.vlgmr.msrb.gmra.mxu0 %v8403_v1  ;;  %v8419_v62 = vand.u32 4294901760, %v8403_v1  ;;  %v8516_v17 = vand.u32 4294901760, %v3460_v2 }
 0x5a9   :  { %9363 = vst [vmem:[#allocation32_spill] sm:$0xff] %v8411_v20  ;;  %v8425_v21 = vand.u32 4294901760, %v8411_v20  ;;  %4325 = vmatpush.msra.mxu3 %v8345_v30  ;;  %4352 = vmatpush.msrb.mxu0 %v4253_v41 }
 0x5aa   :  { %9364 = vst [vmem:[#allocation10_spill] sm:$0xff] %v8419_v62  ;;  %4100 = vmatmul.f32.vlgmr.msrb.gmra.mxu1 %v8419_v62  ;;  %v3904_v29 = vsub.f32 %v8403_v1, %v8419_v62 }
 0x5ab   :  { %9365 = vst [vmem:[#allocation26_spill] sm:$0xff] %v8425_v21  ;;  %4327 = vmatpush.msra.mxu3 %v8347_v15  ;;  %4356 = vmatpush.msrb.mxu0 %v4259_v36  ;;  %v4233_v61 = vsub.f32 %v8411_v20, %v8425_v21 }
 0x5ac   :  { %4383 = vmatpush.msrb.mxu1 %v8339_v3  ;;  %v8444_v41 = vand.u32 4294901760, %v3904_v29  ;;  %v9149_v3 = vand.u32 4294901760, %v8429_v50  ;;  %v8514_v29 = vsub.f32 %v3464_v18, %v8492_v56  ;;  %v8539_v18 = vsub.f32 %v3460_v2, %v8516_v17 }
 0x5ad   :  { %4329 = vmatpush.msra.mxu3 %v8349_v7  ;;  %4360 = vmatpush.msrb.mxu0 %v4265_v9  ;;  %v8457_v36 = vand.u32 4294901760, %v4233_v61  ;;  %v8470_v9 = vand.u32 4294901760, %v3468_v26  ;;  %v3456_v61 = vld [vmem:[#allocation4 + $0x18] sm:$0xff] }
 0x5ae   :  { %4385 = vmatpush.msrb.mxu1 %v8345_v30  ;;  %3906 = vmatmul.f32.vlgmr.msra.gmra.mxu2 %v8444_v41  ;;  %v4452_v30 = vand.u32 4294901760, %v4451_v52 }
 0x5af   :  { %9366 = vst [vmem:[#allocation11_spill] sm:$0xff] %v8457_v36  ;;  %4206 = vmatmul.f32.vlgmr.msrb.gmra.mxu3 %v8393_v33  ;;  %4294 = vmatpush.msra.mxu2 %v8343_v22  ;;  %v4463_v22 = vsub.f32 %v8429_v50, %v9149_v3  ;;  %v3508_v3 = vld [vmem:[#allocation4 + $0x1b8] sm:$0xff] }
 0x5b0   :  { %4441 = vmatpush.msrb.mxu3 %v4440_v35  ;;  %4364 = vmatpush.msrb.mxu0 %v4271_v49  ;;  %v4458_v49 = vand.u32 4294901760, %v4457_v12  ;;  %v4481_v35 = vsub.f32 %v8476_v37, %v9143_v19  ;;  %v3454_v12 = vld [vmem:[#allocation4 + $0x8] sm:$0xff]  ;;  %v8622_v27 = vand.u32 4294901760, %v3508_v3 }
 0x5b1   :  { %4387 = vmatpush.msrb.mxu1 %v8347_v15  ;;  %4235 = vmatmul.f32.vlgmr.msra.gmra.mxu0 %v8457_v36  ;;  %v8490_v15 = vsub.f32 %v3468_v26, %v8470_v9  ;;  %v8526_v26 = vsub.f32 %v3462_v4, %v8504_v0  ;;  %v8553_v2 = vand.u32 4294901760, %v3454_v12 }
 0x5b2   :  { %4447 = vmatpush.msrb.mxu3 %v4446_v25  ;;  %4539 = vmatpush.msra.mxu0 %v8380_v10  ;;  %v8528_v25 = vand.u32 4294901760, %v3458_v46 }
 0x5b3   :  { %4297 = vmatpush.msra.mxu2 %v8354_v39  ;;  %4389 = vmatpush.msrb.mxu1 %v8349_v7  ;;  %v4464_v7 = vand.u32 4294901760, %v4463_v22  ;;  %v8502_v39 = vsub.f32 %v3466_v58, %v8483_v44  ;;  %v9142_v43 = vand.u32 4294901760, %v8490_v15  ;;  %v8541_v22 = vand.u32 4294901760, %v3456_v61 }
 0x5b4   :  { %4276 = vmatmul.f32.vlgmr.msra.gmra.mxu1 %v8398_v51  ;;  %4453 = vmatpush.msrb.mxu3 %v4452_v30  ;;  %v9140_v30 = vand.u32 4294901760, %v8514_v29 }
 0x5b5   :  { %4542 = vmatpush.msra.mxu0 %v8385_v8  ;;  %4592 = vmatpush.msra.mxu1 %v8375_v23  ;;  %v9139_v52 = vand.u32 4294901760, %v8502_v39  ;;  %v4487_v58 = vsub.f32 %v8490_v15, %v9142_v43 }
 0x5b6   :  { %4300 = vmatpush.msra.mxu2 %v8357_v34  ;;  %4459 = vmatpush.msrb.mxu3 %v4458_v49  ;;  %v4470_v34 = vand.u32 4294901760, %v4469_v14  ;;  %v4482_v49 = vand.u32 4294901760, %v4481_v35  ;;  %v9141_v14 = vand.u32 4294901760, %v8526_v26  ;;  %v9144_v35 = vand.u32 4294901760, %v8539_v18 }
 0x5b7   :  { %4545 = vmatpush.msra.mxu0 %v8396_v28  ;;  %4594 = vmatpush.msra.mxu1 %v8377_v13  ;;  %v4493_v4 = vsub.f32 %v8502_v39, %v9139_v52  ;;  %v8563_v52 = vsub.f32 %v3456_v61, %v8541_v22  ;;  %v3516_v61 = vld [vmem:[#allocation4 + $0x1f8] sm:$0xff] }
 0x5b8   :  { %4303 = vmatpush.msra.mxu2 %v8360_v5  ;;  %4333 = vmatmul.f32.vlgmr.msra.gmra.mxu3 %v8425_v21  ;;  %v4476_v5 = vand.u32 4294901760, %v4475_v47  ;;  %v4488_v47 = vand.u32 4294901760, %v4487_v58  ;;  %v8589_v19 = vand.u32 4294901760, %v3516_v61  ;;  %v8661_v21 = vand.u32 4294901760, %v3502_v32 }
 0x5b9   :  { %4169 = vmatmul.f32.vlgmr.msrb.gmra.mxu2 %v8393_v33  ;;  %4465 = vmatpush.msrb.mxu3 %v4464_v7  ;;  %v8551_v7 = vsub.f32 %v3458_v46, %v8528_v25  ;;  %v4494_v46 = vand.u32 4294901760, %v4493_v4  ;;  %v4511_v4 = vsub.f32 %v8539_v18, %v9144_v35 }
 0x5ba   :  { %4396 = vmatpush.msrb.mxu2 %v8375_v23  ;;  %4548 = vmatpush.msra.mxu0 %v8408_v31 }
 0x5bb   :  { %4596 = vmatpush.msra.mxu1 %v8382_v48  ;;  %4366 = vmatmul.f32.vlgmr.msrb.gmra.mxu0 %v8398_v51  ;;  %v9146_v58 = vand.u32 4294901760, %v8551_v7  ;;  %v4512_v35 = vand.u32 4294901760, %v4511_v4  ;;  %v8606_v4 = vsub.f32 %v3516_v61, %v8589_v19  ;;  %v8618_v61 = vand.u32 4294901760, %v3510_v60 }
 0x5bc   :  { %4398 = vmatpush.msrb.mxu2 %v8377_v13  ;;  %4471 = vmatpush.msrb.mxu3 %v4470_v34  ;;  %v4499_v34 = vsub.f32 %v8514_v29, %v9140_v30  ;;  %v8573_v30 = vsub.f32 %v3454_v12, %v8553_v2  ;;  %v3514_v12 = vld [vmem:[#allocation4 + $0x1e8] sm:$0xff] }
 0x5bd   :  { %4551 = vmatpush.msra.mxu0 %v8429_v50  ;;  %4598 = vmatpush.msra.mxu1 %v8387_v57  ;;  %v9156_v24 = vand.u32 4294901760, %v8606_v4 }
 0x5be   :  { %4391 = vmatmul.f32.vlgmr.msrb.gmra.mxu1 %v8398_v51  ;;  %4400 = vmatpush.msrb.mxu2 %v8382_v48  ;;  %9367 = vst [vmem:[#allocation14_spill] sm:$0xff] %v8573_v30  ;;  %v3496_v51 = vld [vmem:[#allocation4 + $0x158] sm:$0xff] }
 0x5bf   :  { %4477 = vmatpush.msrb.mxu3 %v4476_v5  ;;  %4554 = vmatpush.msra.mxu0 %v8450_v45  ;;  %v4505_v5 = vsub.f32 %v8526_v26, %v9141_v14  ;;  %v9148_v14 = vand.u32 4294901760, %v8563_v52 }
 0x5c0   :  { %4600 = vmatpush.msra.mxu1 %v8400_v53  ;;  %4402 = vmatpush.msrb.mxu2 %v8387_v57 }
 0x5c1   :  { %4483 = vmatpush.msrb.mxu3 %v4482_v49  ;;  %4557 = vmatpush.msra.mxu0 %v8466_v16  ;;  %v4500_v49 = vand.u32 4294901760, %v4499_v34  ;;  %v4506_v43 = vand.u32 4294901760, %v4505_v5  ;;  %v9150_v34 = vand.u32 4294901760, %v8573_v30  ;;  %v8597_v5 = vand.u32 4294901760, %v3514_v12 }
 0x5c2   :  { %4602 = vmatpush.msra.mxu1 %v8422_v63  ;;  %4306 = vmatmul.f32.vlgmr.msra.gmra.mxu2 %v8411_v20 }
 0x5c3   :  { %4404 = vmatpush.msrb.mxu2 %v8400_v53  ;;  %4489 = vmatpush.msrb.mxu3 %v4488_v47  ;;  %v4517_v47 = vsub.f32 %v8551_v7, %v9146_v58 }
 0x5c4   :  { %4560 = vmatpush.msra.mxu0 %v8476_v37  ;;  %4604 = vmatpush.msra.mxu1 %v8438_v6 }
 0x5c5   :  { %4406 = vmatpush.msrb.mxu2 %v8422_v63  ;;  %4495 = vmatpush.msrb.mxu3 %v4494_v46  ;;  %v4523_v46 = vsub.f32 %v8563_v52, %v9148_v14  ;;  %v4518_v58 = vand.u32 4294901760, %v4517_v47  ;;  %v8610_v14 = vand.u32 4294901760, %v3512_v40  ;;  %v8614_v47 = vsub.f32 %v3514_v12, %v8597_v5 }
 0x5c6   :  { %4563 = vmatpush.msra.mxu0 %v8490_v15  ;;  %4606 = vmatpush.msra.mxu1 %v8452_v59 }
 0x5c7   :  { %4408 = vmatpush.msrb.mxu2 %v8438_v6  ;;  %4501 = vmatpush.msrb.mxu3 %v4500_v49  ;;  %v4529_v49 = vsub.f32 %v8573_v30, %v9150_v34  ;;  %v3506_v34 = vld [vmem:[#allocation4 + $0x1a8] sm:$0xff] }
 0x5c8   :  { %4566 = vmatpush.msra.mxu0 %v8502_v39  ;;  %4608 = vmatpush.msra.mxu1 %v8470_v9 }
 0x5c9   :  { %4410 = vmatpush.msrb.mxu2 %v8452_v59  ;;  %4507 = vmatpush.msrb.mxu3 %v4506_v43  ;;  %v4524_v43 = vand.u32 4294901760, %v4523_v46  ;;  %v4530_v54 = vand.u32 4294901760, %v4529_v49  ;;  %v8631_v46 = vand.u32 4294901760, %v3506_v34  ;;  %v8636_v49 = vsub.f32 %v3510_v60, %v8618_v61 }
 0x5ca   :  { %4569 = vmatpush.msra.mxu0 %v8514_v29  ;;  %4610 = vmatpush.msra.mxu1 %v8483_v44 }
 0x5cb   :  { %4412 = vmatpush.msrb.mxu2 %v8470_v9  ;;  %4513 = vmatpush.msrb.mxu3 %v4512_v35  ;;  %v8627_v35 = vsub.f32 %v3512_v40, %v8610_v14  ;;  %9368 = vst [vmem:[#allocation29_spill] sm:$0xff] %v8636_v49  ;;  %v4780_v40 = vsub.f32 %v8606_v4, %v9156_v24  ;;  %v3500_v24 = vld [vmem:[#allocation4 + $0x178] sm:$0xff] }
 0x5cc   :  { %4572 = vmatpush.msra.mxu0 %v8526_v26  ;;  %4612 = vmatpush.msra.mxu1 %v8492_v56  ;;  %v8674_v1 = vand.u32 4294901760, %v3500_v24 }
 0x5cd   :  { %4414 = vmatpush.msrb.mxu2 %v8483_v44  ;;  %4519 = vmatpush.msrb.mxu3 %v4518_v58  ;;  %v3504_v58 = vld [vmem:[#allocation4 + $0x198] sm:$0xff]  ;;  %v4781_v20 = vand.u32 4294901760, %v4780_v40 }
 0x5ce   :  { %4575 = vmatpush.msra.mxu0 %v8539_v18  ;;  %4614 = vmatpush.msra.mxu1 %v8504_v0  ;;  %v8648_v36 = vand.u32 4294901760, %v3504_v58 }
 0x5cf   :  { %4416 = vmatpush.msrb.mxu2 %v8492_v56  ;;  %4525 = vmatpush.msrb.mxu3 %v4524_v43  ;;  %v8643_v43 = vsub.f32 %v3508_v3, %v8622_v27  ;;  %v8656_v3 = vsub.f32 %v3506_v34, %v8631_v46 }
 0x5d0   :  { %4578 = vmatpush.msra.mxu0 %v8551_v7  ;;  %4616 = vmatpush.msra.mxu1 %v8516_v17  ;;  %v8672_v12 = vsub.f32 %v3504_v58, %v8648_v36  ;;  %v8685_v58 = vsub.f32 %v3502_v32, %v8661_v21  ;;  %v8697_v32 = vsub.f32 %v3500_v24, %v8674_v1 }
 0x5d1   :  { %4418 = vmatpush.msrb.mxu2 %v8504_v0  ;;  %4531 = vmatpush.msrb.mxu3 %v4530_v54  ;;  %9369 = vst [vmem:[#allocation9_spill] sm:$0xff] %v8643_v43  ;;  %v9370_v54 = vand.u32 4294901760, %v8614_v47 }
 0x5d2   :  { %4581 = vmatpush.msra.mxu0 %v8563_v52  ;;  %4618 = vmatpush.msra.mxu1 %v8528_v25  ;;  %9371 = vst [vmem:[#allocation16_spill] sm:$0xff] %v8656_v3 }
 0x5d3   :  { %4533 = vmatmul.f32.vlgmr.msrb.gmra.mxu3 %v8151_v11  ;;  %4420 = vmatpush.msrb.mxu2 %v8516_v17  ;;  %v4786_v60 = vsub.f32 %v8614_v47, %v9370_v54  ;;  %v3498_v54 = vld [vmem:[#allocation4 + $0x168] sm:$0xff] }
 0x5d4   :  { %4700 = vmatpush.msra.mxu3 %v8375_v23  ;;  %4584 = vmatpush.msra.mxu0 %v8573_v30  ;;  %v9372_v23 = vand.u32 4294901760, %v8627_v35  ;;  %v8687_v62 = vand.u32 4294901760, %v3498_v54  ;;  %v3494_v30 = vld [vmem:[#allocation4 + $0x148] sm:$0xff] }
 0x5d5   :  { %4620 = vmatpush.msra.mxu1 %v8541_v22  ;;  %4587 = vmatmul.f32.vlgmr.msra.gmra.mxu0 %v8171_v38  ;;  %v4787_v38 = vand.u32 4294901760, %v4786_v60  ;;  %v9374_v60 = vand.u32 4294901760, %v8643_v43 }
 0x5d6   :  { %4702 = vmatpush.msra.mxu3 %v8377_v13  ;;  %4737 = vmatpush.msrb.mxu0 %v8589_v19  ;;  %v4792_v34 = vsub.f32 %v8627_v35, %v9372_v23  ;;  %v9373_v13 = vand.u32 4294901760, %v8636_v49  ;;  %v8709_v24 = vsub.f32 %v3498_v54, %v8687_v62 }
 0x5d7   :  { %4422 = vmatpush.msrb.mxu2 %v8528_v25  ;;  %4622 = vmatpush.msra.mxu1 %v8553_v2  ;;  %v4804_v40 = vsub.f32 %v8643_v43, %v9374_v60  ;;  %v3492_v43 = vld [vmem:[#allocation4 + $0x138] sm:$0xff] }
 0x5d8   :  { %4626 = vmatmul.f32.vlgmr.msra.gmra.mxu1 %v8187_v55  ;;  %4704 = vmatpush.msra.mxu3 %v8382_v48  ;;  %v4798_v23 = vsub.f32 %v8636_v49, %v9373_v13  ;;  %v4793_v55 = vand.u32 4294901760, %v4792_v34  ;;  %v8699_v13 = vand.u32 4294901760, %v3496_v51  ;;  %v8711_v48 = vand.u32 4294901760, %v3494_v30  ;;  %v3490_v49 = vld [vmem:[#allocation4 + $0x128] sm:$0xff]  ;;  %v3488_v34 = vld [vmem:[#allocation4 + $0x118] sm:$0xff] }
 0x5d9   :  { %4739 = vmatpush.msrb.mxu0 %v8597_v5  ;;  %4782 = vmatpush.msrb.mxu1 %v4781_v20  ;;  %v9375_v20 = vand.u32 4294901760, %v8656_v3 }
 0x5da   :  { %4424 = vmatpush.msrb.mxu2 %v8541_v22  ;;  %4706 = vmatpush.msra.mxu3 %v8387_v57  ;;  %v4799_v57 = vand.u32 4294901760, %v4798_v23  ;;  %v8722_v54 = vsub.f32 %v3496_v51, %v8699_v13  ;;  %v8735_v51 = vsub.f32 %v3494_v30, %v8711_v48 }
 0x5db   :  { %4741 = vmatpush.msrb.mxu0 %v8610_v14  ;;  %4788 = vmatpush.msrb.mxu1 %v4787_v38  ;;  %v4810_v60 = vsub.f32 %v8656_v3, %v9375_v20  ;;  %v4805_v38 = vand.u32 4294901760, %v4804_v40  ;;  %v9376_v20 = vand.u32 4294901760, %v8380_v10  ;;  %v8724_v3 = vand.u32 4294901760, %v3492_v43 }
 0x5dc   :  { %4426 = vmatpush.msrb.mxu2 %v8553_v2  ;;  %4708 = vmatpush.msra.mxu3 %v8400_v53  ;;  %v9377_v53 = vand.u32 4294901760, %v8672_v12  ;;  %v9378_v10 = vand.u32 4294901760, %v8385_v8  ;;  %v9379_v40 = vand.u32 4294901760, %v8685_v58  ;;  %v9380_v8 = vand.u32 4294901760, %v8396_v28 }
 0x5dd   :  { %4432 = vmatmul.f32.vlgmr.msrb.gmra.mxu2 %v8215_v42  ;;  %4743 = vmatpush.msrb.mxu0 %v8618_v61  ;;  %v4811_v42 = vand.u32 4294901760, %v4810_v60  ;;  %v9381_v60 = vand.u32 4294901760, %v8697_v32  ;;  %v8748_v30 = vsub.f32 %v3492_v43, %v8724_v3  ;;  %v9382_v28 = vand.u32 4294901760, %v8408_v31 }
 0x5de   :  { %4633 = vmatpush.msra.mxu2 %v9376_v20  ;;  %4794 = vmatpush.msrb.mxu1 %v4793_v55  ;;  %v4816_v23 = vsub.f32 %v8672_v12, %v9377_v53  ;;  %v4822_v55 = vsub.f32 %v8685_v58, %v9379_v40  ;;  %v4833_v20 = vand.u32 4294901760, %v8709_v24  ;;  %v8737_v53 = vand.u32 4294901760, %v3490_v49  ;;  %v3486_v40 = vld [vmem:[#allocation4 + $0x108] sm:$0xff] }
 0x5df   :  { %4710 = vmatpush.msra.mxu3 %v8422_v63  ;;  %4745 = vmatpush.msrb.mxu0 %v8622_v27  ;;  %v9383_v31 = vand.u32 4294901760, %v8429_v50 }
 0x5e0   :  { %4637 = vmatpush.msra.mxu2 %v9378_v10  ;;  %4800 = vmatpush.msrb.mxu1 %v4799_v57  ;;  %v4817_v63 = vand.u32 4294901760, %v4816_v23  ;;  %v4828_v57 = vsub.f32 %v8697_v32, %v9381_v60  ;;  %v4839_v10 = vand.u32 4294901760, %v8722_v54  ;;  %v4834_v23 = vsub.f32 %v8709_v24, %v4833_v20 }
 0x5e1   :  { %4712 = vmatpush.msra.mxu3 %v8438_v6  ;;  %4747 = vmatpush.msrb.mxu0 %v8631_v46  ;;  %v8752_v6 = vand.u32 4294901760, %v3488_v34  ;;  %v8761_v43 = vsub.f32 %v3490_v49, %v8737_v53  ;;  %v4851_v60 = vand.u32 4294901760, %v8748_v30  ;;  %v9384_v49 = vand.u32 4294901760, %v8450_v45 }
 0x5e2   :  { %4641 = vmatpush.msra.mxu2 %v9380_v8  ;;  %4806 = vmatpush.msrb.mxu1 %v4805_v38  ;;  %v4823_v38 = vand.u32 4294901760, %v4822_v55  ;;  %v4845_v8 = vand.u32 4294901760, %v8735_v51  ;;  %v4840_v55 = vsub.f32 %v8722_v54, %v4839_v10  ;;  %v4835_v50 = vand.u32 4294901760, %v4834_v23 }
 0x5e3   :  { %4714 = vmatpush.msra.mxu3 %v8452_v59  ;;  %4749 = vmatpush.msrb.mxu0 %v8648_v36  ;;  %v8765_v59 = vand.u32 4294901760, %v3486_v40 }
 0x5e4   :  { %4645 = vmatpush.msra.mxu2 %v9382_v28  ;;  %4812 = vmatpush.msrb.mxu1 %v4811_v42  ;;  %v4829_v42 = vand.u32 4294901760, %v4828_v57  ;;  %v4857_v57 = vand.u32 4294901760, %v8761_v43  ;;  %v4841_v45 = vand.u32 4294901760, %v4840_v55  ;;  %v4852_v28 = vsub.f32 %v8748_v30, %v4851_v60 }
 0x5e5   :  { %4716 = vmatpush.msra.mxu3 %v8470_v9  ;;  %4751 = vmatpush.msrb.mxu0 %v8661_v21  ;;  %v8776_v9 = vsub.f32 %v3488_v34, %v8752_v6  ;;  %v9385_v34 = vand.u32 4294901760, %v8466_v16  ;;  %v9390_v55 = vand.u32 4294901760, %v8526_v26  ;;  %v9393_v26 = vand.u32 4294901760, %v8551_v7  ;;  %v9397_v7 = vld [vmem:[#allocation14_spill] sm:$0xff] }
 0x5e6   :  { %4649 = vmatpush.msra.mxu2 %v9383_v31  ;;  %4818 = vmatpush.msrb.mxu1 %v4817_v63  ;;  %v4846_v63 = vsub.f32 %v8735_v51, %v4845_v8  ;;  %v4858_v16 = vsub.f32 %v8761_v43, %v4857_v57  ;;  %v4853_v31 = vand.u32 4294901760, %v4852_v28 }
 0x5e7   :  { %4718 = vmatpush.msra.mxu3 %v8483_v44  ;;  %4753 = vmatpush.msrb.mxu0 %v8674_v1  ;;  %v8787_v44 = vsub.f32 %v3486_v40, %v8765_v59 }
 0x5e8   :  { %4653 = vmatpush.msra.mxu2 %v9384_v49  ;;  %4824 = vmatpush.msrb.mxu1 %v4823_v38  ;;  %v9386_v38 = vand.u32 4294901760, %v8476_v37  ;;  %v4847_v40 = vand.u32 4294901760, %v4846_v63  ;;  %v9394_v49 = vand.u32 4294901760, %v8614_v47  ;;  %v9399_v63 = vld [vmem:[#allocation29_spill] sm:$0xff] }
 0x5e9   :  { %4720 = vmatpush.msra.mxu3 %v8492_v56  ;;  %4755 = vmatpush.msrb.mxu0 %v8687_v62  ;;  %v4863_v56 = vand.u32 4294901760, %v8776_v9  ;;  %v4869_v23 = vand.u32 4294901760, %v8787_v44 }
 0x5ea   :  { %4657 = vmatpush.msra.mxu2 %v9385_v34  ;;  %4830 = vmatpush.msrb.mxu1 %v4829_v42  ;;  %v9388_v42 = vand.u32 4294901760, %v8502_v39  ;;  %v9400_v34 = vand.u32 4294901760, %v9399_v63 }
 0x5eb   :  { %4722 = vmatpush.msra.mxu3 %v8504_v0  ;;  %4757 = vmatpush.msrb.mxu0 %v8699_v13  ;;  %v9387_v0 = vand.u32 4294901760, %v8490_v15  ;;  %v4864_v37 = vsub.f32 %v8776_v9, %v4863_v56  ;;  %v4870_v15 = vsub.f32 %v8787_v44, %v4869_v23 }
 0x5ec   :  { %4661 = vmatpush.msra.mxu2 %v9386_v38  ;;  %4836 = vmatpush.msrb.mxu1 %v4835_v50  ;;  %v9398_v50 = vand.u32 4294901760, %v9397_v7  ;;  %v9407_v38 = vand.u32 4294901760, %v8697_v32 }
 0x5ed   :  { %4724 = vmatpush.msra.mxu3 %v8516_v17  ;;  %4759 = vmatpush.msrb.mxu0 %v8711_v48  ;;  %v4859_v17 = vand.u32 4294901760, %v4858_v16  ;;  %v4865_v39 = vand.u32 4294901760, %v4864_v37  ;;  %v5262_v37 = vld [vmem:[%s9029_s1] sm:$0xff] }
 0x5ee   :  { %4665 = vmatpush.msra.mxu2 %v9387_v0  ;;  %4842 = vmatpush.msrb.mxu1 %v4841_v45 }
 0x5ef   :  { %4726 = vmatpush.msra.mxu3 %v8528_v25  ;;  %4761 = vmatpush.msrb.mxu0 %v8724_v3  ;;  %v9389_v25 = vand.u32 4294901760, %v8514_v29  ;;  %v9391_v29 = vand.u32 4294901760, %v8539_v18  ;;  %v9396_v18 = vand.u32 4294901760, %v8627_v35 }
 0x5f0   :  { %4669 = vmatpush.msra.mxu2 %v9388_v42  ;;  %4848 = vmatpush.msrb.mxu1 %v4847_v40  ;;  %v5288_v42 = vand.u32 4294901760, %v5262_v37 }
 0x5f1   :  { %4728 = vmatpush.msra.mxu3 %v8541_v22  ;;  %4763 = vmatpush.msrb.mxu0 %v8737_v53  ;;  %v4871_v22 = vand.u32 4294901760, %v4870_v15 }
 0x5f2   :  { %4673 = vmatpush.msra.mxu2 %v9389_v25  ;;  %4854 = vmatpush.msrb.mxu1 %v4853_v31 }
 0x5f3   :  { %4730 = vmatpush.msra.mxu3 %v8553_v2  ;;  %4765 = vmatpush.msrb.mxu0 %v8752_v6  ;;  %v9392_v2 = vand.u32 4294901760, %v8606_v4 }
 0x5f4   :  { %4677 = vmatpush.msra.mxu2 %v9390_v55  ;;  %4860 = vmatpush.msrb.mxu1 %v4859_v17  ;;  %v5316_v55 = vsub.f32 %v5262_v37, %v5288_v42 }
 0x5f5   :  { %4732 = vmatmul.f32.vlgmr.msra.gmra.mxu3 %v8151_v11  ;;  %4767 = vmatpush.msrb.mxu0 %v8765_v59 }
 0x5f6   :  { %4933 = vmatpush.msrb.mxu3 %v8589_v19  ;;  %4681 = vmatpush.msra.mxu2 %v9391_v29 }
 0x5f7   :  { %4866 = vmatpush.msrb.mxu1 %v4865_v39  ;;  %4773 = vmatmul.f32.vlgmr.msrb.gmra.mxu0 %v8444_v41  ;;  %v9395_v41 = vand.u32 4294901760, %v8563_v52 }
 0x5f8   :  { %4935 = vmatpush.msrb.mxu3 %v8597_v5  ;;  %4974 = vmatpush.msra.mxu0 %v9392_v2 }
 0x5f9   :  { %4685 = vmatpush.msra.mxu2 %v9393_v26  ;;  %4872 = vmatpush.msrb.mxu1 %v4871_v22  ;;  %v5317_v26 = vand.u32 4294901760, %v5316_v55 }
 0x5fa   :  { %4874 = vmatmul.f32.vlgmr.msrb.gmra.mxu1 %v8393_v33  ;;  %4937 = vmatpush.msrb.mxu3 %v8610_v14 }
 0x5fb   :  { %4978 = vmatpush.msra.mxu0 %v9394_v49  ;;  %5041 = vmatpush.msra.mxu1 %v8589_v19  ;;  %v9401_v19 = vld [vmem:[#allocation9_spill] sm:$0xff]  ;;  %v5318_v7 = vsub.f32 %v5316_v55, %v5317_v26 }
 0x5fc   :  { %4689 = vmatpush.msra.mxu2 %v9395_v41  ;;  %4939 = vmatpush.msrb.mxu3 %v8618_v61  ;;  %v9402_v52 = vand.u32 4294901760, %v9401_v19 }
 0x5fd   :  { %4982 = vmatpush.msra.mxu0 %v9396_v18  ;;  %5043 = vmatpush.msra.mxu1 %v8597_v5  ;;  %v3524_v5 = vld [vmem:[#allocation4 + $0x238] sm:$0xff]  ;;  %v5264_v18 = vld [vmem:[%s9035_s7] sm:$0xff] }
 0x5fe   :  { %4693 = vmatpush.msra.mxu2 %v9398_v50  ;;  %4941 = vmatpush.msrb.mxu3 %v8622_v27  ;;  %v8868_v28 = vand.u32 4294901760, %v3524_v5 }
 0x5ff   :  { %4695 = vmatmul.f32.vlgmr.msra.gmra.mxu2 %v8151_v11  ;;  %4986 = vmatpush.msra.mxu0 %v9400_v34  ;;  %v9403_v11 = vld [vmem:[#allocation16_spill] sm:$0xff]  ;;  %v5272_v34 = vsel %vm2550_vm4, %v5264_v18, 0 }
 0x600   :  { %4880 = vmatpush.msrb.mxu2 %v8606_v4  ;;  %5045 = vmatpush.msra.mxu1 %v8610_v14  ;;  %v9404_v45 = vand.u32 4294901760, %v9403_v11  ;;  %v3522_v14 = vld [vmem:[#allocation4 + $0x228] sm:$0xff]  ;;  %v9405_v4 = vand.u32 4294901760, %v8672_v12 }
 0x601   :  { %4943 = vmatpush.msrb.mxu3 %v8631_v46  ;;  %4990 = vmatpush.msra.mxu0 %v9402_v52 }
 0x602   :  { %4883 = vmatpush.msrb.mxu2 %v8614_v47  ;;  %5047 = vmatpush.msra.mxu1 %v8618_v61  ;;  %v3520_v47 = vld [vmem:[#allocation4 + $0x218] sm:$0xff]  ;;  %v9406_v61 = vand.u32 4294901760, %v8685_v58 }
 0x603   :  { %4945 = vmatpush.msrb.mxu3 %v8648_v36  ;;  %4994 = vmatpush.msra.mxu0 %v9404_v45  ;;  %v8885_v40 = vand.u32 4294901760, %v3520_v47 }
 0x604   :  { %4886 = vmatpush.msrb.mxu2 %v8627_v35  ;;  %5049 = vmatpush.msra.mxu1 %v8622_v27  ;;  %v8875_v35 = vand.u32 4294901760, %v3522_v14  ;;  %v3518_v27 = vld [vmem:[#allocation4 + $0x208] sm:$0xff] }
 0x605   :  { %4947 = vmatpush.msrb.mxu3 %v8661_v21  ;;  %4998 = vmatpush.msra.mxu0 %v9405_v4  ;;  %v8895_v16 = vand.u32 4294901760, %v3518_v27  ;;  %v8904_v0 = vsub.f32 %v3520_v47, %v8885_v40 }
 0x606   :  { %4889 = vmatpush.msrb.mxu2 %v9399_v63  ;;  %5051 = vmatpush.msra.mxu1 %v8631_v46  ;;  %v8883_v46 = vsub.f32 %v3524_v5, %v8868_v28  ;;  %v5319_v63 = vand.u32 4294901760, %v5318_v7 }
 0x607   :  { %4949 = vmatpush.msrb.mxu3 %v8674_v1  ;;  %5002 = vmatpush.msra.mxu0 %v9406_v61 }
 0x608   :  { %4892 = vmatpush.msrb.mxu2 %v9401_v19  ;;  %5053 = vmatpush.msra.mxu1 %v8648_v36  ;;  %v8893_v36 = vsub.f32 %v3522_v14, %v8875_v35 }
 0x609   :  { %4951 = vmatpush.msrb.mxu3 %v8687_v62  ;;  %5006 = vmatpush.msra.mxu0 %v9407_v38 }
 0x60a   :  { %4895 = vmatpush.msrb.mxu2 %v9403_v11  ;;  %5055 = vmatpush.msra.mxu1 %v8661_v21  ;;  %v5120_v21 = vand.u32 4294901760, %v8883_v46  ;;  %v8995_v11 = vand.u32 4294901760, %v5272_v34 }
 0x60b   :  { %4953 = vmatpush.msrb.mxu3 %v8699_v13  ;;  %5010 = vmatpush.msra.mxu0 %v4833_v20  ;;  %v9408_v20 = vld [vmem:[#allocation10_spill] sm:$0xff] }
 0x60c   :  { %4898 = vmatpush.msrb.mxu2 %v8672_v12  ;;  %5057 = vmatpush.msra.mxu1 %v8674_v1  ;;  %v5126_v1 = vand.u32 4294901760, %v8893_v36  ;;  %v8913_v12 = vsub.f32 %v3518_v27, %v8895_v16  ;;  %v8998_v47 = vsub.f32 %v5272_v34, %v8995_v11 }
 0x60d   :  { %4955 = vmatpush.msrb.mxu3 %v8711_v48  ;;  %5014 = vmatpush.msra.mxu0 %v4839_v10  ;;  %v3566_v10 = vpop.f32.mrf.mxu0 }
 0x60e   :  { %4901 = vmatpush.msrb.mxu2 %v8685_v58  ;;  %5059 = vmatpush.msra.mxu1 %v8687_v62  ;;  %v5121_v62 = vsub.f32 %v8883_v46, %v5120_v21  ;;  %v5132_v58 = vand.u32 4294901760, %v8904_v0  ;;  %v9001_v27 = vand.u32 4294901760, %v8998_v47 }
 0x60f   :  { %4957 = vmatpush.msrb.mxu3 %v8724_v3  ;;  %5018 = vmatpush.msra.mxu0 %v4845_v8  ;;  %v9410_v8 = vld [vmem:[#allocation24_spill] sm:$0xff] }
 0x610   :  { %4904 = vmatpush.msrb.mxu2 %v8697_v32  ;;  %5061 = vmatpush.msra.mxu1 %v8699_v13  ;;  %v5127_v32 = vsub.f32 %v8893_v36, %v5126_v1  ;;  %v5138_v13 = vand.u32 4294901760, %v8913_v12 }
 0x611   :  { %4959 = vmatpush.msrb.mxu3 %v8737_v53  ;;  %5022 = vmatpush.msra.mxu0 %v4851_v60  ;;  %v9412_v60 = vld [vmem:[#allocation26_spill] sm:$0xff] }
 0x612   :  { %4907 = vmatpush.msrb.mxu2 %v8709_v24  ;;  %5063 = vmatpush.msra.mxu1 %v8711_v48  ;;  %v5122_v48 = vand.u32 4294901760, %v5121_v62  ;;  %v5133_v24 = vsub.f32 %v8904_v0, %v5132_v58 }
 0x613   :  { %4961 = vmatpush.msrb.mxu3 %v8752_v6  ;;  %5026 = vmatpush.msra.mxu0 %v4857_v57  ;;  %v3760_v57 = vpop.f32.mrf.mxu3 }
 0x614   :  { %4910 = vmatpush.msrb.mxu2 %v8722_v54  ;;  %5065 = vmatpush.msra.mxu1 %v8724_v3  ;;  %v5128_v3 = vand.u32 4294901760, %v5127_v32  ;;  %v5139_v54 = vsub.f32 %v8913_v12, %v5138_v13 }
 0x615   :  { %4963 = vmatpush.msrb.mxu3 %v8765_v59  ;;  %5030 = vmatpush.msra.mxu0 %v4863_v56  ;;  %v9413_v56 = vld [vmem:[#allocation11_spill] sm:$0xff] }
 0x616   :  { %4913 = vmatpush.msrb.mxu2 %v8735_v51  ;;  %5067 = vmatpush.msra.mxu1 %v8737_v53  ;;  %v5134_v51 = vand.u32 4294901760, %v5133_v24  ;;  %v5140_v53 = vand.u32 4294901760, %v5139_v54 }
 0x617   :  { %4967 = vmatmul.f32.vlgmr.msrb.gmra.mxu3 %v9408_v20  ;;  %5034 = vmatpush.msra.mxu0 %v4869_v23 }
 0x618   :  { %4916 = vmatpush.msrb.mxu2 %v8748_v30  ;;  %5069 = vmatpush.msra.mxu1 %v8752_v6  ;;  %v9409_v30 = vld [vmem:[#allocation25_spill] sm:$0xff]  ;;  %v3667_v6 = vpop.f32.mrf.mxu1 }
 0x619   :  { %5123 = vmatpush.msra.mxu3 %v5122_v48  ;;  %5036 = vmatmul.f32.vlgmr.msra.gmra.mxu0 %v8393_v33 }
 0x61a   :  { %4919 = vmatpush.msrb.mxu2 %v8761_v43  ;;  %5071 = vmatpush.msra.mxu1 %v8765_v59  ;;  %v9411_v43 = vld [vmem:[#allocation32_spill] sm:$0xff]  ;;  %v3721_v59 = vpop.f32.mrf.mxu2 }
 0x61b   :  { %5129 = vmatpush.msra.mxu3 %v5128_v3  ;;  %5161 = vmatpush.msrb.mxu0 %v8883_v46 }
 0x61c   :  { %5073 = vmatmul.f32.vlgmr.msra.gmra.mxu1 %v8393_v33  ;;  %4922 = vmatpush.msrb.mxu2 %v8776_v9  ;;  %v3668_v33 = vadd.f32 %v3667_v6, %v3566_v10 }
 0x61d   :  { %5135 = vmatpush.msra.mxu3 %v5134_v51  ;;  %5164 = vmatpush.msrb.mxu0 %v8893_v36 }
 0x61e   :  { %5190 = vmatpush.msrb.mxu1 %v8868_v28  ;;  %4925 = vmatpush.msrb.mxu2 %v8787_v44  ;;  %v3722_v9 = vadd.f32 %v3721_v59, %v3668_v33  ;;  %v3829_v44 = vpop.f32.mrf.mxu0 }
 0x61f   :  { %5141 = vmatpush.msra.mxu3 %v5140_v53  ;;  %5167 = vmatpush.msrb.mxu0 %v8904_v0 }
 0x620   :  { %5192 = vmatpush.msrb.mxu1 %v8875_v35  ;;  %4928 = vmatmul.f32.vlgmr.msrb.gmra.mxu2 %v9409_v30  ;;  %v3761_v23 = vadd.f32 %v3760_v57, %v3722_v9  ;;  %v3866_v17 = vpop.f32.mrf.mxu1 }
 0x621   :  { %5143 = vmatmul.f32.vlgmr.msra.gmra.mxu3 %v9410_v8  ;;  %5090 = vmatpush.msra.mxu2 %v8868_v28 }
 0x622   :  { %5170 = vmatpush.msrb.mxu0 %v8913_v12  ;;  %5194 = vmatpush.msrb.mxu1 %v8885_v40  ;;  %v3830_v31 = vadd.f32 %v3829_v44, %v3761_v23 }
 0x623   :  { %5250 = vmatpush.msrb.mxu3 %v8868_v28  ;;  %5173 = vmatmul.f32.vlgmr.msrb.gmra.mxu0 %v9411_v43 }
 0x624   :  { %5092 = vmatpush.msra.mxu2 %v8875_v35  ;;  %5196 = vmatpush.msrb.mxu1 %v8895_v16  ;;  %v3867_v15 = vadd.f32 %v3866_v17, %v3830_v31 }
 0x625   :  { %5252 = vmatpush.msrb.mxu3 %v8875_v35  ;;  %5200 = vmatmul.f32.vlgmr.msrb.gmra.mxu1 %v9412_v60 }
 0x626   :  { %5094 = vmatpush.msra.mxu2 %v8885_v40  ;;  %5289 = vmatpush.msra.mxu0 %v5288_v42  ;;  %v4062_v2 = vpop.f32.mrf.mxu0 }
 0x627   :  { %5254 = vmatpush.msrb.mxu3 %v8885_v40  ;;  %5320 = vmatpush.msra.mxu1 %v5319_v63 }
 0x628   :  { %5096 = vmatpush.msra.mxu2 %v8895_v16  ;;  %v4101_v41 = vpop.f32.mrf.mxu1 }
 0x629   :  { %5256 = vmatpush.msrb.mxu3 %v8895_v16  ;;  %5102 = vmatmul.f32.vlgmr.msra.gmra.mxu2 %v9413_v56  ;;  %v4008_v22 = vpop.f32.mrf.mxu3  ;;  %v5295_v16 = vsub.f32 %v8998_v47, %v9001_v27 }
 0x62a   :  { %5258 = vmatmul.f32.vlgmr.msrb.gmra.mxu3 %v9410_v8  ;;  %5219 = vmatpush.msrb.mxu2 %v5120_v21 }
 0x62b   :  { %5373 = vmatpush.msra.mxu3 %v5288_v42  ;;  %v9005_v12 = vand.u32 4294901760, %v5295_v16 }
 0x62c   :  { %5223 = vmatpush.msrb.mxu2 %v5126_v1 }
 0x62e   :  { %5227 = vmatpush.msrb.mxu2 %v5132_v58  ;;  %v4236_v45 = vpop.f32.mrf.mxu0 }
 0x630   :  { %5231 = vmatpush.msrb.mxu2 %v5138_v13 }
 0x631   :  { %5233 = vmatmul.f32.vlgmr.msrb.gmra.mxu2 %v9410_v8  ;;  %v3907_v25 = vpop.f32.mrf.mxu2  ;;  %v4277_v4 = vpop.f32.mrf.mxu1  ;;  %v5263_v8 = vld [vmem:[%s9029_s1 + $0x8] sm:$0xff] }
 0x632   :  { %v3908_v39 = vadd.f32 %v3907_v25, %v3867_v15  ;;  %5348 = vmatpush.msra.mxu2 %v5316_v55  ;;  %v4207_v52 = vpop.f32.mrf.mxu3  ;;  %v5447_v33 = vand.u32 4294901760, %v5263_v8 }
 0x634   :  { %v4009_v29 = vadd.f32 %v4008_v22, %v3908_v39  ;;  %v5475_v60 = vsub.f32 %v5263_v8, %v5447_v33 }
 0x636   :  { %v4063_v49 = vadd.f32 %v4062_v2, %v4009_v29  ;;  %v5476_v9 = vand.u32 4294901760, %v5475_v60 }
 0x638   :  { %v4102_v50 = vadd.f32 %v4101_v41, %v4063_v49  ;;  %v4367_v36 = vpop.f32.mrf.mxu0  ;;  %v5477_v56 = vsub.f32 %v5475_v60, %v5476_v9 }
 0x63a   :  { %v5478_v31 = vand.u32 4294901760, %v5477_v56 }
 0x63b   :  { %v4334_v46 = vpop.f32.mrf.mxu3  ;;  %v4392_v0 = vpop.f32.mrf.mxu1 }
 0x63c   :  { %v4170_v19 = vpop.f32.mrf.mxu2 }
 0x63d   :  { %v4171_v5 = vadd.f32 %v4170_v19, %v4102_v50 }
 0x63f   :  { %v4208_v14 = vadd.f32 %v4207_v52, %v4171_v5 }
 0x641   :  { %v4237_v28 = vadd.f32 %v4236_v45, %v4208_v14 }
 0x643   :  { %v4278_v61 = vadd.f32 %v4277_v4, %v4237_v28 }
 0x645   :  { %v4307_v35 = vpop.f32.mrf.mxu2 }
 0x646   :  { %v4308_v38 = vadd.f32 %v4307_v35, %v4278_v61 }
 0x648   :  { %v4335_v40 = vadd.f32 %v4334_v46, %v4308_v38  ;;  %v5269_v38 = vpop.permute.xlu0 %5268 }
 0x64a   :  { %v4368_v21 = vadd.f32 %v4367_v36, %v4335_v40 }
 0x64c   :  { %v4393_v1 = vadd.f32 %v4392_v0, %v4368_v21 }
 0x64e   :  { %v5290_v62 = vand.u32 4294901760, %v4393_v1 }
 0x650   :  { %5291 = vmatpush.msra.mxu0 %v5290_v62  ;;  %5375 = vmatpush.msra.mxu3 %v5290_v62  ;;  %v5322_v58 = vsub.f32 %v4393_v1, %v5290_v62 }
 0x651   :  { %5297 = vmatmul.f32.vlgmr.msra.gmra.mxu0 %v9005_v12  ;;  %5379 = vmatmul.f32.vlgmr.msra.gmra.mxu3 %v9001_v27 }
 0x652   :  { %5351 = vmatpush.msra.mxu2 %v5322_v58  ;;  %5400 = vmatpush.msrb.mxu0 %v5317_v26  ;;  %v5323_v32 = vand.u32 4294901760, %v5322_v58  ;;  %v4588_v54 = vpop.f32.mrf.mxu0 }
 0x653   :  { %5354 = vmatmul.f32.vlgmr.msra.gmra.mxu2 %v8998_v47  ;;  %5479 = vmatpush.msrb.mxu3 %v5478_v31 }
 0x654   :  { %5404 = vmatpush.msrb.mxu0 %v5323_v32  ;;  %v5324_v13 = vsub.f32 %v5322_v58, %v5323_v32  ;;  %5448 = vmatpush.msrb.mxu2 %v5447_v33 }
 0x655   :  { %v4627_v53 = vpop.f32.mrf.mxu1 }
 0x656   :  { %v5325_v48 = vand.u32 4294901760, %v5324_v13  ;;  %v4534_v20 = vpop.f32.mrf.mxu3  ;;  %5507 = vmatpush.msra.mxu0 %v5475_v60 }
 0x658   :  { %5326 = vmatpush.msra.mxu1 %v5325_v48 }
 0x659   :  { %5328 = vmatmul.f32.vlgmr.msra.gmra.mxu1 %v8995_v11  ;;  %5406 = vmatmul.f32.vlgmr.msrb.gmra.mxu0 %v8995_v11 }
 0x65a   :  { %5425 = vmatpush.msrb.mxu1 %v5288_v42 }
 0x65c   :  { %5427 = vmatpush.msrb.mxu1 %v5290_v62 }
 0x65e   :  { %5532 = vmatpush.msra.mxu1 %v5447_v33 }
 0x660   :  { %v4433_v24 = vpop.f32.mrf.mxu2 }
 0x661   :  { %5429 = vmatmul.f32.vlgmr.msrb.gmra.mxu1 %v8995_v11  ;;  %v4535_v3 = vadd.f32 %v4534_v20, %v4433_v24 }
 0x663   :  { %v4589_v51 = vadd.f32 %v4588_v54, %v4535_v3 }
 0x665   :  { %v4628_v30 = vadd.f32 %v4627_v53, %v4589_v51 }
 0x674   :  { %v4774_v57 = vpop.f32.mrf.mxu0 }
 0x677   :  { %v4875_v23 = vpop.f32.mrf.mxu1 }
 0x678   :  { %v4733_v43 = vpop.f32.mrf.mxu3 }
 0x682   :  { %v4696_v10 = vpop.f32.mrf.mxu2 }
 0x683   :  { %v4697_v6 = vadd.f32 %v4696_v10, %v4628_v30 }
 0x685   :  { %v4734_v59 = vadd.f32 %v4733_v43, %v4697_v6 }
 0x687   :  { %v4775_v44 = vadd.f32 %v4774_v57, %v4734_v59 }
 0x689   :  { %v4876_v42 = vadd.f32 %v4875_v23, %v4775_v44 }
 0x696   :  { %v5037_v25 = vpop.f32.mrf.mxu0 }
 0x699   :  { %v5074_v55 = vpop.f32.mrf.mxu1 }
 0x69a   :  { %v4968_v37 = vpop.f32.mrf.mxu3 }
 0x6a0   :  { %v5174_v18 = vpop.f32.mrf.mxu0 }
 0x6a2   :  { %v5201_v50 = vpop.f32.mrf.mxu1 }
 0x6a3   :  { %v4929_v17 = vpop.f32.mrf.mxu2 }
 0x6a4   :  { %v4930_v15 = vadd.f32 %v4929_v17, %v4876_v42  ;;  %v5144_v2 = vpop.f32.mrf.mxu3 }
 0x6a6   :  { %v4969_v39 = vadd.f32 %v4968_v37, %v4930_v15 }
 0x6a8   :  { %v5038_v22 = vadd.f32 %v5037_v25, %v4969_v39 }
 0x6aa   :  { %v5075_v29 = vadd.f32 %v5074_v55, %v5038_v22 }
 0x6ac   :  { %v5103_v26 = vpop.f32.mrf.mxu2 }
 0x6ad   :  { %v5104_v49 = vadd.f32 %v5103_v26, %v5075_v29  ;;  %v5259_v52 = vpop.f32.mrf.mxu3 }
 0x6af   :  { %v5145_v41 = vadd.f32 %v5144_v2, %v5104_v49 }
 0x6b1   :  { %v5175_v7 = vadd.f32 %v5174_v18, %v5145_v41 }
 0x6b3   :  { %v5202_v63 = vadd.f32 %v5201_v50, %v5175_v7 }
 0x6b4   :  { %v5234_v34 = vpop.f32.mrf.mxu2 }
 0x6b5   :  { %v5235_v19 = vadd.f32 %v5234_v34, %v5202_v63 }
 0x6b7   :  { %v5260_v5 = vadd.f32 %v5259_v52, %v5235_v19 }
 0x6b9   :  { %v5449_v45 = vand.u32 4294901760, %v5260_v5 }
 0x6bb   :  { %5450 = vmatpush.msrb.mxu2 %v5449_v45  ;;  %5534 = vmatpush.msra.mxu1 %v5449_v45  ;;  %v5481_v14 = vsub.f32 %v5260_v5, %v5449_v45 }
 0x6bc   :  { %5456 = vmatmul.f32.vlgmr.msrb.gmra.mxu2 %v9005_v12  ;;  %5538 = vmatmul.f32.vlgmr.msra.gmra.mxu1 %v9001_v27 }
 0x6bd   :  { %5510 = vmatpush.msra.mxu0 %v5481_v14  ;;  %5559 = vmatpush.msra.mxu2 %v5476_v9  ;;  %v5482_v4 = vand.u32 4294901760, %v5481_v14 }
 0x6be   :  { %5513 = vmatmul.f32.vlgmr.msra.gmra.mxu0 %v8998_v47 }
 0x6bf   :  { %5563 = vmatpush.msra.mxu2 %v5482_v4  ;;  %v5483_v28 = vsub.f32 %v5481_v14, %v5482_v4 }
 0x6c1   :  { %v5484_v61 = vand.u32 4294901760, %v5483_v28 }
 0x6c3   :  { %5485 = vmatpush.msrb.mxu3 %v5484_v61 }
 0x6c4   :  { %5487 = vmatmul.f32.vlgmr.msrb.gmra.mxu3 %v8995_v11  ;;  %5565 = vmatmul.f32.vlgmr.msra.gmra.mxu2 %v8995_v11 }
 0x6c5   :  { %5584 = vmatpush.msra.mxu3 %v5447_v33 }
 0x6c7   :  { %5586 = vmatpush.msra.mxu3 %v5449_v45 }
 0x6cc   :  { %5588 = vmatmul.f32.vlgmr.msra.gmra.mxu3 %v8995_v11 }
 0x6ce   :  { %v5298_v35 = vpop.f32.mrf.mxu0 }
 0x6cf   :  { %v5299_v27 = vadd.f32 %v5298_v35, %v5269_v38 }
 0x6d4   :  { %v5380_v16 = vpop.f32.mrf.mxu3 }
 0x6d6   :  { %v5329_v46 = vpop.f32.mrf.mxu1  ;;  %v5355_v40 = vpop.f32.mrf.mxu2 }
 0x6d7   :  { %v5330_v36 = vadd.f32 %v5329_v46, %v5299_v27  ;;  %v5407_v21 = vpop.f32.mrf.mxu0 }
 0x6d9   :  { %v5356_v47 = vadd.f32 %v5355_v40, %v5330_v36 }
 0x6db   :  { %v5381_v0 = vadd.f32 %v5380_v16, %v5356_v47 }
 0x6dd   :  { %v5408_v1 = vadd.f32 %v5407_v21, %v5381_v0 }
 0x6de   :  { %v5430_v12 = vpop.f32.mrf.mxu1 }
 0x6df   :  { %v5431_v62 = vadd.f32 %v5430_v12, %v5408_v1 }
 0x6e1   :  { %5592 = vst [vmem:[%s9037_s9] sm:$0xff] %v5431_v62 }
 0x739   :  { %v5539_v24 = vpop.f32.mrf.mxu1 }
 0x73b   :  { %v5514_v13 = vpop.f32.mrf.mxu0 }
 0x73f   :  { %v5457_v58 = vpop.f32.mrf.mxu2 }
 0x740   :  { %v5458_v32 = vadd.f32 %v5457_v58, %v5269_v38 }
 0x747   :  { %v5488_v11 = vpop.f32.mrf.mxu3  ;;  %v5566_v3 = vpop.f32.mrf.mxu2 }
 0x748   :  { %v5489_v48 = vadd.f32 %v5488_v11, %v5458_v32 }
 0x74a   :  { %v5515_v20 = vadd.f32 %v5514_v13, %v5489_v48 }
 0x74c   :  { %v5540_v54 = vadd.f32 %v5539_v24, %v5515_v20 }
 0x74e   :  { %v5567_v51 = vadd.f32 %v5566_v3, %v5540_v54 }
 0x74f   :  { %v5589_v53 = vpop.f32.mrf.mxu3 }
 0x750   :  { %v5590_v10 = vadd.f32 %v5589_v53, %v5567_v51 }
 0x752   :  { %5593 = vst [vmem:[%s9037_s9 + $0x8] sm:$0xff] %v5590_v10 }
 0x753   :  { %5598 = vsyncpa [#allocation3], 1 }
 0x754   :  { %5599 = vsyncpa [#allocation5], 1 }

</bundles_post_ra>
